<compile_context>
chip_gen: v7x
topology: tpu7x:2x2x1
jax: 0.10.0
libtpu: 0.0.40
codegen_flags: <defaults>
</compile_context>

<pallas_src>
import math
import functools

import jax
import jax.numpy as jnp
from jax import lax
from jax.experimental import pallas as pl
from jax.experimental.pallas import tpu as pltpu


def _vmem_limit_bytes():
    # Generation-aware VMEM budget: ~75% of physical (96 MiB on v5e/v6e,
    # 48 MiB on v7x).  Fall back to a conservative 48 MiB if the query fails.
    try:
        cap = int(pltpu.get_tpu_info().vmem_capacity_bytes)
        return max(32 * 1024 * 1024, (cap * 3) // 4)
    except Exception:
        return 48 * 1024 * 1024


def _layernorm(x, w, b, eps=1e-5):
    mu = jnp.mean(x, axis=-1, keepdims=True)
    var = jnp.mean((x - mu) ** 2, axis=-1, keepdims=True)
    return (x - mu) * lax.rsqrt(var + eps) * w + b


def _gelu_tanh(x):
    c = math.sqrt(2.0 / math.pi)
    return 0.5 * x * (1.0 + jnp.tanh(c * (x + 0.044715 * x * x * x)))


# -----------------------------------------------------------------------------
# Kernel 1: per (batch, q-tile):  x1 = ln_1(x);  qkv = x1 @ W_qkv + b_qkv
# Emits x1 plus q/k/v in head-major (B, H, T, hd) layout; in bf16 mode the
# intermediates are stored in bf16 (all LayerNorm math stays in f32).
# -----------------------------------------------------------------------------
def ln1_qkv_kernel(x_ref, ln1_w_ref, ln1_b_ref, attn_w_ref, attn_b_ref,
                   x1_ref, q_ref, k_ref, v_ref):
    x = x_ref[0]                                   # (TQ, C) f32
    _, C = x.shape
    n_head, hd = q_ref.shape[1], q_ref.shape[3]

    x1 = _layernorm(x, ln1_w_ref[...], ln1_b_ref[...])
    x1_ref[0] = x1.astype(x1_ref.dtype)

    attn_w = attn_w_ref[...]
    qkv = jnp.dot(x1.astype(attn_w.dtype), attn_w,
                  preferred_element_type=jnp.float32) + attn_b_ref[...]
    qkv = qkv.astype(q_ref.dtype)

    for h in range(n_head):                        # static unroll: lane slices only
        q_ref[0, h] = qkv[:, h * hd:(h + 1) * hd]
        k_ref[0, h] = qkv[:, C + h * hd:C + (h + 1) * hd]
        v_ref[0, h] = qkv[:, 2 * C + h * hd:2 * C + (h + 1) * hd]
    # TODO(synk): at real GPT-2 sizes (hd=64) a lane-dense K layout
    # (B, H, hd, T) would avoid the masked per-head stores above.


# -----------------------------------------------------------------------------
# Kernel 2: per (batch, q-tile, kv-tile): flash-style causal attention update;
# on the last kv-tile: normalize, merge heads, output proj, residual, ln_2,
# MLP, residual.
# -----------------------------------------------------------------------------
def attn_mlp_kernel(x1_ref, q_ref, k_ref, v_ref,
                    pw_ref, pb_ref, ln2_w_ref, ln2_b_ref,
                    fc_w_ref, fc_b_ref, fcp_w_ref, fcp_b_ref,
                    o_ref,
                    m_ref, l_ref, acc_ref, att_ref,
                    *, approx_recip):
    qi = pl.program_id(1)
    ki = pl.program_id(2)
    nk = pl.num_programs(2)

    @pl.when(ki == 0)
    def _init():
        m_ref[...] = jnp.full(m_ref.shape, -jnp.inf, dtype=m_ref.dtype)
        l_ref[...] = jnp.zeros(l_ref.shape, dtype=l_ref.dtype)
        acc_ref[...] = jnp.zeros(acc_ref.shape, dtype=acc_ref.dtype)

    # Online-softmax update.  KV tiles strictly above the causal diagonal are
    # skipped entirely (their DMA is also elided via the clamped index_map).
    @pl.when(ki <= qi)
    def _update():
        q = q_ref[0]                               # (H, TQ, hd)
        k = k_ref[0]                               # (H, TK, hd)
        v = v_ref[0]                               # (H, TK, hd)
        _, TQ, hd = q.shape
        TK = k.shape[1]
        scale = 1.0 / math.sqrt(hd)

        s = jnp.einsum('htd,hsd->hts', q, k,
                       preferred_element_type=jnp.float32) * scale
        row = qi * TQ + lax.broadcasted_iota(jnp.int32, (TQ, TK), 0)
        col = ki * TK + lax.broadcasted_iota(jnp.int32, (TQ, TK), 1)
        s = jnp.where((col <= row)[None, :, :], s, -jnp.inf)

        m_prev = m_ref[...]                                      # (H, TQ, 1)
        m_new = jnp.maximum(m_prev, jnp.max(s, axis=-1, keepdims=True))
        alpha = jnp.exp(m_prev - m_new)
        p = jnp.exp(s - m_new)
        l_ref[...] = alpha * l_ref[...] + jnp.sum(p, axis=-1, keepdims=True)
        acc_ref[...] = alpha * acc_ref[...] + jnp.einsum(
            'hts,hsd->htd', p.astype(v.dtype), v,
            preferred_element_type=jnp.float32)
        m_ref[...] = m_new

    # Finalize once per q-tile: normalize, merge heads lane-dense, project,
    # residual, ln_2, MLP, residual.
    @pl.when(ki == nk - 1)
    def _finalize():
        n_head, TQ, hd = acc_ref.shape
        inv_l = pl.reciprocal(l_ref[...], approx=approx_recip)   # (H, TQ, 1)
        att = acc_ref[...] * inv_l                               # (H, TQ, hd) f32
        for h in range(n_head):                    # static unroll: lane slices
            att_ref[:, h * hd:(h + 1) * hd] = att[h]

        # Single full-C output projection (no per-head matmul/accumulate loop).
        pw = pw_ref[...]
        attn_out = jnp.dot(att_ref[...].astype(pw.dtype), pw,
                           preferred_element_type=jnp.float32) + pb_ref[...]

        x1 = x1_ref[0].astype(jnp.float32)         # (TQ, C)
        x2 = x1 + attn_out            # NOTE: residual uses ln_1 output (per spec)
        x3 = _layernorm(x2, ln2_w_ref[...], ln2_b_ref[...])

        fc_w = fc_w_ref[...]
        h1 = jnp.dot(x3.astype(fc_w.dtype), fc_w,
                     preferred_element_type=jnp.float32) + fc_b_ref[...]
        h1 = _gelu_tanh(h1)
        fcp_w = fcp_w_ref[...]
        mlp_out = jnp.dot(h1.astype(fcp_w.dtype), fcp_w,
                          preferred_element_type=jnp.float32) + fcp_b_ref[...]

        o_ref[0] = (x3 + mlp_out).astype(o_ref.dtype)


def _const_spec(a, single_buffer):
    """Spec for a grid-invariant input (fetched once, never re-fetched)."""
    nd = a.ndim
    idx = lambda *_: (0,) * nd
    if single_buffer:
        return pl.BlockSpec(a.shape, idx, pipeline_mode=pl.Buffered(1))
    return pl.BlockSpec(a.shape, idx)


@functools.partial(jax.jit,
                   static_argnames=("n_head", "tq", "use_bf16_matmul",
                                    "single_buffer_weights"))
def _block_forward_impl(x, params, n_head, tq, use_bf16_matmul,
                        single_buffer_weights):
    (ln1_w, ln1_b, attn_w, attn_b, attn_pw, attn_pb,
     ln2_w, ln2_b, fc_w, fc_b, fcp_w, fcp_b) = params
    B, T, C = x.shape
    assert C % n_head == 0
    hd = C // n_head
    if tq is None:
        tq = T if T <= 128 else 128
    assert T % tq == 0
    nq = T // tq
    tk = tq                      # KV tile == Q tile (keeps the causal clamp simple)
    nk = T // tk
    vmem_limit = _vmem_limit_bytes()

    # MXU weight operands and the inter-kernel intermediates (x1/q/k/v) in
    # bf16; LayerNorm / softmax / GELU math and matmul accumulation stay f32.
    w_dtype = jnp.bfloat16 if use_bf16_matmul else x.dtype
    w_bytes = 2 if use_bf16_matmul else 4
    attn_w_m = attn_w.astype(w_dtype)
    pw_m = attn_pw.astype(w_dtype)
    fc_w_m = fc_w.astype(w_dtype)
    fcp_w_m = fcp_w.astype(w_dtype)

    cspec = functools.partial(_const_spec, single_buffer=single_buffer_weights)

    # ---- kernel 1: ln_1 + fused qkv projection -------------------------------
    k1_cost = pl.CostEstimate(
        flops=2 * B * T * C * 3 * C,
        transcendentals=B * T,
        bytes_accessed=4 * B * T * C + 3 * C * C * w_bytes + 4 * B * T * C * w_bytes)
    x1, q, k, v = pl.pallas_call(
        ln1_qkv_kernel,
        out_shape=(
            jax.ShapeDtypeStruct((B, T, C), w_dtype),
            jax.ShapeDtypeStruct((B, n_head, T, hd), w_dtype),
            jax.ShapeDtypeStruct((B, n_head, T, hd), w_dtype),
            jax.ShapeDtypeStruct((B, n_head, T, hd), w_dtype),
        ),
        grid=(B, nq),
        in_specs=[pl.BlockSpec((1, tq, C), lambda b, i: (b, i, 0)),
                  cspec(ln1_w), cspec(ln1_b), cspec(attn_w_m), cspec(attn_b)],
        out_specs=(pl.BlockSpec((1, tq, C), lambda b, i: (b, i, 0)),
                   pl.BlockSpec((1, n_head, tq, hd), lambda b, i: (b, 0, i, 0)),
                   pl.BlockSpec((1, n_head, tq, hd), lambda b, i: (b, 0, i, 0)),
                   pl.BlockSpec((1, n_head, tq, hd), lambda b, i: (b, 0, i, 0))),
        compiler_params=pltpu.CompilerParams(
            dimension_semantics=("parallel", "parallel"),
            vmem_limit_bytes=vmem_limit),
        cost_estimate=k1_cost,
    )(x, ln1_w, ln1_b, attn_w_m, attn_b)

    # ---- kernel 2: flash attention over KV tiles + proj + ln_2 + MLP ---------
    def kv_map(b, qi, ki):
        # Clamp to the causal diagonal: masked KV tiles re-use the previous
        # block index, so their HBM->VMEM copy is elided.
        return (b, 0, jnp.minimum(ki, qi), 0)

    k2_cost = pl.CostEstimate(
        flops=2 * B * T * T * C + 2 * B * T * 9 * C * C,
        transcendentals=B * n_head * T * T // 2 + 8 * B * T * C,
        bytes_accessed=(4 + 4 * w_bytes) * B * T * C + 9 * C * C * w_bytes)

    out_dtype = x.dtype
    # Alias the x1 buffer with the output only when dtypes match (f32 path);
    # index maps for x1 and the output are identical per grid step.
    io_alias = {0: 0} if jnp.dtype(w_dtype) == jnp.dtype(out_dtype) else {}

    out = pl.pallas_call(
        functools.partial(attn_mlp_kernel, approx_recip=bool(use_bf16_matmul)),
        out_shape=jax.ShapeDtypeStruct((B, T, C), out_dtype),
        grid=(B, nq, nk),
        in_specs=[
            pl.BlockSpec((1, tq, C), lambda b, qi, ki: (b, qi, 0)),              # x1
            pl.BlockSpec((1, n_head, tq, hd), lambda b, qi, ki: (b, 0, qi, 0)),  # q
            pl.BlockSpec((1, n_head, tk, hd), kv_map),                           # k tile
            pl.BlockSpec((1, n_head, tk, hd), kv_map),                           # v tile
            cspec(pw_m), cspec(attn_pb), cspec(ln2_w), cspec(ln2_b),
            cspec(fc_w_m), cspec(fc_b), cspec(fcp_w_m), cspec(fcp_b)],
        out_specs=pl.BlockSpec((1, tq, C), lambda b, qi, ki: (b, qi, 0)),
        scratch_shapes=[
            pltpu.VMEM((n_head, tq, 1), jnp.float32),    # running max
            pltpu.VMEM((n_head, tq, 1), jnp.float32),    # running sum
            pltpu.VMEM((n_head, tq, hd), jnp.float32),   # attention accumulator
            pltpu.VMEM((tq, C), jnp.float32),            # lane-dense merged heads
        ],
        input_output_aliases=io_alias,
        compiler_params=pltpu.CompilerParams(
            dimension_semantics=("parallel", "parallel", "arbitrary"),
            vmem_limit_bytes=vmem_limit),
        cost_estimate=k2_cost,
    )(x1, q, k, v, pw_m, attn_pb, ln2_w, ln2_b, fc_w_m, fc_b, fcp_w_m, fcp_b)
    return out


def block_forward(x, params, n_head, tq=None, use_bf16_matmul=True):
    """GPT-2 `Block` forward as two fused Pallas TPU kernels."""
    try:
        return _block_forward_impl(x, params, n_head=n_head, tq=tq,
                                   use_bf16_matmul=use_bf16_matmul,
                                   single_buffer_weights=True)
    except Exception:
        # pl.Buffered(1) (single-buffered grid-invariant weights) may be
        # unavailable on older jax; fall back to default double buffering.
        return _block_forward_impl(x, params, n_head=n_head, tq=tq,
                                   use_bf16_matmul=use_bf16_matmul,
                                   single_buffer_weights=False)


def reference_forward(x, params, n_head):
    (ln1_w, ln1_b, attn_w, attn_b, attn_pw, attn_pb,
     ln2_w, ln2_b, fc_w, fc_b, fcp_w, fcp_b) = params
    B, T, C = x.shape
    hd = C // n_head

    x1 = _layernorm(x, ln1_w, ln1_b)
    qkv = x1 @ attn_w + attn_b
    q, k, v = jnp.split(qkv, 3, axis=-1)
    q = q.reshape(B, T, n_head, hd).transpose(0, 2, 1, 3)
    k = k.reshape(B, T, n_head, hd).transpose(0, 2, 1, 3)
    v = v.reshape(B, T, n_head, hd).transpose(0, 2, 1, 3)
    att = jnp.einsum("bhtd,bhsd->bhts", q, k) / math.sqrt(hd)
    mask = jnp.tril(jnp.ones((T, T), dtype=bool))
    att = jnp.where(mask, att, -jnp.inf)
    att = jax.nn.softmax(att, axis=-1)
    out = jnp.einsum("bhts,bhsd->bhtd", att, v).transpose(0, 2, 1, 3).reshape(B, T, C)
    out = out @ attn_pw + attn_pb
    x2 = x1 + out
    x3 = _layernorm(x2, ln2_w, ln2_b)
    h = _gelu_tanh(x3 @ fc_w + fc_b)
    return x3 + (h @ fcp_w + fcp_b)


if __name__ == "__main__":
    # Small GPT-2-like block; tq < T exercises the q-tile grid, multiple KV
    # tiles exercise the online-softmax path and the causal tile skip.
    B, T, C, n_head, TQ = 2, 32, 64, 4, 8

    key = jax.random.PRNGKey(0)
    ks = jax.random.split(key, 9)

    x = jax.random.normal(ks[0], (B, T, C), dtype=jnp.float32)

    ln1_w = jnp.ones((1, C), jnp.float32)
    ln1_b = jnp.zeros((1, C), jnp.float32)
    ln2_w = jnp.ones((1, C), jnp.float32)
    ln2_b = jnp.zeros((1, C), jnp.float32)
    attn_w  = 0.02 * jax.random.normal(ks[1], (C, 3 * C), jnp.float32)
    attn_b  = 0.02 * jax.random.normal(ks[2], (1, 3 * C), jnp.float32)
    attn_pw = 0.02 * jax.random.normal(ks[3], (C, C), jnp.float32)
    attn_pb = 0.02 * jax.random.normal(ks[4], (1, C), jnp.float32)
    fc_w    = 0.02 * jax.random.normal(ks[5], (C, 4 * C), jnp.float32)
    fc_b    = 0.02 * jax.random.normal(ks[6], (1, 4 * C), jnp.float32)
    fcp_w   = 0.02 * jax.random.normal(ks[7], (4 * C, C), jnp.float32)
    fcp_b   = 0.02 * jax.random.normal(ks[8], (1, C), jnp.float32)

    params = (ln1_w, ln1_b, attn_w, attn_b, attn_pw, attn_pb,
              ln2_w, ln2_b, fc_w, fc_b, fcp_w, fcp_b)

    ref = reference_forward(x, params, n_head)

    # f32 path: strict check against the JAX reference.
    out = block_forward(x, params, n_head=n_head, tq=TQ, use_bf16_matmul=False)
    out = jax.block_until_ready(out)
    assert out.shape == (B, T, C)
    assert jnp.allclose(out, ref, rtol=1e-4, atol=1e-4), "f32 kernel mismatch vs JAX reference"

    # bf16 production path (default): looser check.
    out_bf16 = block_forward(x, params, n_head=n_head, tq=TQ, use_bf16_matmul=True)
    out_bf16 = jax.block_until_ready(out_bf16)
    assert jnp.allclose(out_bf16, ref, rtol=5e-2, atol=5e-2), "bf16 kernel mismatch vs JAX reference"

    print("KERNEL_OK")
</pallas_src>

<mosaic_0001>
module attributes {stable_mosaic.version = 11 : i64} {
  func.func @ln1_qkv_kernel(%arg0: i32, %arg1: i32, %arg2: memref<1x8x64xf32, #tpu.memory_space<vmem>>, %arg3: memref<1x64xf32, #tpu.memory_space<vmem>>, %arg4: memref<1x64xf32, #tpu.memory_space<vmem>>, %arg5: memref<64x192xf32, #tpu.memory_space<vmem>>, %arg6: memref<1x192xf32, #tpu.memory_space<vmem>>, %arg7: memref<1x8x64xf32, #tpu.memory_space<vmem>>, %arg8: memref<1x4x8x16xf32, #tpu.memory_space<vmem>>, %arg9: memref<1x4x8x16xf32, #tpu.memory_space<vmem>>, %arg10: memref<1x4x8x16xf32, #tpu.memory_space<vmem>>) attributes {dimension_semantics = [#tpu.dimension_semantics<parallel>, #tpu.dimension_semantics<parallel>], iteration_bounds = array<i64: 2, 4>, scalar_prefetch = 0 : i64, scratch_operands = 0 : i64, tpu.core_type = #tpu.core_type<tc>, window_params = [{transform_indices = @transform_0, window_bounds = array<i64: 1, 8, 64>}, {pipeline_mode = #tpu.pipeline_mode<synchronous>, transform_indices = @transform_1, window_bounds = array<i64: 1, 64>}, {pipeline_mode = #tpu.pipeline_mode<synchronous>, transform_indices = @transform_2, window_bounds = array<i64: 1, 64>}, {pipeline_mode = #tpu.pipeline_mode<synchronous>, transform_indices = @transform_3, window_bounds = array<i64: 64, 192>}, {pipeline_mode = #tpu.pipeline_mode<synchronous>, transform_indices = @transform_4, window_bounds = array<i64: 1, 192>}, {transform_indices = @transform_5, window_bounds = array<i64: 1, 8, 64>}, {transform_indices = @transform_6, window_bounds = array<i64: 1, 4, 8, 16>}, {transform_indices = @transform_7, window_bounds = array<i64: 1, 4, 8, 16>}, {transform_indices = @transform_8, window_bounds = array<i64: 1, 4, 8, 16>}]} {
    %c0 = arith.constant 0 : index
    %c0_0 = arith.constant 0 : index
    %c0_1 = arith.constant 0 : index
    %0 = vector.load %arg2[%c0, %c0_0, %c0_1] : memref<1x8x64xf32, #tpu.memory_space<vmem>>, vector<1x8x64xf32>
    %1 = vector.shape_cast %0 : vector<1x8x64xf32> to vector<8x64xf32>
    %c0_2 = arith.constant 0 : index
    %c0_3 = arith.constant 0 : index
    %2 = vector.load %arg3[%c0_2, %c0_3] : memref<1x64xf32, #tpu.memory_space<vmem>>, vector<1x64xf32>
    %c0_4 = arith.constant 0 : index
    %c0_5 = arith.constant 0 : index
    %3 = vector.load %arg4[%c0_4, %c0_5] : memref<1x64xf32, #tpu.memory_space<vmem>>, vector<1x64xf32>
    %cst = arith.constant dense<0.000000e+00> : vector<8xf32>
    %4 = vector.multi_reduction <add>, %1, %cst [1] : vector<8x64xf32> to vector<8xf32>
    %5 = vector.shape_cast %4 : vector<8xf32> to vector<8x1xf32>
    %cst_6 = arith.constant 6.400000e+01 : f32
    %6 = vector.broadcast %cst_6 : f32 to vector<8x1xf32>
    %7 = arith.divf %5, %6 : vector<8x1xf32>
    %8 = vector.broadcast %7 : vector<8x1xf32> to vector<8x64xf32>
    %9 = arith.subf %1, %8 : vector<8x64xf32>
    %10 = arith.mulf %9, %9 : vector<8x64xf32>
    %cst_7 = arith.constant dense<0.000000e+00> : vector<8xf32>
    %11 = vector.multi_reduction <add>, %10, %cst_7 [1] : vector<8x64xf32> to vector<8xf32>
    %12 = vector.shape_cast %11 : vector<8xf32> to vector<8x1xf32>
    %cst_8 = arith.constant 6.400000e+01 : f32
    %13 = vector.broadcast %cst_8 : f32 to vector<8x1xf32>
    %14 = arith.divf %12, %13 : vector<8x1xf32>
    %15 = vector.broadcast %7 : vector<8x1xf32> to vector<8x64xf32>
    %16 = arith.subf %1, %15 : vector<8x64xf32>
    %cst_9 = arith.constant 9.99999974E-6 : f32
    %17 = vector.broadcast %cst_9 : f32 to vector<8x1xf32>
    %18 = arith.addf %14, %17 : vector<8x1xf32>
    %19 = math.rsqrt %18 : vector<8x1xf32>
    %20 = vector.broadcast %19 : vector<8x1xf32> to vector<8x64xf32>
    %21 = arith.mulf %16, %20 : vector<8x64xf32>
    %22 = vector.broadcast %2 : vector<1x64xf32> to vector<8x64xf32>
    %23 = arith.mulf %21, %22 : vector<8x64xf32>
    %24 = vector.broadcast %3 : vector<1x64xf32> to vector<8x64xf32>
    %25 = arith.addf %23, %24 : vector<8x64xf32>
    %c0_10 = arith.constant 0 : index
    %c0_11 = arith.constant 0 : index
    %c0_12 = arith.constant 0 : index
    %26 = vector.load %arg7[%c0_10, %c0_11, %c0_12] : memref<1x8x64xf32, #tpu.memory_space<vmem>>, vector<1x8x64xf32>
    %27 = vector.shape_cast %26 : vector<1x8x64xf32> to vector<8x64xf32>
    %28 = vector.shape_cast %25 : vector<8x64xf32> to vector<1x8x64xf32>
    tpu.vector_store %arg7[%c0_10, %c0_11, %c0_12], %28 {strides = array<i32>} : memref<1x8x64xf32, #tpu.memory_space<vmem>>, vector<1x8x64xf32>,
    %c0_13 = arith.constant 0 : index
    %c0_14 = arith.constant 0 : index
    %29 = vector.load %arg5[%c0_13, %c0_14] : memref<64x192xf32, #tpu.memory_space<vmem>>, vector<64x192xf32>
    %cst_15 = arith.constant dense<0.000000e+00> : vector<8x192xf32>
    %30 = tpu.matmul %25, %29, %cst_15 {dimension_numbers = #tpu.dot_dimension_numbers<[1], [0], [0], [1], [0, 0, 1, 1], [], []>} : vector<8x64xf32>, vector<64x192xf32>, vector<8x192xf32> -> vector<8x192xf32>
    %c0_16 = arith.constant 0 : index
    %c0_17 = arith.constant 0 : index
    %31 = vector.load %arg6[%c0_16, %c0_17] : memref<1x192xf32, #tpu.memory_space<vmem>>, vector<1x192xf32>
    %32 = vector.broadcast %31 : vector<1x192xf32> to vector<8x192xf32>
    %33 = arith.addf %30, %32 : vector<8x192xf32>
    %34 = vector.extract_strided_slice %33 {offsets = [0, 0], sizes = [8, 16], strides = [1, 1]} : vector<8x192xf32> to vector<8x16xf32>
    %c0_18 = arith.constant 0 : index
    %c0_19 = arith.constant 0 : index
    %c0_20 = arith.constant 0 : index
    %c0_21 = arith.constant 0 : index
    %35 = vector.load %arg8[%c0_18, %c0_19, %c0_20, %c0_21] : memref<1x4x8x16xf32, #tpu.memory_space<vmem>>, vector<1x1x8x16xf32>
    %36 = vector.shape_cast %35 : vector<1x1x8x16xf32> to vector<8x16xf32>
    %37 = vector.shape_cast %34 : vector<8x16xf32> to vector<1x1x8x16xf32>
    tpu.vector_store %arg8[%c0_18, %c0_19, %c0_20, %c0_21], %37 {strides = array<i32>} : memref<1x4x8x16xf32, #tpu.memory_space<vmem>>, vector<1x1x8x16xf32>,
    %38 = vector.extract_strided_slice %33 {offsets = [0, 64], sizes = [8, 16], strides = [1, 1]} : vector<8x192xf32> to vector<8x16xf32>
    %c0_22 = arith.constant 0 : index
    %c0_23 = arith.constant 0 : index
    %c0_24 = arith.constant 0 : index
    %c0_25 = arith.constant 0 : index
    %39 = vector.load %arg9[%c0_22, %c0_23, %c0_24, %c0_25] : memref<1x4x8x16xf32, #tpu.memory_space<vmem>>, vector<1x1x8x16xf32>
    %40 = vector.shape_cast %39 : vector<1x1x8x16xf32> to vector<8x16xf32>
    %41 = vector.shape_cast %38 : vector<8x16xf32> to vector<1x1x8x16xf32>
    tpu.vector_store %arg9[%c0_22, %c0_23, %c0_24, %c0_25], %41 {strides = array<i32>} : memref<1x4x8x16xf32, #tpu.memory_space<vmem>>, vector<1x1x8x16xf32>,
    %42 = vector.extract_strided_slice %33 {offsets = [0, 128], sizes = [8, 16], strides = [1, 1]} : vector<8x192xf32> to vector<8x16xf32>
    %c0_26 = arith.constant 0 : index
    %c0_27 = arith.constant 0 : index
    %c0_28 = arith.constant 0 : index
    %c0_29 = arith.constant 0 : index
    %43 = vector.load %arg10[%c0_26, %c0_27, %c0_28, %c0_29] : memref<1x4x8x16xf32, #tpu.memory_space<vmem>>, vector<1x1x8x16xf32>
    %44 = vector.shape_cast %43 : vector<1x1x8x16xf32> to vector<8x16xf32>
    %45 = vector.shape_cast %42 : vector<8x16xf32> to vector<1x1x8x16xf32>
    tpu.vector_store %arg10[%c0_26, %c0_27, %c0_28, %c0_29], %45 {strides = array<i32>} : memref<1x4x8x16xf32, #tpu.memory_space<vmem>>, vector<1x1x8x16xf32>,
    %46 = vector.extract_strided_slice %33 {offsets = [0, 16], sizes = [8, 16], strides = [1, 1]} : vector<8x192xf32> to vector<8x16xf32>
    %c0_30 = arith.constant 0 : index
    %c1 = arith.constant 1 : index
    %c0_31 = arith.constant 0 : index
    %c0_32 = arith.constant 0 : index
    %47 = vector.load %arg8[%c0_30, %c1, %c0_31, %c0_32] : memref<1x4x8x16xf32, #tpu.memory_space<vmem>>, vector<1x1x8x16xf32>
    %48 = vector.shape_cast %47 : vector<1x1x8x16xf32> to vector<8x16xf32>
    %49 = vector.shape_cast %46 : vector<8x16xf32> to vector<1x1x8x16xf32>
    tpu.vector_store %arg8[%c0_30, %c1, %c0_31, %c0_32], %49 {strides = array<i32>} : memref<1x4x8x16xf32, #tpu.memory_space<vmem>>, vector<1x1x8x16xf32>,
    %50 = vector.extract_strided_slice %33 {offsets = [0, 80], sizes = [8, 16], strides = [1, 1]} : vector<8x192xf32> to vector<8x16xf32>
    %c0_33 = arith.constant 0 : index
    %c1_34 = arith.constant 1 : index
    %c0_35 = arith.constant 0 : index
    %c0_36 = arith.constant 0 : index
    %51 = vector.load %arg9[%c0_33, %c1_34, %c0_35, %c0_36] : memref<1x4x8x16xf32, #tpu.memory_space<vmem>>, vector<1x1x8x16xf32>
    %52 = vector.shape_cast %51 : vector<1x1x8x16xf32> to vector<8x16xf32>
    %53 = vector.shape_cast %50 : vector<8x16xf32> to vector<1x1x8x16xf32>
    tpu.vector_store %arg9[%c0_33, %c1_34, %c0_35, %c0_36], %53 {strides = array<i32>} : memref<1x4x8x16xf32, #tpu.memory_space<vmem>>, vector<1x1x8x16xf32>,
    %54 = vector.extract_strided_slice %33 {offsets = [0, 144], sizes = [8, 16], strides = [1, 1]} : vector<8x192xf32> to vector<8x16xf32>
    %c0_37 = arith.constant 0 : index
    %c1_38 = arith.constant 1 : index
    %c0_39 = arith.constant 0 : index
    %c0_40 = arith.constant 0 : index
    %55 = vector.load %arg10[%c0_37, %c1_38, %c0_39, %c0_40] : memref<1x4x8x16xf32, #tpu.memory_space<vmem>>, vector<1x1x8x16xf32>
    %56 = vector.shape_cast %55 : vector<1x1x8x16xf32> to vector<8x16xf32>
    %57 = vector.shape_cast %54 : vector<8x16xf32> to vector<1x1x8x16xf32>
    tpu.vector_store %arg10[%c0_37, %c1_38, %c0_39, %c0_40], %57 {strides = array<i32>} : memref<1x4x8x16xf32, #tpu.memory_space<vmem>>, vector<1x1x8x16xf32>,
    %58 = vector.extract_strided_slice %33 {offsets = [0, 32], sizes = [8, 16], strides = [1, 1]} : vector<8x192xf32> to vector<8x16xf32>
    %c0_41 = arith.constant 0 : index
    %c2 = arith.constant 2 : index
    %c0_42 = arith.constant 0 : index
    %c0_43 = arith.constant 0 : index
    %59 = vector.load %arg8[%c0_41, %c2, %c0_42, %c0_43] : memref<1x4x8x16xf32, #tpu.memory_space<vmem>>, vector<1x1x8x16xf32>
    %60 = vector.shape_cast %59 : vector<1x1x8x16xf32> to vector<8x16xf32>
    %61 = vector.shape_cast %58 : vector<8x16xf32> to vector<1x1x8x16xf32>
    tpu.vector_store %arg8[%c0_41, %c2, %c0_42, %c0_43], %61 {strides = array<i32>} : memref<1x4x8x16xf32, #tpu.memory_space<vmem>>, vector<1x1x8x16xf32>,
    %62 = vector.extract_strided_slice %33 {offsets = [0, 96], sizes = [8, 16], strides = [1, 1]} : vector<8x192xf32> to vector<8x16xf32>
    %c0_44 = arith.constant 0 : index
    %c2_45 = arith.constant 2 : index
    %c0_46 = arith.constant 0 : index
    %c0_47 = arith.constant 0 : index
    %63 = vector.load %arg9[%c0_44, %c2_45, %c0_46, %c0_47] : memref<1x4x8x16xf32, #tpu.memory_space<vmem>>, vector<1x1x8x16xf32>
    %64 = vector.shape_cast %63 : vector<1x1x8x16xf32> to vector<8x16xf32>
    %65 = vector.shape_cast %62 : vector<8x16xf32> to vector<1x1x8x16xf32>
    tpu.vector_store %arg9[%c0_44, %c2_45, %c0_46, %c0_47], %65 {strides = array<i32>} : memref<1x4x8x16xf32, #tpu.memory_space<vmem>>, vector<1x1x8x16xf32>,
    %66 = vector.extract_strided_slice %33 {offsets = [0, 160], sizes = [8, 16], strides = [1, 1]} : vector<8x192xf32> to vector<8x16xf32>
    %c0_48 = arith.constant 0 : index
    %c2_49 = arith.constant 2 : index
    %c0_50 = arith.constant 0 : index
    %c0_51 = arith.constant 0 : index
    %67 = vector.load %arg10[%c0_48, %c2_49, %c0_50, %c0_51] : memref<1x4x8x16xf32, #tpu.memory_space<vmem>>, vector<1x1x8x16xf32>
    %68 = vector.shape_cast %67 : vector<1x1x8x16xf32> to vector<8x16xf32>
    %69 = vector.shape_cast %66 : vector<8x16xf32> to vector<1x1x8x16xf32>
    tpu.vector_store %arg10[%c0_48, %c2_49, %c0_50, %c0_51], %69 {strides = array<i32>} : memref<1x4x8x16xf32, #tpu.memory_space<vmem>>, vector<1x1x8x16xf32>,
    %70 = vector.extract_strided_slice %33 {offsets = [0, 48], sizes = [8, 16], strides = [1, 1]} : vector<8x192xf32> to vector<8x16xf32>
    %c0_52 = arith.constant 0 : index
    %c3 = arith.constant 3 : index
    %c0_53 = arith.constant 0 : index
    %c0_54 = arith.constant 0 : index
    %71 = vector.load %arg8[%c0_52, %c3, %c0_53, %c0_54] : memref<1x4x8x16xf32, #tpu.memory_space<vmem>>, vector<1x1x8x16xf32>
    %72 = vector.shape_cast %71 : vector<1x1x8x16xf32> to vector<8x16xf32>
    %73 = vector.shape_cast %70 : vector<8x16xf32> to vector<1x1x8x16xf32>
    tpu.vector_store %arg8[%c0_52, %c3, %c0_53, %c0_54], %73 {strides = array<i32>} : memref<1x4x8x16xf32, #tpu.memory_space<vmem>>, vector<1x1x8x16xf32>,
    %74 = vector.extract_strided_slice %33 {offsets = [0, 112], sizes = [8, 16], strides = [1, 1]} : vector<8x192xf32> to vector<8x16xf32>
    %c0_55 = arith.constant 0 : index
    %c3_56 = arith.constant 3 : index
    %c0_57 = arith.constant 0 : index
    %c0_58 = arith.constant 0 : index
    %75 = vector.load %arg9[%c0_55, %c3_56, %c0_57, %c0_58] : memref<1x4x8x16xf32, #tpu.memory_space<vmem>>, vector<1x1x8x16xf32>
    %76 = vector.shape_cast %75 : vector<1x1x8x16xf32> to vector<8x16xf32>
    %77 = vector.shape_cast %74 : vector<8x16xf32> to vector<1x1x8x16xf32>
    tpu.vector_store %arg9[%c0_55, %c3_56, %c0_57, %c0_58], %77 {strides = array<i32>} : memref<1x4x8x16xf32, #tpu.memory_space<vmem>>, vector<1x1x8x16xf32>,
    %78 = vector.extract_strided_slice %33 {offsets = [0, 176], sizes = [8, 16], strides = [1, 1]} : vector<8x192xf32> to vector<8x16xf32>
    %c0_59 = arith.constant 0 : index
    %c3_60 = arith.constant 3 : index
    %c0_61 = arith.constant 0 : index
    %c0_62 = arith.constant 0 : index
    %79 = vector.load %arg10[%c0_59, %c3_60, %c0_61, %c0_62] : memref<1x4x8x16xf32, #tpu.memory_space<vmem>>, vector<1x1x8x16xf32>
    %80 = vector.shape_cast %79 : vector<1x1x8x16xf32> to vector<8x16xf32>
    %81 = vector.shape_cast %78 : vector<8x16xf32> to vector<1x1x8x16xf32>
    tpu.vector_store %arg10[%c0_59, %c3_60, %c0_61, %c0_62], %81 {strides = array<i32>} : memref<1x4x8x16xf32, #tpu.memory_space<vmem>>, vector<1x1x8x16xf32>,
    return
  }
  func.func @transform_0(%arg0: i32, %arg1: i32) -> (i32, i32, i32) {
    %c0_i32 = arith.constant 0 : i32
    %c0_i32_0 = arith.constant 0 : i32
    return %arg0, %arg1, %c0_i32 : i32, i32, i32
  }
  func.func @transform_1(%arg0: i32, %arg1: i32) -> (i32, i32) {
    %c0_i32 = arith.constant 0 : i32
    %c0_i32_0 = arith.constant 0 : i32
    %c0_i32_1 = arith.constant 0 : i32
    return %c0_i32, %c0_i32_0 : i32, i32
  }
  func.func @transform_2(%arg0: i32, %arg1: i32) -> (i32, i32) {
    %c0_i32 = arith.constant 0 : i32
    %c0_i32_0 = arith.constant 0 : i32
    %c0_i32_1 = arith.constant 0 : i32
    return %c0_i32, %c0_i32_0 : i32, i32
  }
  func.func @transform_3(%arg0: i32, %arg1: i32) -> (i32, i32) {
    %c0_i32 = arith.constant 0 : i32
    %c0_i32_0 = arith.constant 0 : i32
    %c0_i32_1 = arith.constant 0 : i32
    return %c0_i32, %c0_i32_0 : i32, i32
  }
  func.func @transform_4(%arg0: i32, %arg1: i32) -> (i32, i32) {
    %c0_i32 = arith.constant 0 : i32
    %c0_i32_0 = arith.constant 0 : i32
    %c0_i32_1 = arith.constant 0 : i32
    return %c0_i32, %c0_i32_0 : i32, i32
  }
  func.func @transform_5(%arg0: i32, %arg1: i32) -> (i32, i32, i32) {
    %c0_i32 = arith.constant 0 : i32
    %c0_i32_0 = arith.constant 0 : i32
    return %arg0, %arg1, %c0_i32 : i32, i32, i32
  }
  func.func @transform_6(%arg0: i32, %arg1: i32) -> (i32, i32, i32, i32) {
    %c0_i32 = arith.constant 0 : i32
    %c0_i32_0 = arith.constant 0 : i32
    %c0_i32_1 = arith.constant 0 : i32
    return %arg0, %c0_i32, %arg1, %c0_i32_0 : i32, i32, i32, i32
  }
  func.func @transform_7(%arg0: i32, %arg1: i32) -> (i32, i32, i32, i32) {
    %c0_i32 = arith.constant 0 : i32
    %c0_i32_0 = arith.constant 0 : i32
    %c0_i32_1 = arith.constant 0 : i32
    return %arg0, %c0_i32, %arg1, %c0_i32_0 : i32, i32, i32, i32
  }
  func.func @transform_8(%arg0: i32, %arg1: i32) -> (i32, i32, i32, i32) {
    %c0_i32 = arith.constant 0 : i32
    %c0_i32_0 = arith.constant 0 : i32
    %c0_i32_1 = arith.constant 0 : i32
    return %arg0, %c0_i32, %arg1, %c0_i32_0 : i32, i32, i32, i32
  }
}

module attributes {stable_mosaic.version = 11 : i64} {
  func.func @attn_mlp_kernel(%arg0: i32, %arg1: i32, %arg2: i32, %arg3: memref<1x8x64xf32, #tpu.memory_space<vmem>>, %arg4: memref<1x4x8x16xf32, #tpu.memory_space<vmem>>, %arg5: memref<1x4x8x16xf32, #tpu.memory_space<vmem>>, %arg6: memref<1x4x8x16xf32, #tpu.memory_space<vmem>>, %arg7: memref<64x64xf32, #tpu.memory_space<vmem>>, %arg8: memref<1x64xf32, #tpu.memory_space<vmem>>, %arg9: memref<1x64xf32, #tpu.memory_space<vmem>>, %arg10: memref<1x64xf32, #tpu.memory_space<vmem>>, %arg11: memref<64x256xf32, #tpu.memory_space<vmem>>, %arg12: memref<1x256xf32, #tpu.memory_space<vmem>>, %arg13: memref<256x64xf32, #tpu.memory_space<vmem>>, %arg14: memref<1x64xf32, #tpu.memory_space<vmem>>, %arg15: memref<1x8x64xf32, #tpu.memory_space<vmem>>, %arg16: memref<4x8x1xf32, #tpu.memory_space<vmem>>, %arg17: memref<4x8x1xf32, #tpu.memory_space<vmem>>, %arg18: memref<4x8x16xf32, #tpu.memory_space<vmem>>, %arg19: memref<8x64xf32, #tpu.memory_space<vmem>>) attributes {dimension_semantics = [#tpu.dimension_semantics<parallel>, #tpu.dimension_semantics<parallel>, #tpu.dimension_semantics<arbitrary>], iteration_bounds = array<i64: 2, 4, 4>, scalar_prefetch = 0 : i64, scratch_operands = 4 : i64, tpu.core_type = #tpu.core_type<tc>, window_params = [{transform_indices = @transform_0, window_bounds = array<i64: 1, 8, 64>}, {transform_indices = @transform_1, window_bounds = array<i64: 1, 4, 8, 16>}, {transform_indices = @transform_2, window_bounds = array<i64: 1, 4, 8, 16>}, {transform_indices = @transform_3, window_bounds = array<i64: 1, 4, 8, 16>}, {pipeline_mode = #tpu.pipeline_mode<synchronous>, transform_indices = @transform_4, window_bounds = array<i64: 64, 64>}, {pipeline_mode = #tpu.pipeline_mode<synchronous>, transform_indices = @transform_5, window_bounds = array<i64: 1, 64>}, {pipeline_mode = #tpu.pipeline_mode<synchronous>, transform_indices = @transform_6, window_bounds = array<i64: 1, 64>}, {pipeline_mode = #tpu.pipeline_mode<synchronous>, transform_indices = @transform_7, window_bounds = array<i64: 1, 64>}, {pipeline_mode = #tpu.pipeline_mode<synchronous>, transform_indices = @transform_8, window_bounds = array<i64: 64, 256>}, {pipeline_mode = #tpu.pipeline_mode<synchronous>, transform_indices = @transform_9, window_bounds = array<i64: 1, 256>}, {pipeline_mode = #tpu.pipeline_mode<synchronous>, transform_indices = @transform_10, window_bounds = array<i64: 256, 64>}, {pipeline_mode = #tpu.pipeline_mode<synchronous>, transform_indices = @transform_11, window_bounds = array<i64: 1, 64>}, {transform_indices = @transform_12, window_bounds = array<i64: 1, 8, 64>}]} {
    %c0_i32 = arith.constant 0 : i32
    %0 = arith.cmpi eq, %arg2, %c0_i32 : i32
    %1 = arith.extui %0 : i1 to i32
    %c0_i32_0 = arith.constant 0 : i32
    %2 = arith.cmpi ne, %1, %c0_i32_0 : i32
    scf.if %2 {
      %cst = arith.constant 0xFF800000 : f32
      %9 = vector.broadcast %cst : f32 to vector<4x8x1xf32>
      %c0 = arith.constant 0 : index
      %c0_3 = arith.constant 0 : index
      %c0_4 = arith.constant 0 : index
      %10 = vector.load %arg16[%c0, %c0_3, %c0_4] : memref<4x8x1xf32, #tpu.memory_space<vmem>>, vector<4x8x1xf32>
      tpu.vector_store %arg16[%c0, %c0_3, %c0_4], %9 {strides = array<i32>} : memref<4x8x1xf32, #tpu.memory_space<vmem>>, vector<4x8x1xf32>,
      %cst_5 = arith.constant 0.000000e+00 : f32
      %11 = vector.broadcast %cst_5 : f32 to vector<4x8x1xf32>
      %c0_6 = arith.constant 0 : index
      %c0_7 = arith.constant 0 : index
      %c0_8 = arith.constant 0 : index
      %12 = vector.load %arg17[%c0_6, %c0_7, %c0_8] : memref<4x8x1xf32, #tpu.memory_space<vmem>>, vector<4x8x1xf32>
      tpu.vector_store %arg17[%c0_6, %c0_7, %c0_8], %11 {strides = array<i32>} : memref<4x8x1xf32, #tpu.memory_space<vmem>>, vector<4x8x1xf32>,
      %cst_9 = arith.constant 0.000000e+00 : f32
      %13 = vector.broadcast %cst_9 : f32 to vector<4x8x16xf32>
      %c0_10 = arith.constant 0 : index
      %c0_11 = arith.constant 0 : index
      %c0_12 = arith.constant 0 : index
      %14 = vector.load %arg18[%c0_10, %c0_11, %c0_12] : memref<4x8x16xf32, #tpu.memory_space<vmem>>, vector<4x8x16xf32>
      tpu.vector_store %arg18[%c0_10, %c0_11, %c0_12], %13 {strides = array<i32>} : memref<4x8x16xf32, #tpu.memory_space<vmem>>, vector<4x8x16xf32>,
    } else {
    }
    %3 = arith.cmpi sle, %arg2, %arg1 : i32
    %4 = arith.extui %3 : i1 to i32
    %c0_i32_1 = arith.constant 0 : i32
    %5 = arith.cmpi ne, %4, %c0_i32_1 : i32
    scf.if %5 {
      %c0 = arith.constant 0 : index
      %c0_3 = arith.constant 0 : index
      %c0_4 = arith.constant 0 : index
      %c0_5 = arith.constant 0 : index
      %9 = vector.load %arg4[%c0, %c0_3, %c0_4, %c0_5] : memref<1x4x8x16xf32, #tpu.memory_space<vmem>>, vector<1x4x8x16xf32>
      %10 = vector.shape_cast %9 : vector<1x4x8x16xf32> to vector<4x8x16xf32>
      %c0_6 = arith.constant 0 : index
      %c0_7 = arith.constant 0 : index
      %c0_8 = arith.constant 0 : index
      %c0_9 = arith.constant 0 : index
      %11 = vector.load %arg5[%c0_6, %c0_7, %c0_8, %c0_9] : memref<1x4x8x16xf32, #tpu.memory_space<vmem>>, vector<1x4x8x16xf32>
      %12 = vector.shape_cast %11 : vector<1x4x8x16xf32> to vector<4x8x16xf32>
      %c0_10 = arith.constant 0 : index
      %c0_11 = arith.constant 0 : index
      %c0_12 = arith.constant 0 : index
      %c0_13 = arith.constant 0 : index
      %13 = vector.load %arg6[%c0_10, %c0_11, %c0_12, %c0_13] : memref<1x4x8x16xf32, #tpu.memory_space<vmem>>, vector<1x4x8x16xf32>
      %14 = vector.shape_cast %13 : vector<1x4x8x16xf32> to vector<4x8x16xf32>
      "tpu.trace_start"() <{level = 10 : i32, message = "htd,hsd->hts"}> : () -> ()
      %cst = arith.constant dense<0.000000e+00> : vector<4x8x8xf32>
      %15 = tpu.matmul %10, %12, %cst {dimension_numbers = #tpu.dot_dimension_numbers<[2], [2], [1], [1], [0, 0, 0, 1, 1, 1], [0], [0]>} : vector<4x8x16xf32>, vector<4x8x16xf32>, vector<4x8x8xf32> -> vector<4x8x8xf32>
      "tpu.trace_stop"() : () -> ()
      %cst_14 = arith.constant 2.500000e-01 : f32
      %16 = vector.broadcast %cst_14 : f32 to vector<4x8x8xf32>
      %17 = arith.mulf %15, %16 : vector<4x8x8xf32>
      %c8_i32 = arith.constant 8 : i32
      %18 = arith.muli %arg1, %c8_i32 : i32
      %19 = tpu.iota {dimensions = array<i32: 0>} : vector<8x8xi32>
      %20 = vector.broadcast %18 : i32 to vector<8x8xi32>
      %21 = arith.addi %20, %19 : vector<8x8xi32>
      %c8_i32_15 = arith.constant 8 : i32
      %22 = arith.muli %arg2, %c8_i32_15 : i32
      %23 = tpu.iota {dimensions = array<i32: 1>} : vector<8x8xi32>
      %24 = vector.broadcast %22 : i32 to vector<8x8xi32>
      %25 = arith.addi %24, %23 : vector<8x8xi32>
      %26 = arith.cmpi sle, %25, %21 : vector<8x8xi32>
      %27 = vector.shape_cast %26 : vector<8x8xi1> to vector<1x8x8xi1>
      %cst_16 = arith.constant 0xFF800000 : f32
      %28 = vector.shape_cast %27 : vector<1x8x8xi1> to vector<1x8x8xi1>
      %29 = vector.broadcast %28 : vector<1x8x8xi1> to vector<4x8x8xi1>
      %30 = vector.broadcast %cst_16 : f32 to vector<4x8x8xf32>
      %31 = arith.select %29, %17, %30 : vector<4x8x8xi1>, vector<4x8x8xf32>
      %c0_17 = arith.constant 0 : index
      %c0_18 = arith.constant 0 : index
      %c0_19 = arith.constant 0 : index
      %32 = vector.load %arg16[%c0_17, %c0_18, %c0_19] : memref<4x8x1xf32, #tpu.memory_space<vmem>>, vector<4x8x1xf32>
      %cst_20 = arith.constant dense<0xFF800000> : vector<4x8xf32>
      %33 = vector.multi_reduction <maximumf>, %31, %cst_20 [2] : vector<4x8x8xf32> to vector<4x8xf32>
      %34 = vector.shape_cast %33 : vector<4x8xf32> to vector<4x8x1xf32>
      %35 = arith.maximumf %32, %34 : vector<4x8x1xf32>
      %36 = arith.subf %32, %35 : vector<4x8x1xf32>
      %37 = math.exp %36 : vector<4x8x1xf32>
      %38 = vector.broadcast %35 : vector<4x8x1xf32> to vector<4x8x8xf32>
      %39 = arith.subf %31, %38 : vector<4x8x8xf32>
      %40 = math.exp %39 : vector<4x8x8xf32>
      %c0_21 = arith.constant 0 : index
      %c0_22 = arith.constant 0 : index
      %c0_23 = arith.constant 0 : index
      %41 = vector.load %arg17[%c0_21, %c0_22, %c0_23] : memref<4x8x1xf32, #tpu.memory_space<vmem>>, vector<4x8x1xf32>
      %42 = arith.mulf %37, %41 : vector<4x8x1xf32>
      %cst_24 = arith.constant dense<0.000000e+00> : vector<4x8xf32>
      %43 = vector.multi_reduction <add>, %40, %cst_24 [2] : vector<4x8x8xf32> to vector<4x8xf32>
      %44 = vector.shape_cast %43 : vector<4x8xf32> to vector<4x8x1xf32>
      %45 = arith.addf %42, %44 : vector<4x8x1xf32>
      %c0_25 = arith.constant 0 : index
      %c0_26 = arith.constant 0 : index
      %c0_27 = arith.constant 0 : index
      %46 = vector.load %arg17[%c0_25, %c0_26, %c0_27] : memref<4x8x1xf32, #tpu.memory_space<vmem>>, vector<4x8x1xf32>
      tpu.vector_store %arg17[%c0_25, %c0_26, %c0_27], %45 {strides = array<i32>} : memref<4x8x1xf32, #tpu.memory_space<vmem>>, vector<4x8x1xf32>,
      %c0_28 = arith.constant 0 : index
      %c0_29 = arith.constant 0 : index
      %c0_30 = arith.constant 0 : index
      %47 = vector.load %arg18[%c0_28, %c0_29, %c0_30] : memref<4x8x16xf32, #tpu.memory_space<vmem>>, vector<4x8x16xf32>
      %48 = vector.broadcast %37 : vector<4x8x1xf32> to vector<4x8x16xf32>
      %49 = arith.mulf %48, %47 : vector<4x8x16xf32>
      "tpu.trace_start"() <{level = 10 : i32, message = "hts,hsd->htd"}> : () -> ()
      %cst_31 = arith.constant dense<0.000000e+00> : vector<4x8x16xf32>
      %50 = tpu.matmul %40, %14, %cst_31 {dimension_numbers = #tpu.dot_dimension_numbers<[2], [1], [1], [2], [0, 0, 0, 1, 1, 2], [0], [0]>} : vector<4x8x8xf32>, vector<4x8x16xf32>, vector<4x8x16xf32> -> vector<4x8x16xf32>
      "tpu.trace_stop"() : () -> ()
      %51 = arith.addf %49, %50 : vector<4x8x16xf32>
      %c0_32 = arith.constant 0 : index
      %c0_33 = arith.constant 0 : index
      %c0_34 = arith.constant 0 : index
      %52 = vector.load %arg18[%c0_32, %c0_33, %c0_34] : memref<4x8x16xf32, #tpu.memory_space<vmem>>, vector<4x8x16xf32>
      tpu.vector_store %arg18[%c0_32, %c0_33, %c0_34], %51 {strides = array<i32>} : memref<4x8x16xf32, #tpu.memory_space<vmem>>, vector<4x8x16xf32>,
      %c0_35 = arith.constant 0 : index
      %c0_36 = arith.constant 0 : index
      %c0_37 = arith.constant 0 : index
      %53 = vector.load %arg16[%c0_35, %c0_36, %c0_37] : memref<4x8x1xf32, #tpu.memory_space<vmem>>, vector<4x8x1xf32>
      tpu.vector_store %arg16[%c0_35, %c0_36, %c0_37], %35 {strides = array<i32>} : memref<4x8x1xf32, #tpu.memory_space<vmem>>, vector<4x8x1xf32>,
    } else {
    }
    %c3_i32 = arith.constant 3 : i32
    %6 = arith.cmpi eq, %arg2, %c3_i32 : i32
    %7 = arith.extui %6 : i1 to i32
    %c0_i32_2 = arith.constant 0 : i32
    %8 = arith.cmpi ne, %7, %c0_i32_2 : i32
    scf.if %8 {
      %c0 = arith.constant 0 : index
      %c0_3 = arith.constant 0 : index
      %c0_4 = arith.constant 0 : index
      %9 = vector.load %arg17[%c0, %c0_3, %c0_4] : memref<4x8x1xf32, #tpu.memory_space<vmem>>, vector<4x8x1xf32>
      %10 = tpu.reciprocal %9 : vector<4x8x1xf32> -> vector<4x8x1xf32>
      %c0_5 = arith.constant 0 : index
      %c0_6 = arith.constant 0 : index
      %c0_7 = arith.constant 0 : index
      %11 = vector.load %arg18[%c0_5, %c0_6, %c0_7] : memref<4x8x16xf32, #tpu.memory_space<vmem>>, vector<4x8x16xf32>
      %12 = vector.broadcast %10 : vector<4x8x1xf32> to vector<4x8x16xf32>
      %13 = arith.mulf %11, %12 : vector<4x8x16xf32>
      %14 = vector.extract_strided_slice %13 {offsets = [0, 0, 0], sizes = [1, 8, 16], strides = [1, 1, 1]} : vector<4x8x16xf32> to vector<1x8x16xf32>
      %15 = vector.shape_cast %14 : vector<1x8x16xf32> to vector<8x16xf32>
      %c0_8 = arith.constant 0 : index
      %c0_9 = arith.constant 0 : index
      %16 = vector.load %arg19[%c0_8, %c0_9] : memref<8x64xf32, #tpu.memory_space<vmem>>, vector<8x16xf32>
      tpu.vector_store %arg19[%c0_8, %c0_9], %15 {strides = array<i32>} : memref<8x64xf32, #tpu.memory_space<vmem>>, vector<8x16xf32>,
      %17 = vector.extract_strided_slice %13 {offsets = [1, 0, 0], sizes = [1, 8, 16], strides = [1, 1, 1]} : vector<4x8x16xf32> to vector<1x8x16xf32>
      %18 = vector.shape_cast %17 : vector<1x8x16xf32> to vector<8x16xf32>
      %c0_10 = arith.constant 0 : index
      %c16 = arith.constant 16 : index
      %19 = vector.load %arg19[%c0_10, %c16] : memref<8x64xf32, #tpu.memory_space<vmem>>, vector<8x16xf32>
      tpu.vector_store %arg19[%c0_10, %c16], %18 {strides = array<i32>} : memref<8x64xf32, #tpu.memory_space<vmem>>, vector<8x16xf32>,
      %20 = vector.extract_strided_slice %13 {offsets = [2, 0, 0], sizes = [1, 8, 16], strides = [1, 1, 1]} : vector<4x8x16xf32> to vector<1x8x16xf32>
      %21 = vector.shape_cast %20 : vector<1x8x16xf32> to vector<8x16xf32>
      %c0_11 = arith.constant 0 : index
      %c32 = arith.constant 32 : index
      %22 = vector.load %arg19[%c0_11, %c32] : memref<8x64xf32, #tpu.memory_space<vmem>>, vector<8x16xf32>
      tpu.vector_store %arg19[%c0_11, %c32], %21 {strides = array<i32>} : memref<8x64xf32, #tpu.memory_space<vmem>>, vector<8x16xf32>,
      %23 = vector.extract_strided_slice %13 {offsets = [3, 0, 0], sizes = [1, 8, 16], strides = [1, 1, 1]} : vector<4x8x16xf32> to vector<1x8x16xf32>
      %24 = vector.shape_cast %23 : vector<1x8x16xf32> to vector<8x16xf32>
      %c0_12 = arith.constant 0 : index
      %c48 = arith.constant 48 : index
      %25 = vector.load %arg19[%c0_12, %c48] : memref<8x64xf32, #tpu.memory_space<vmem>>, vector<8x16xf32>
      tpu.vector_store %arg19[%c0_12, %c48], %24 {strides = array<i32>} : memref<8x64xf32, #tpu.memory_space<vmem>>, vector<8x16xf32>,
      %c0_13 = arith.constant 0 : index
      %c0_14 = arith.constant 0 : index
      %26 = vector.load %arg7[%c0_13, %c0_14] : memref<64x64xf32, #tpu.memory_space<vmem>>, vector<64x64xf32>
      %c0_15 = arith.constant 0 : index
      %c0_16 = arith.constant 0 : index
      %27 = vector.load %arg19[%c0_15, %c0_16] : memref<8x64xf32, #tpu.memory_space<vmem>>, vector<8x64xf32>
      %cst = arith.constant dense<0.000000e+00> : vector<8x64xf32>
      %28 = tpu.matmul %27, %26, %cst {dimension_numbers = #tpu.dot_dimension_numbers<[1], [0], [0], [1], [0, 0, 1, 1], [], []>} : vector<8x64xf32>, vector<64x64xf32>, vector<8x64xf32> -> vector<8x64xf32>
      %c0_17 = arith.constant 0 : index
      %c0_18 = arith.constant 0 : index
      %29 = vector.load %arg8[%c0_17, %c0_18] : memref<1x64xf32, #tpu.memory_space<vmem>>, vector<1x64xf32>
      %30 = vector.broadcast %29 : vector<1x64xf32> to vector<8x64xf32>
      %31 = arith.addf %28, %30 : vector<8x64xf32>
      %c0_19 = arith.constant 0 : index
      %c0_20 = arith.constant 0 : index
      %c0_21 = arith.constant 0 : index
      %32 = vector.load %arg3[%c0_19, %c0_20, %c0_21] : memref<1x8x64xf32, #tpu.memory_space<vmem>>, vector<1x8x64xf32>
      %33 = vector.shape_cast %32 : vector<1x8x64xf32> to vector<8x64xf32>
      %34 = arith.addf %33, %31 : vector<8x64xf32>
      %c0_22 = arith.constant 0 : index
      %c0_23 = arith.constant 0 : index
      %35 = vector.load %arg9[%c0_22, %c0_23] : memref<1x64xf32, #tpu.memory_space<vmem>>, vector<1x64xf32>
      %c0_24 = arith.constant 0 : index
      %c0_25 = arith.constant 0 : index
      %36 = vector.load %arg10[%c0_24, %c0_25] : memref<1x64xf32, #tpu.memory_space<vmem>>, vector<1x64xf32>
      %cst_26 = arith.constant dense<0.000000e+00> : vector<8xf32>
      %37 = vector.multi_reduction <add>, %34, %cst_26 [1] : vector<8x64xf32> to vector<8xf32>
      %38 = vector.shape_cast %37 : vector<8xf32> to vector<8x1xf32>
      %cst_27 = arith.constant 6.400000e+01 : f32
      %39 = vector.broadcast %cst_27 : f32 to vector<8x1xf32>
      %40 = arith.divf %38, %39 : vector<8x1xf32>
      %41 = vector.broadcast %40 : vector<8x1xf32> to vector<8x64xf32>
      %42 = arith.subf %34, %41 : vector<8x64xf32>
      %43 = arith.mulf %42, %42 : vector<8x64xf32>
      %cst_28 = arith.constant dense<0.000000e+00> : vector<8xf32>
      %44 = vector.multi_reduction <add>, %43, %cst_28 [1] : vector<8x64xf32> to vector<8xf32>
      %45 = vector.shape_cast %44 : vector<8xf32> to vector<8x1xf32>
      %cst_29 = arith.constant 6.400000e+01 : f32
      %46 = vector.broadcast %cst_29 : f32 to vector<8x1xf32>
      %47 = arith.divf %45, %46 : vector<8x1xf32>
      %48 = vector.broadcast %40 : vector<8x1xf32> to vector<8x64xf32>
      %49 = arith.subf %34, %48 : vector<8x64xf32>
      %cst_30 = arith.constant 9.99999974E-6 : f32
      %50 = vector.broadcast %cst_30 : f32 to vector<8x1xf32>
      %51 = arith.addf %47, %50 : vector<8x1xf32>
      %52 = math.rsqrt %51 : vector<8x1xf32>
      %53 = vector.broadcast %52 : vector<8x1xf32> to vector<8x64xf32>
      %54 = arith.mulf %49, %53 : vector<8x64xf32>
      %55 = vector.broadcast %35 : vector<1x64xf32> to vector<8x64xf32>
      %56 = arith.mulf %54, %55 : vector<8x64xf32>
      %57 = vector.broadcast %36 : vector<1x64xf32> to vector<8x64xf32>
      %58 = arith.addf %56, %57 : vector<8x64xf32>
      %c0_31 = arith.constant 0 : index
      %c0_32 = arith.constant 0 : index
      %59 = vector.load %arg11[%c0_31, %c0_32] : memref<64x256xf32, #tpu.memory_space<vmem>>, vector<64x256xf32>
      %cst_33 = arith.constant dense<0.000000e+00> : vector<8x256xf32>
      %60 = tpu.matmul %58, %59, %cst_33 {dimension_numbers = #tpu.dot_dimension_numbers<[1], [0], [0], [1], [0, 0, 1, 1], [], []>} : vector<8x64xf32>, vector<64x256xf32>, vector<8x256xf32> -> vector<8x256xf32>
      %c0_34 = arith.constant 0 : index
      %c0_35 = arith.constant 0 : index
      %61 = vector.load %arg12[%c0_34, %c0_35] : memref<1x256xf32, #tpu.memory_space<vmem>>, vector<1x256xf32>
      %62 = vector.broadcast %61 : vector<1x256xf32> to vector<8x256xf32>
      %63 = arith.addf %60, %62 : vector<8x256xf32>
      %cst_36 = arith.constant 5.000000e-01 : f32
      %64 = vector.broadcast %cst_36 : f32 to vector<8x256xf32>
      %65 = arith.mulf %64, %63 : vector<8x256xf32>
      %cst_37 = arith.constant 4.471500e-02 : f32
      %66 = vector.broadcast %cst_37 : f32 to vector<8x256xf32>
      %67 = arith.mulf %66, %63 : vector<8x256xf32>
      %68 = arith.mulf %67, %63 : vector<8x256xf32>
      %69 = arith.mulf %68, %63 : vector<8x256xf32>
      %70 = arith.addf %63, %69 : vector<8x256xf32>
      %cst_38 = arith.constant 0.797884583 : f32
      %71 = vector.broadcast %cst_38 : f32 to vector<8x256xf32>
      %72 = arith.mulf %71, %70 : vector<8x256xf32>
      %73 = math.tanh %72 : vector<8x256xf32>
      %cst_39 = arith.constant 1.000000e+00 : f32
      %74 = vector.broadcast %cst_39 : f32 to vector<8x256xf32>
      %75 = arith.addf %74, %73 : vector<8x256xf32>
      %76 = arith.mulf %65, %75 : vector<8x256xf32>
      %c0_40 = arith.constant 0 : index
      %c0_41 = arith.constant 0 : index
      %77 = vector.load %arg13[%c0_40, %c0_41] : memref<256x64xf32, #tpu.memory_space<vmem>>, vector<256x64xf32>
      %cst_42 = arith.constant dense<0.000000e+00> : vector<8x64xf32>
      %78 = tpu.matmul %76, %77, %cst_42 {dimension_numbers = #tpu.dot_dimension_numbers<[1], [0], [0], [1], [0, 0, 1, 1], [], []>} : vector<8x256xf32>, vector<256x64xf32>, vector<8x64xf32> -> vector<8x64xf32>
      %c0_43 = arith.constant 0 : index
      %c0_44 = arith.constant 0 : index
      %79 = vector.load %arg14[%c0_43, %c0_44] : memref<1x64xf32, #tpu.memory_space<vmem>>, vector<1x64xf32>
      %80 = vector.broadcast %79 : vector<1x64xf32> to vector<8x64xf32>
      %81 = arith.addf %78, %80 : vector<8x64xf32>
      %82 = arith.addf %58, %81 : vector<8x64xf32>
      %c0_45 = arith.constant 0 : index
      %c0_46 = arith.constant 0 : index
      %c0_47 = arith.constant 0 : index
      %83 = vector.load %arg15[%c0_45, %c0_46, %c0_47] : memref<1x8x64xf32, #tpu.memory_space<vmem>>, vector<1x8x64xf32>
      %84 = vector.shape_cast %83 : vector<1x8x64xf32> to vector<8x64xf32>
      %85 = vector.shape_cast %82 : vector<8x64xf32> to vector<1x8x64xf32>
      tpu.vector_store %arg15[%c0_45, %c0_46, %c0_47], %85 {strides = array<i32>} : memref<1x8x64xf32, #tpu.memory_space<vmem>>, vector<1x8x64xf32>,
    } else {
    }
    return
  }
  func.func @transform_0(%arg0: i32, %arg1: i32, %arg2: i32) -> (i32, i32, i32) {
    %c0_i32 = arith.constant 0 : i32
    %c0_i32_0 = arith.constant 0 : i32
    return %arg0, %arg1, %c0_i32 : i32, i32, i32
  }
  func.func @transform_1(%arg0: i32, %arg1: i32, %arg2: i32) -> (i32, i32, i32, i32) {
    %c0_i32 = arith.constant 0 : i32
    %c0_i32_0 = arith.constant 0 : i32
    %c0_i32_1 = arith.constant 0 : i32
    return %arg0, %c0_i32, %arg1, %c0_i32_0 : i32, i32, i32, i32
  }
  func.func @transform_2(%arg0: i32, %arg1: i32, %arg2: i32) -> (i32, i32, i32, i32) {
    %0 = arith.minsi %arg2, %arg1 : i32
    %c0_i32 = arith.constant 0 : i32
    %c0_i32_0 = arith.constant 0 : i32
    %c0_i32_1 = arith.constant 0 : i32
    return %arg0, %c0_i32, %0, %c0_i32_0 : i32, i32, i32, i32
  }
  func.func @transform_3(%arg0: i32, %arg1: i32, %arg2: i32) -> (i32, i32, i32, i32) {
    %0 = arith.minsi %arg2, %arg1 : i32
    %c0_i32 = arith.constant 0 : i32
    %c0_i32_0 = arith.constant 0 : i32
    %c0_i32_1 = arith.constant 0 : i32
    return %arg0, %c0_i32, %0, %c0_i32_0 : i32, i32, i32, i32
  }
  func.func @transform_4(%arg0: i32, %arg1: i32, %arg2: i32) -> (i32, i32) {
    %c0_i32 = arith.constant 0 : i32
    %c0_i32_0 = arith.constant 0 : i32
    %c0_i32_1 = arith.constant 0 : i32
    return %c0_i32, %c0_i32_0 : i32, i32
  }
  func.func @transform_5(%arg0: i32, %arg1: i32, %arg2: i32) -> (i32, i32) {
    %c0_i32 = arith.constant 0 : i32
    %c0_i32_0 = arith.constant 0 : i32
    %c0_i32_1 = arith.constant 0 : i32
    return %c0_i32, %c0_i32_0 : i32, i32
  }
  func.func @transform_6(%arg0: i32, %arg1: i32, %arg2: i32) -> (i32, i32) {
    %c0_i32 = arith.constant 0 : i32
    %c0_i32_0 = arith.constant 0 : i32
    %c0_i32_1 = arith.constant 0 : i32
    return %c0_i32, %c0_i32_0 : i32, i32
  }
  func.func @transform_7(%arg0: i32, %arg1: i32, %arg2: i32) -> (i32, i32) {
    %c0_i32 = arith.constant 0 : i32
    %c0_i32_0 = arith.constant 0 : i32
    %c0_i32_1 = arith.constant 0 : i32
    return %c0_i32, %c0_i32_0 : i32, i32
  }
  func.func @transform_8(%arg0: i32, %arg1: i32, %arg2: i32) -> (i32, i32) {
    %c0_i32 = arith.constant 0 : i32
    %c0_i32_0 = arith.constant 0 : i32
    %c0_i32_1 = arith.constant 0 : i32
    return %c0_i32, %c0_i32_0 : i32, i32
  }
  func.func @transform_9(%arg0: i32, %arg1: i32, %arg2: i32) -> (i32, i32) {
    %c0_i32 = arith.constant 0 : i32
    %c0_i32_0 = arith.constant 0 : i32
    %c0_i32_1 = arith.constant 0 : i32
    return %c0_i32, %c0_i32_0 : i32, i32
  }
  func.func @transform_10(%arg0: i32, %arg1: i32, %arg2: i32) -> (i32, i32) {
    %c0_i32 = arith.constant 0 : i32
    %c0_i32_0 = arith.constant 0 : i32
    %c0_i32_1 = arith.constant 0 : i32
    return %c0_i32, %c0_i32_0 : i32, i32
  }
  func.func @transform_11(%arg0: i32, %arg1: i32, %arg2: i32) -> (i32, i32) {
    %c0_i32 = arith.constant 0 : i32
    %c0_i32_0 = arith.constant 0 : i32
    %c0_i32_1 = arith.constant 0 : i32
    return %c0_i32, %c0_i32_0 : i32, i32
  }
  func.func @transform_12(%arg0: i32, %arg1: i32, %arg2: i32) -> (i32, i32, i32) {
    %c0_i32 = arith.constant 0 : i32
    %c0_i32_0 = arith.constant 0 : i32
    return %arg0, %arg1, %c0_i32 : i32, i32, i32
  }
}

module attributes {stable_mosaic.version = 11 : i64} {
  func.func @ln1_qkv_kernel(%arg0: i32, %arg1: i32, %arg2: memref<1x8x64xf32, #tpu.memory_space<vmem>>, %arg3: memref<1x64xf32, #tpu.memory_space<vmem>>, %arg4: memref<1x64xf32, #tpu.memory_space<vmem>>, %arg5: memref<64x192xf32, #tpu.memory_space<vmem>>, %arg6: memref<1x192xf32, #tpu.memory_space<vmem>>, %arg7: memref<1x8x64xf32, #tpu.memory_space<vmem>>, %arg8: memref<1x4x8x16xf32, #tpu.memory_space<vmem>>, %arg9: memref<1x4x8x16xf32, #tpu.memory_space<vmem>>, %arg10: memref<1x4x8x16xf32, #tpu.memory_space<vmem>>) attributes {dimension_semantics = [#tpu.dimension_semantics<parallel>, #tpu.dimension_semantics<parallel>], iteration_bounds = array<i64: 2, 4>, scalar_prefetch = 0 : i64, scratch_operands = 0 : i64, tpu.core_type = #tpu.core_type<tc>, window_params = [{transform_indices = @transform_0, window_bounds = array<i64: 1, 8, 64>}, {pipeline_mode = #tpu.pipeline_mode<synchronous>, transform_indices = @transform_1, window_bounds = array<i64: 1, 64>}, {pipeline_mode = #tpu.pipeline_mode<synchronous>, transform_indices = @transform_2, window_bounds = array<i64: 1, 64>}, {pipeline_mode = #tpu.pipeline_mode<synchronous>, transform_indices = @transform_3, window_bounds = array<i64: 64, 192>}, {pipeline_mode = #tpu.pipeline_mode<synchronous>, transform_indices = @transform_4, window_bounds = array<i64: 1, 192>}, {transform_indices = @transform_5, window_bounds = array<i64: 1, 8, 64>}, {transform_indices = @transform_6, window_bounds = array<i64: 1, 4, 8, 16>}, {transform_indices = @transform_7, window_bounds = array<i64: 1, 4, 8, 16>}, {transform_indices = @transform_8, window_bounds = array<i64: 1, 4, 8, 16>}]} {
    %c0 = arith.constant 0 : index
    %c0_0 = arith.constant 0 : index
    %c0_1 = arith.constant 0 : index
    %0 = vector.load %arg2[%c0, %c0_0, %c0_1] : memref<1x8x64xf32, #tpu.memory_space<vmem>>, vector<1x8x64xf32>
    %1 = vector.shape_cast %0 : vector<1x8x64xf32> to vector<8x64xf32>
    %c0_2 = arith.constant 0 : index
    %c0_3 = arith.constant 0 : index
    %2 = vector.load %arg3[%c0_2, %c0_3] : memref<1x64xf32, #tpu.memory_space<vmem>>, vector<1x64xf32>
    %c0_4 = arith.constant 0 : index
    %c0_5 = arith.constant 0 : index
    %3 = vector.load %arg4[%c0_4, %c0_5] : memref<1x64xf32, #tpu.memory_space<vmem>>, vector<1x64xf32>
    %cst = arith.constant dense<0.000000e+00> : vector<8xf32>
    %4 = vector.multi_reduction <add>, %1, %cst [1] : vector<8x64xf32> to vector<8xf32>
    %5 = vector.shape_cast %4 : vector<8xf32> to vector<8x1xf32>
    %cst_6 = arith.constant 6.400000e+01 : f32
    %6 = vector.broadcast %cst_6 : f32 to vector<8x1xf32>
    %7 = arith.divf %5, %6 : vector<8x1xf32>
    %8 = vector.broadcast %7 : vector<8x1xf32> to vector<8x64xf32>
    %9 = arith.subf %1, %8 : vector<8x64xf32>
    %10 = arith.mulf %9, %9 : vector<8x64xf32>
    %cst_7 = arith.constant dense<0.000000e+00> : vector<8xf32>
    %11 = vector.multi_reduction <add>, %10, %cst_7 [1] : vector<8x64xf32> to vector<8xf32>
    %12 = vector.shape_cast %11 : vector<8xf32> to vector<8x1xf32>
    %cst_8 = arith.constant 6.400000e+01 : f32
    %13 = vector.broadcast %cst_8 : f32 to vector<8x1xf32>
    %14 = arith.divf %12, %13 : vector<8x1xf32>
    %15 = vector.broadcast %7 : vector<8x1xf32> to vector<8x64xf32>
    %16 = arith.subf %1, %15 : vector<8x64xf32>
    %cst_9 = arith.constant 9.99999974E-6 : f32
    %17 = vector.broadcast %cst_9 : f32 to vector<8x1xf32>
    %18 = arith.addf %14, %17 : vector<8x1xf32>
    %19 = math.rsqrt %18 : vector<8x1xf32>
    %20 = vector.broadcast %19 : vector<8x1xf32> to vector<8x64xf32>
    %21 = arith.mulf %16, %20 : vector<8x64xf32>
    %22 = vector.broadcast %2 : vector<1x64xf32> to vector<8x64xf32>
    %23 = arith.mulf %21, %22 : vector<8x64xf32>
    %24 = vector.broadcast %3 : vector<1x64xf32> to vector<8x64xf32>
    %25 = arith.addf %23, %24 : vector<8x64xf32>
    %c0_10 = arith.constant 0 : index
    %c0_11 = arith.constant 0 : index
    %c0_12 = arith.constant 0 : index
    %26 = vector.load %arg7[%c0_10, %c0_11, %c0_12] : memref<1x8x64xf32, #tpu.memory_space<vmem>>, vector<1x8x64xf32>
    %27 = vector.shape_cast %26 : vector<1x8x64xf32> to vector<8x64xf32>
    %28 = vector.shape_cast %25 : vector<8x64xf32> to vector<1x8x64xf32>
    tpu.vector_store %arg7[%c0_10, %c0_11, %c0_12], %28 {strides = array<i32>} : memref<1x8x64xf32, #tpu.memory_space<vmem>>, vector<1x8x64xf32>,
    %c0_13 = arith.constant 0 : index
    %c0_14 = arith.constant 0 : index
    %29 = vector.load %arg5[%c0_13, %c0_14] : memref<64x192xf32, #tpu.memory_space<vmem>>, vector<64x192xf32>
    %cst_15 = arith.constant dense<0.000000e+00> : vector<8x192xf32>
    %30 = tpu.matmul %25, %29, %cst_15 {dimension_numbers = #tpu.dot_dimension_numbers<[1], [0], [0], [1], [0, 0, 1, 1], [], []>} : vector<8x64xf32>, vector<64x192xf32>, vector<8x192xf32> -> vector<8x192xf32>
    %c0_16 = arith.constant 0 : index
    %c0_17 = arith.constant 0 : index
    %31 = vector.load %arg6[%c0_16, %c0_17] : memref<1x192xf32, #tpu.memory_space<vmem>>, vector<1x192xf32>
    %32 = vector.broadcast %31 : vector<1x192xf32> to vector<8x192xf32>
    %33 = arith.addf %30, %32 : vector<8x192xf32>
    %34 = vector.extract_strided_slice %33 {offsets = [0, 0], sizes = [8, 16], strides = [1, 1]} : vector<8x192xf32> to vector<8x16xf32>
    %c0_18 = arith.constant 0 : index
    %c0_19 = arith.constant 0 : index
    %c0_20 = arith.constant 0 : index
    %c0_21 = arith.constant 0 : index
    %35 = vector.load %arg8[%c0_18, %c0_19, %c0_20, %c0_21] : memref<1x4x8x16xf32, #tpu.memory_space<vmem>>, vector<1x1x8x16xf32>
    %36 = vector.shape_cast %35 : vector<1x1x8x16xf32> to vector<8x16xf32>
    %37 = vector.shape_cast %34 : vector<8x16xf32> to vector<1x1x8x16xf32>
    tpu.vector_store %arg8[%c0_18, %c0_19, %c0_20, %c0_21], %37 {strides = array<i32>} : memref<1x4x8x16xf32, #tpu.memory_space<vmem>>, vector<1x1x8x16xf32>,
    %38 = vector.extract_strided_slice %33 {offsets = [0, 64], sizes = [8, 16], strides = [1, 1]} : vector<8x192xf32> to vector<8x16xf32>
    %c0_22 = arith.constant 0 : index
    %c0_23 = arith.constant 0 : index
    %c0_24 = arith.constant 0 : index
    %c0_25 = arith.constant 0 : index
    %39 = vector.load %arg9[%c0_22, %c0_23, %c0_24, %c0_25] : memref<1x4x8x16xf32, #tpu.memory_space<vmem>>, vector<1x1x8x16xf32>
    %40 = vector.shape_cast %39 : vector<1x1x8x16xf32> to vector<8x16xf32>
    %41 = vector.shape_cast %38 : vector<8x16xf32> to vector<1x1x8x16xf32>
    tpu.vector_store %arg9[%c0_22, %c0_23, %c0_24, %c0_25], %41 {strides = array<i32>} : memref<1x4x8x16xf32, #tpu.memory_space<vmem>>, vector<1x1x8x16xf32>,
    %42 = vector.extract_strided_slice %33 {offsets = [0, 128], sizes = [8, 16], strides = [1, 1]} : vector<8x192xf32> to vector<8x16xf32>
    %c0_26 = arith.constant 0 : index
    %c0_27 = arith.constant 0 : index
    %c0_28 = arith.constant 0 : index
    %c0_29 = arith.constant 0 : index
    %43 = vector.load %arg10[%c0_26, %c0_27, %c0_28, %c0_29] : memref<1x4x8x16xf32, #tpu.memory_space<vmem>>, vector<1x1x8x16xf32>
    %44 = vector.shape_cast %43 : vector<1x1x8x16xf32> to vector<8x16xf32>
    %45 = vector.shape_cast %42 : vector<8x16xf32> to vector<1x1x8x16xf32>
    tpu.vector_store %arg10[%c0_26, %c0_27, %c0_28, %c0_29], %45 {strides = array<i32>} : memref<1x4x8x16xf32, #tpu.memory_space<vmem>>, vector<1x1x8x16xf32>,
    %46 = vector.extract_strided_slice %33 {offsets = [0, 16], sizes = [8, 16], strides = [1, 1]} : vector<8x192xf32> to vector<8x16xf32>
    %c0_30 = arith.constant 0 : index
    %c1 = arith.constant 1 : index
    %c0_31 = arith.constant 0 : index
    %c0_32 = arith.constant 0 : index
    %47 = vector.load %arg8[%c0_30, %c1, %c0_31, %c0_32] : memref<1x4x8x16xf32, #tpu.memory_space<vmem>>, vector<1x1x8x16xf32>
    %48 = vector.shape_cast %47 : vector<1x1x8x16xf32> to vector<8x16xf32>
    %49 = vector.shape_cast %46 : vector<8x16xf32> to vector<1x1x8x16xf32>
    tpu.vector_store %arg8[%c0_30, %c1, %c0_31, %c0_32], %49 {strides = array<i32>} : memref<1x4x8x16xf32, #tpu.memory_space<vmem>>, vector<1x1x8x16xf32>,
    %50 = vector.extract_strided_slice %33 {offsets = [0, 80], sizes = [8, 16], strides = [1, 1]} : vector<8x192xf32> to vector<8x16xf32>
    %c0_33 = arith.constant 0 : index
    %c1_34 = arith.constant 1 : index
    %c0_35 = arith.constant 0 : index
    %c0_36 = arith.constant 0 : index
    %51 = vector.load %arg9[%c0_33, %c1_34, %c0_35, %c0_36] : memref<1x4x8x16xf32, #tpu.memory_space<vmem>>, vector<1x1x8x16xf32>
    %52 = vector.shape_cast %51 : vector<1x1x8x16xf32> to vector<8x16xf32>
    %53 = vector.shape_cast %50 : vector<8x16xf32> to vector<1x1x8x16xf32>
    tpu.vector_store %arg9[%c0_33, %c1_34, %c0_35, %c0_36], %53 {strides = array<i32>} : memref<1x4x8x16xf32, #tpu.memory_space<vmem>>, vector<1x1x8x16xf32>,
    %54 = vector.extract_strided_slice %33 {offsets = [0, 144], sizes = [8, 16], strides = [1, 1]} : vector<8x192xf32> to vector<8x16xf32>
    %c0_37 = arith.constant 0 : index
    %c1_38 = arith.constant 1 : index
    %c0_39 = arith.constant 0 : index
    %c0_40 = arith.constant 0 : index
    %55 = vector.load %arg10[%c0_37, %c1_38, %c0_39, %c0_40] : memref<1x4x8x16xf32, #tpu.memory_space<vmem>>, vector<1x1x8x16xf32>
    %56 = vector.shape_cast %55 : vector<1x1x8x16xf32> to vector<8x16xf32>
    %57 = vector.shape_cast %54 : vector<8x16xf32> to vector<1x1x8x16xf32>
    tpu.vector_store %arg10[%c0_37, %c1_38, %c0_39, %c0_40], %57 {strides = array<i32>} : memref<1x4x8x16xf32, #tpu.memory_space<vmem>>, vector<1x1x8x16xf32>,
    %58 = vector.extract_strided_slice %33 {offsets = [0, 32], sizes = [8, 16], strides = [1, 1]} : vector<8x192xf32> to vector<8x16xf32>
    %c0_41 = arith.constant 0 : index
    %c2 = arith.constant 2 : index
    %c0_42 = arith.constant 0 : index
    %c0_43 = arith.constant 0 : index
    %59 = vector.load %arg8[%c0_41, %c2, %c0_42, %c0_43] : memref<1x4x8x16xf32, #tpu.memory_space<vmem>>, vector<1x1x8x16xf32>
    %60 = vector.shape_cast %59 : vector<1x1x8x16xf32> to vector<8x16xf32>
    %61 = vector.shape_cast %58 : vector<8x16xf32> to vector<1x1x8x16xf32>
    tpu.vector_store %arg8[%c0_41, %c2, %c0_42, %c0_43], %61 {strides = array<i32>} : memref<1x4x8x16xf32, #tpu.memory_space<vmem>>, vector<1x1x8x16xf32>,
    %62 = vector.extract_strided_slice %33 {offsets = [0, 96], sizes = [8, 16], strides = [1, 1]} : vector<8x192xf32> to vector<8x16xf32>
    %c0_44 = arith.constant 0 : index
    %c2_45 = arith.constant 2 : index
    %c0_46 = arith.constant 0 : index
    %c0_47 = arith.constant 0 : index
    %63 = vector.load %arg9[%c0_44, %c2_45, %c0_46, %c0_47] : memref<1x4x8x16xf32, #tpu.memory_space<vmem>>, vector<1x1x8x16xf32>
    %64 = vector.shape_cast %63 : vector<1x1x8x16xf32> to vector<8x16xf32>
    %65 = vector.shape_cast %62 : vector<8x16xf32> to vector<1x1x8x16xf32>
    tpu.vector_store %arg9[%c0_44, %c2_45, %c0_46, %c0_47], %65 {strides = array<i32>} : memref<1x4x8x16xf32, #tpu.memory_space<vmem>>, vector<1x1x8x16xf32>,
    %66 = vector.extract_strided_slice %33 {offsets = [0, 160], sizes = [8, 16], strides = [1, 1]} : vector<8x192xf32> to vector<8x16xf32>
    %c0_48 = arith.constant 0 : index
    %c2_49 = arith.constant 2 : index
    %c0_50 = arith.constant 0 : index
    %c0_51 = arith.constant 0 : index
    %67 = vector.load %arg10[%c0_48, %c2_49, %c0_50, %c0_51] : memref<1x4x8x16xf32, #tpu.memory_space<vmem>>, vector<1x1x8x16xf32>
    %68 = vector.shape_cast %67 : vector<1x1x8x16xf32> to vector<8x16xf32>
    %69 = vector.shape_cast %66 : vector<8x16xf32> to vector<1x1x8x16xf32>
    tpu.vector_store %arg10[%c0_48, %c2_49, %c0_50, %c0_51], %69 {strides = array<i32>} : memref<1x4x8x16xf32, #tpu.memory_space<vmem>>, vector<1x1x8x16xf32>,
    %70 = vector.extract_strided_slice %33 {offsets = [0, 48], sizes = [8, 16], strides = [1, 1]} : vector<8x192xf32> to vector<8x16xf32>
    %c0_52 = arith.constant 0 : index
    %c3 = arith.constant 3 : index
    %c0_53 = arith.constant 0 : index
    %c0_54 = arith.constant 0 : index
    %71 = vector.load %arg8[%c0_52, %c3, %c0_53, %c0_54] : memref<1x4x8x16xf32, #tpu.memory_space<vmem>>, vector<1x1x8x16xf32>
    %72 = vector.shape_cast %71 : vector<1x1x8x16xf32> to vector<8x16xf32>
    %73 = vector.shape_cast %70 : vector<8x16xf32> to vector<1x1x8x16xf32>
    tpu.vector_store %arg8[%c0_52, %c3, %c0_53, %c0_54], %73 {strides = array<i32>} : memref<1x4x8x16xf32, #tpu.memory_space<vmem>>, vector<1x1x8x16xf32>,
    %74 = vector.extract_strided_slice %33 {offsets = [0, 112], sizes = [8, 16], strides = [1, 1]} : vector<8x192xf32> to vector<8x16xf32>
    %c0_55 = arith.constant 0 : index
    %c3_56 = arith.constant 3 : index
    %c0_57 = arith.constant 0 : index
    %c0_58 = arith.constant 0 : index
    %75 = vector.load %arg9[%c0_55, %c3_56, %c0_57, %c0_58] : memref<1x4x8x16xf32, #tpu.memory_space<vmem>>, vector<1x1x8x16xf32>
    %76 = vector.shape_cast %75 : vector<1x1x8x16xf32> to vector<8x16xf32>
    %77 = vector.shape_cast %74 : vector<8x16xf32> to vector<1x1x8x16xf32>
    tpu.vector_store %arg9[%c0_55, %c3_56, %c0_57, %c0_58], %77 {strides = array<i32>} : memref<1x4x8x16xf32, #tpu.memory_space<vmem>>, vector<1x1x8x16xf32>,
    %78 = vector.extract_strided_slice %33 {offsets = [0, 176], sizes = [8, 16], strides = [1, 1]} : vector<8x192xf32> to vector<8x16xf32>
    %c0_59 = arith.constant 0 : index
    %c3_60 = arith.constant 3 : index
    %c0_61 = arith.constant 0 : index
    %c0_62 = arith.constant 0 : index
    %79 = vector.load %arg10[%c0_59, %c3_60, %c0_61, %c0_62] : memref<1x4x8x16xf32, #tpu.memory_space<vmem>>, vector<1x1x8x16xf32>
    %80 = vector.shape_cast %79 : vector<1x1x8x16xf32> to vector<8x16xf32>
    %81 = vector.shape_cast %78 : vector<8x16xf32> to vector<1x1x8x16xf32>
    tpu.vector_store %arg10[%c0_59, %c3_60, %c0_61, %c0_62], %81 {strides = array<i32>} : memref<1x4x8x16xf32, #tpu.memory_space<vmem>>, vector<1x1x8x16xf32>,
    return
  }
  func.func @transform_0(%arg0: i32, %arg1: i32) -> (i32, i32, i32) {
    %c0_i32 = arith.constant 0 : i32
    %c0_i32_0 = arith.constant 0 : i32
    return %arg0, %arg1, %c0_i32 : i32, i32, i32
  }
  func.func @transform_1(%arg0: i32, %arg1: i32) -> (i32, i32) {
    %c0_i32 = arith.constant 0 : i32
    %c0_i32_0 = arith.constant 0 : i32
    %c0_i32_1 = arith.constant 0 : i32
    return %c0_i32, %c0_i32_0 : i32, i32
  }
  func.func @transform_2(%arg0: i32, %arg1: i32) -> (i32, i32) {
    %c0_i32 = arith.constant 0 : i32
    %c0_i32_0 = arith.constant 0 : i32
    %c0_i32_1 = arith.constant 0 : i32
    return %c0_i32, %c0_i32_0 : i32, i32
  }
  func.func @transform_3(%arg0: i32, %arg1: i32) -> (i32, i32) {
    %c0_i32 = arith.constant 0 : i32
    %c0_i32_0 = arith.constant 0 : i32
    %c0_i32_1 = arith.constant 0 : i32
    return %c0_i32, %c0_i32_0 : i32, i32
  }
  func.func @transform_4(%arg0: i32, %arg1: i32) -> (i32, i32) {
    %c0_i32 = arith.constant 0 : i32
    %c0_i32_0 = arith.constant 0 : i32
    %c0_i32_1 = arith.constant 0 : i32
    return %c0_i32, %c0_i32_0 : i32, i32
  }
  func.func @transform_5(%arg0: i32, %arg1: i32) -> (i32, i32, i32) {
    %c0_i32 = arith.constant 0 : i32
    %c0_i32_0 = arith.constant 0 : i32
    return %arg0, %arg1, %c0_i32 : i32, i32, i32
  }
  func.func @transform_6(%arg0: i32, %arg1: i32) -> (i32, i32, i32, i32) {
    %c0_i32 = arith.constant 0 : i32
    %c0_i32_0 = arith.constant 0 : i32
    %c0_i32_1 = arith.constant 0 : i32
    return %arg0, %c0_i32, %arg1, %c0_i32_0 : i32, i32, i32, i32
  }
  func.func @transform_7(%arg0: i32, %arg1: i32) -> (i32, i32, i32, i32) {
    %c0_i32 = arith.constant 0 : i32
    %c0_i32_0 = arith.constant 0 : i32
    %c0_i32_1 = arith.constant 0 : i32
    return %arg0, %c0_i32, %arg1, %c0_i32_0 : i32, i32, i32, i32
  }
  func.func @transform_8(%arg0: i32, %arg1: i32) -> (i32, i32, i32, i32) {
    %c0_i32 = arith.constant 0 : i32
    %c0_i32_0 = arith.constant 0 : i32
    %c0_i32_1 = arith.constant 0 : i32
    return %arg0, %c0_i32, %arg1, %c0_i32_0 : i32, i32, i32, i32
  }
}

module attributes {stable_mosaic.version = 11 : i64} {
  func.func @attn_mlp_kernel(%arg0: i32, %arg1: i32, %arg2: i32, %arg3: memref<1x8x64xf32, #tpu.memory_space<vmem>>, %arg4: memref<1x4x8x16xf32, #tpu.memory_space<vmem>>, %arg5: memref<1x4x8x16xf32, #tpu.memory_space<vmem>>, %arg6: memref<1x4x8x16xf32, #tpu.memory_space<vmem>>, %arg7: memref<64x64xf32, #tpu.memory_space<vmem>>, %arg8: memref<1x64xf32, #tpu.memory_space<vmem>>, %arg9: memref<1x64xf32, #tpu.memory_space<vmem>>, %arg10: memref<1x64xf32, #tpu.memory_space<vmem>>, %arg11: memref<64x256xf32, #tpu.memory_space<vmem>>, %arg12: memref<1x256xf32, #tpu.memory_space<vmem>>, %arg13: memref<256x64xf32, #tpu.memory_space<vmem>>, %arg14: memref<1x64xf32, #tpu.memory_space<vmem>>, %arg15: memref<1x8x64xf32, #tpu.memory_space<vmem>>, %arg16: memref<4x8x1xf32, #tpu.memory_space<vmem>>, %arg17: memref<4x8x1xf32, #tpu.memory_space<vmem>>, %arg18: memref<4x8x16xf32, #tpu.memory_space<vmem>>, %arg19: memref<8x64xf32, #tpu.memory_space<vmem>>) attributes {dimension_semantics = [#tpu.dimension_semantics<parallel>, #tpu.dimension_semantics<parallel>, #tpu.dimension_semantics<arbitrary>], iteration_bounds = array<i64: 2, 4, 4>, scalar_prefetch = 0 : i64, scratch_operands = 4 : i64, tpu.core_type = #tpu.core_type<tc>, window_params = [{transform_indices = @transform_0, window_bounds = array<i64: 1, 8, 64>}, {transform_indices = @transform_1, window_bounds = array<i64: 1, 4, 8, 16>}, {transform_indices = @transform_2, window_bounds = array<i64: 1, 4, 8, 16>}, {transform_indices = @transform_3, window_bounds = array<i64: 1, 4, 8, 16>}, {pipeline_mode = #tpu.pipeline_mode<synchronous>, transform_indices = @transform_4, window_bounds = array<i64: 64, 64>}, {pipeline_mode = #tpu.pipeline_mode<synchronous>, transform_indices = @transform_5, window_bounds = array<i64: 1, 64>}, {pipeline_mode = #tpu.pipeline_mode<synchronous>, transform_indices = @transform_6, window_bounds = array<i64: 1, 64>}, {pipeline_mode = #tpu.pipeline_mode<synchronous>, transform_indices = @transform_7, window_bounds = array<i64: 1, 64>}, {pipeline_mode = #tpu.pipeline_mode<synchronous>, transform_indices = @transform_8, window_bounds = array<i64: 64, 256>}, {pipeline_mode = #tpu.pipeline_mode<synchronous>, transform_indices = @transform_9, window_bounds = array<i64: 1, 256>}, {pipeline_mode = #tpu.pipeline_mode<synchronous>, transform_indices = @transform_10, window_bounds = array<i64: 256, 64>}, {pipeline_mode = #tpu.pipeline_mode<synchronous>, transform_indices = @transform_11, window_bounds = array<i64: 1, 64>}, {transform_indices = @transform_12, window_bounds = array<i64: 1, 8, 64>}]} {
    %c0_i32 = arith.constant 0 : i32
    %0 = arith.cmpi eq, %arg2, %c0_i32 : i32
    %1 = arith.extui %0 : i1 to i32
    %c0_i32_0 = arith.constant 0 : i32
    %2 = arith.cmpi ne, %1, %c0_i32_0 : i32
    scf.if %2 {
      %cst = arith.constant 0xFF800000 : f32
      %9 = vector.broadcast %cst : f32 to vector<4x8x1xf32>
      %c0 = arith.constant 0 : index
      %c0_3 = arith.constant 0 : index
      %c0_4 = arith.constant 0 : index
      %10 = vector.load %arg16[%c0, %c0_3, %c0_4] : memref<4x8x1xf32, #tpu.memory_space<vmem>>, vector<4x8x1xf32>
      tpu.vector_store %arg16[%c0, %c0_3, %c0_4], %9 {strides = array<i32>} : memref<4x8x1xf32, #tpu.memory_space<vmem>>, vector<4x8x1xf32>,
      %cst_5 = arith.constant 0.000000e+00 : f32
      %11 = vector.broadcast %cst_5 : f32 to vector<4x8x1xf32>
      %c0_6 = arith.constant 0 : index
      %c0_7 = arith.constant 0 : index
      %c0_8 = arith.constant 0 : index
      %12 = vector.load %arg17[%c0_6, %c0_7, %c0_8] : memref<4x8x1xf32, #tpu.memory_space<vmem>>, vector<4x8x1xf32>
      tpu.vector_store %arg17[%c0_6, %c0_7, %c0_8], %11 {strides = array<i32>} : memref<4x8x1xf32, #tpu.memory_space<vmem>>, vector<4x8x1xf32>,
      %cst_9 = arith.constant 0.000000e+00 : f32
      %13 = vector.broadcast %cst_9 : f32 to vector<4x8x16xf32>
      %c0_10 = arith.constant 0 : index
      %c0_11 = arith.constant 0 : index
      %c0_12 = arith.constant 0 : index
      %14 = vector.load %arg18[%c0_10, %c0_11, %c0_12] : memref<4x8x16xf32, #tpu.memory_space<vmem>>, vector<4x8x16xf32>
      tpu.vector_store %arg18[%c0_10, %c0_11, %c0_12], %13 {strides = array<i32>} : memref<4x8x16xf32, #tpu.memory_space<vmem>>, vector<4x8x16xf32>,
    } else {
    }
    %3 = arith.cmpi sle, %arg2, %arg1 : i32
    %4 = arith.extui %3 : i1 to i32
    %c0_i32_1 = arith.constant 0 : i32
    %5 = arith.cmpi ne, %4, %c0_i32_1 : i32
    scf.if %5 {
      %c0 = arith.constant 0 : index
      %c0_3 = arith.constant 0 : index
      %c0_4 = arith.constant 0 : index
      %c0_5 = arith.constant 0 : index
      %9 = vector.load %arg4[%c0, %c0_3, %c0_4, %c0_5] : memref<1x4x8x16xf32, #tpu.memory_space<vmem>>, vector<1x4x8x16xf32>
      %10 = vector.shape_cast %9 : vector<1x4x8x16xf32> to vector<4x8x16xf32>
      %c0_6 = arith.constant 0 : index
      %c0_7 = arith.constant 0 : index
      %c0_8 = arith.constant 0 : index
      %c0_9 = arith.constant 0 : index
      %11 = vector.load %arg5[%c0_6, %c0_7, %c0_8, %c0_9] : memref<1x4x8x16xf32, #tpu.memory_space<vmem>>, vector<1x4x8x16xf32>
      %12 = vector.shape_cast %11 : vector<1x4x8x16xf32> to vector<4x8x16xf32>
      %c0_10 = arith.constant 0 : index
      %c0_11 = arith.constant 0 : index
      %c0_12 = arith.constant 0 : index
      %c0_13 = arith.constant 0 : index
      %13 = vector.load %arg6[%c0_10, %c0_11, %c0_12, %c0_13] : memref<1x4x8x16xf32, #tpu.memory_space<vmem>>, vector<1x4x8x16xf32>
      %14 = vector.shape_cast %13 : vector<1x4x8x16xf32> to vector<4x8x16xf32>
      "tpu.trace_start"() <{level = 10 : i32, message = "htd,hsd->hts"}> : () -> ()
      %cst = arith.constant dense<0.000000e+00> : vector<4x8x8xf32>
      %15 = tpu.matmul %10, %12, %cst {dimension_numbers = #tpu.dot_dimension_numbers<[2], [2], [1], [1], [0, 0, 0, 1, 1, 1], [0], [0]>} : vector<4x8x16xf32>, vector<4x8x16xf32>, vector<4x8x8xf32> -> vector<4x8x8xf32>
      "tpu.trace_stop"() : () -> ()
      %cst_14 = arith.constant 2.500000e-01 : f32
      %16 = vector.broadcast %cst_14 : f32 to vector<4x8x8xf32>
      %17 = arith.mulf %15, %16 : vector<4x8x8xf32>
      %c8_i32 = arith.constant 8 : i32
      %18 = arith.muli %arg1, %c8_i32 : i32
      %19 = tpu.iota {dimensions = array<i32: 0>} : vector<8x8xi32>
      %20 = vector.broadcast %18 : i32 to vector<8x8xi32>
      %21 = arith.addi %20, %19 : vector<8x8xi32>
      %c8_i32_15 = arith.constant 8 : i32
      %22 = arith.muli %arg2, %c8_i32_15 : i32
      %23 = tpu.iota {dimensions = array<i32: 1>} : vector<8x8xi32>
      %24 = vector.broadcast %22 : i32 to vector<8x8xi32>
      %25 = arith.addi %24, %23 : vector<8x8xi32>
      %26 = arith.cmpi sle, %25, %21 : vector<8x8xi32>
      %27 = vector.shape_cast %26 : vector<8x8xi1> to vector<1x8x8xi1>
      %cst_16 = arith.constant 0xFF800000 : f32
      %28 = vector.shape_cast %27 : vector<1x8x8xi1> to vector<1x8x8xi1>
      %29 = vector.broadcast %28 : vector<1x8x8xi1> to vector<4x8x8xi1>
      %30 = vector.broadcast %cst_16 : f32 to vector<4x8x8xf32>
      %31 = arith.select %29, %17, %30 : vector<4x8x8xi1>, vector<4x8x8xf32>
      %c0_17 = arith.constant 0 : index
      %c0_18 = arith.constant 0 : index
      %c0_19 = arith.constant 0 : index
      %32 = vector.load %arg16[%c0_17, %c0_18, %c0_19] : memref<4x8x1xf32, #tpu.memory_space<vmem>>, vector<4x8x1xf32>
      %cst_20 = arith.constant dense<0xFF800000> : vector<4x8xf32>
      %33 = vector.multi_reduction <maximumf>, %31, %cst_20 [2] : vector<4x8x8xf32> to vector<4x8xf32>
      %34 = vector.shape_cast %33 : vector<4x8xf32> to vector<4x8x1xf32>
      %35 = arith.maximumf %32, %34 : vector<4x8x1xf32>
      %36 = arith.subf %32, %35 : vector<4x8x1xf32>
      %37 = math.exp %36 : vector<4x8x1xf32>
      %38 = vector.broadcast %35 : vector<4x8x1xf32> to vector<4x8x8xf32>
      %39 = arith.subf %31, %38 : vector<4x8x8xf32>
      %40 = math.exp %39 : vector<4x8x8xf32>
      %c0_21 = arith.constant 0 : index
      %c0_22 = arith.constant 0 : index
      %c0_23 = arith.constant 0 : index
      %41 = vector.load %arg17[%c0_21, %c0_22, %c0_23] : memref<4x8x1xf32, #tpu.memory_space<vmem>>, vector<4x8x1xf32>
      %42 = arith.mulf %37, %41 : vector<4x8x1xf32>
      %cst_24 = arith.constant dense<0.000000e+00> : vector<4x8xf32>
      %43 = vector.multi_reduction <add>, %40, %cst_24 [2] : vector<4x8x8xf32> to vector<4x8xf32>
      %44 = vector.shape_cast %43 : vector<4x8xf32> to vector<4x8x1xf32>
      %45 = arith.addf %42, %44 : vector<4x8x1xf32>
      %c0_25 = arith.constant 0 : index
      %c0_26 = arith.constant 0 : index
      %c0_27 = arith.constant 0 : index
      %46 = vector.load %arg17[%c0_25, %c0_26, %c0_27] : memref<4x8x1xf32, #tpu.memory_space<vmem>>, vector<4x8x1xf32>
      tpu.vector_store %arg17[%c0_25, %c0_26, %c0_27], %45 {strides = array<i32>} : memref<4x8x1xf32, #tpu.memory_space<vmem>>, vector<4x8x1xf32>,
      %c0_28 = arith.constant 0 : index
      %c0_29 = arith.constant 0 : index
      %c0_30 = arith.constant 0 : index
      %47 = vector.load %arg18[%c0_28, %c0_29, %c0_30] : memref<4x8x16xf32, #tpu.memory_space<vmem>>, vector<4x8x16xf32>
      %48 = vector.broadcast %37 : vector<4x8x1xf32> to vector<4x8x16xf32>
      %49 = arith.mulf %48, %47 : vector<4x8x16xf32>
      "tpu.trace_start"() <{level = 10 : i32, message = "hts,hsd->htd"}> : () -> ()
      %cst_31 = arith.constant dense<0.000000e+00> : vector<4x8x16xf32>
      %50 = tpu.matmul %40, %14, %cst_31 {dimension_numbers = #tpu.dot_dimension_numbers<[2], [1], [1], [2], [0, 0, 0, 1, 1, 2], [0], [0]>} : vector<4x8x8xf32>, vector<4x8x16xf32>, vector<4x8x16xf32> -> vector<4x8x16xf32>
      "tpu.trace_stop"() : () -> ()
      %51 = arith.addf %49, %50 : vector<4x8x16xf32>
      %c0_32 = arith.constant 0 : index
      %c0_33 = arith.constant 0 : index
      %c0_34 = arith.constant 0 : index
      %52 = vector.load %arg18[%c0_32, %c0_33, %c0_34] : memref<4x8x16xf32, #tpu.memory_space<vmem>>, vector<4x8x16xf32>
      tpu.vector_store %arg18[%c0_32, %c0_33, %c0_34], %51 {strides = array<i32>} : memref<4x8x16xf32, #tpu.memory_space<vmem>>, vector<4x8x16xf32>,
      %c0_35 = arith.constant 0 : index
      %c0_36 = arith.constant 0 : index
      %c0_37 = arith.constant 0 : index
      %53 = vector.load %arg16[%c0_35, %c0_36, %c0_37] : memref<4x8x1xf32, #tpu.memory_space<vmem>>, vector<4x8x1xf32>
      tpu.vector_store %arg16[%c0_35, %c0_36, %c0_37], %35 {strides = array<i32>} : memref<4x8x1xf32, #tpu.memory_space<vmem>>, vector<4x8x1xf32>,
    } else {
    }
    %c3_i32 = arith.constant 3 : i32
    %6 = arith.cmpi eq, %arg2, %c3_i32 : i32
    %7 = arith.extui %6 : i1 to i32
    %c0_i32_2 = arith.constant 0 : i32
    %8 = arith.cmpi ne, %7, %c0_i32_2 : i32
    scf.if %8 {
      %c0 = arith.constant 0 : index
      %c0_3 = arith.constant 0 : index
      %c0_4 = arith.constant 0 : index
      %9 = vector.load %arg17[%c0, %c0_3, %c0_4] : memref<4x8x1xf32, #tpu.memory_space<vmem>>, vector<4x8x1xf32>
      %10 = tpu.reciprocal %9 : vector<4x8x1xf32> -> vector<4x8x1xf32>
      %c0_5 = arith.constant 0 : index
      %c0_6 = arith.constant 0 : index
      %c0_7 = arith.constant 0 : index
      %11 = vector.load %arg18[%c0_5, %c0_6, %c0_7] : memref<4x8x16xf32, #tpu.memory_space<vmem>>, vector<4x8x16xf32>
      %12 = vector.broadcast %10 : vector<4x8x1xf32> to vector<4x8x16xf32>
      %13 = arith.mulf %11, %12 : vector<4x8x16xf32>
      %14 = vector.extract_strided_slice %13 {offsets = [0, 0, 0], sizes = [1, 8, 16], strides = [1, 1, 1]} : vector<4x8x16xf32> to vector<1x8x16xf32>
      %15 = vector.shape_cast %14 : vector<1x8x16xf32> to vector<8x16xf32>
      %c0_8 = arith.constant 0 : index
      %c0_9 = arith.constant 0 : index
      %16 = vector.load %arg19[%c0_8, %c0_9] : memref<8x64xf32, #tpu.memory_space<vmem>>, vector<8x16xf32>
      tpu.vector_store %arg19[%c0_8, %c0_9], %15 {strides = array<i32>} : memref<8x64xf32, #tpu.memory_space<vmem>>, vector<8x16xf32>,
      %17 = vector.extract_strided_slice %13 {offsets = [1, 0, 0], sizes = [1, 8, 16], strides = [1, 1, 1]} : vector<4x8x16xf32> to vector<1x8x16xf32>
      %18 = vector.shape_cast %17 : vector<1x8x16xf32> to vector<8x16xf32>
      %c0_10 = arith.constant 0 : index
      %c16 = arith.constant 16 : index
      %19 = vector.load %arg19[%c0_10, %c16] : memref<8x64xf32, #tpu.memory_space<vmem>>, vector<8x16xf32>
      tpu.vector_store %arg19[%c0_10, %c16], %18 {strides = array<i32>} : memref<8x64xf32, #tpu.memory_space<vmem>>, vector<8x16xf32>,
      %20 = vector.extract_strided_slice %13 {offsets = [2, 0, 0], sizes = [1, 8, 16], strides = [1, 1, 1]} : vector<4x8x16xf32> to vector<1x8x16xf32>
      %21 = vector.shape_cast %20 : vector<1x8x16xf32> to vector<8x16xf32>
      %c0_11 = arith.constant 0 : index
      %c32 = arith.constant 32 : index
      %22 = vector.load %arg19[%c0_11, %c32] : memref<8x64xf32, #tpu.memory_space<vmem>>, vector<8x16xf32>
      tpu.vector_store %arg19[%c0_11, %c32], %21 {strides = array<i32>} : memref<8x64xf32, #tpu.memory_space<vmem>>, vector<8x16xf32>,
      %23 = vector.extract_strided_slice %13 {offsets = [3, 0, 0], sizes = [1, 8, 16], strides = [1, 1, 1]} : vector<4x8x16xf32> to vector<1x8x16xf32>
      %24 = vector.shape_cast %23 : vector<1x8x16xf32> to vector<8x16xf32>
      %c0_12 = arith.constant 0 : index
      %c48 = arith.constant 48 : index
      %25 = vector.load %arg19[%c0_12, %c48] : memref<8x64xf32, #tpu.memory_space<vmem>>, vector<8x16xf32>
      tpu.vector_store %arg19[%c0_12, %c48], %24 {strides = array<i32>} : memref<8x64xf32, #tpu.memory_space<vmem>>, vector<8x16xf32>,
      %c0_13 = arith.constant 0 : index
      %c0_14 = arith.constant 0 : index
      %26 = vector.load %arg7[%c0_13, %c0_14] : memref<64x64xf32, #tpu.memory_space<vmem>>, vector<64x64xf32>
      %c0_15 = arith.constant 0 : index
      %c0_16 = arith.constant 0 : index
      %27 = vector.load %arg19[%c0_15, %c0_16] : memref<8x64xf32, #tpu.memory_space<vmem>>, vector<8x64xf32>
      %cst = arith.constant dense<0.000000e+00> : vector<8x64xf32>
      %28 = tpu.matmul %27, %26, %cst {dimension_numbers = #tpu.dot_dimension_numbers<[1], [0], [0], [1], [0, 0, 1, 1], [], []>} : vector<8x64xf32>, vector<64x64xf32>, vector<8x64xf32> -> vector<8x64xf32>
      %c0_17 = arith.constant 0 : index
      %c0_18 = arith.constant 0 : index
      %29 = vector.load %arg8[%c0_17, %c0_18] : memref<1x64xf32, #tpu.memory_space<vmem>>, vector<1x64xf32>
      %30 = vector.broadcast %29 : vector<1x64xf32> to vector<8x64xf32>
      %31 = arith.addf %28, %30 : vector<8x64xf32>
      %c0_19 = arith.constant 0 : index
      %c0_20 = arith.constant 0 : index
      %c0_21 = arith.constant 0 : index
      %32 = vector.load %arg3[%c0_19, %c0_20, %c0_21] : memref<1x8x64xf32, #tpu.memory_space<vmem>>, vector<1x8x64xf32>
      %33 = vector.shape_cast %32 : vector<1x8x64xf32> to vector<8x64xf32>
      %34 = arith.addf %33, %31 : vector<8x64xf32>
      %c0_22 = arith.constant 0 : index
      %c0_23 = arith.constant 0 : index
      %35 = vector.load %arg9[%c0_22, %c0_23] : memref<1x64xf32, #tpu.memory_space<vmem>>, vector<1x64xf32>
      %c0_24 = arith.constant 0 : index
      %c0_25 = arith.constant 0 : index
      %36 = vector.load %arg10[%c0_24, %c0_25] : memref<1x64xf32, #tpu.memory_space<vmem>>, vector<1x64xf32>
      %cst_26 = arith.constant dense<0.000000e+00> : vector<8xf32>
      %37 = vector.multi_reduction <add>, %34, %cst_26 [1] : vector<8x64xf32> to vector<8xf32>
      %38 = vector.shape_cast %37 : vector<8xf32> to vector<8x1xf32>
      %cst_27 = arith.constant 6.400000e+01 : f32
      %39 = vector.broadcast %cst_27 : f32 to vector<8x1xf32>
      %40 = arith.divf %38, %39 : vector<8x1xf32>
      %41 = vector.broadcast %40 : vector<8x1xf32> to vector<8x64xf32>
      %42 = arith.subf %34, %41 : vector<8x64xf32>
      %43 = arith.mulf %42, %42 : vector<8x64xf32>
      %cst_28 = arith.constant dense<0.000000e+00> : vector<8xf32>
      %44 = vector.multi_reduction <add>, %43, %cst_28 [1] : vector<8x64xf32> to vector<8xf32>
      %45 = vector.shape_cast %44 : vector<8xf32> to vector<8x1xf32>
      %cst_29 = arith.constant 6.400000e+01 : f32
      %46 = vector.broadcast %cst_29 : f32 to vector<8x1xf32>
      %47 = arith.divf %45, %46 : vector<8x1xf32>
      %48 = vector.broadcast %40 : vector<8x1xf32> to vector<8x64xf32>
      %49 = arith.subf %34, %48 : vector<8x64xf32>
      %cst_30 = arith.constant 9.99999974E-6 : f32
      %50 = vector.broadcast %cst_30 : f32 to vector<8x1xf32>
      %51 = arith.addf %47, %50 : vector<8x1xf32>
      %52 = math.rsqrt %51 : vector<8x1xf32>
      %53 = vector.broadcast %52 : vector<8x1xf32> to vector<8x64xf32>
      %54 = arith.mulf %49, %53 : vector<8x64xf32>
      %55 = vector.broadcast %35 : vector<1x64xf32> to vector<8x64xf32>
      %56 = arith.mulf %54, %55 : vector<8x64xf32>
      %57 = vector.broadcast %36 : vector<1x64xf32> to vector<8x64xf32>
      %58 = arith.addf %56, %57 : vector<8x64xf32>
      %c0_31 = arith.constant 0 : index
      %c0_32 = arith.constant 0 : index
      %59 = vector.load %arg11[%c0_31, %c0_32] : memref<64x256xf32, #tpu.memory_space<vmem>>, vector<64x256xf32>
      %cst_33 = arith.constant dense<0.000000e+00> : vector<8x256xf32>
      %60 = tpu.matmul %58, %59, %cst_33 {dimension_numbers = #tpu.dot_dimension_numbers<[1], [0], [0], [1], [0, 0, 1, 1], [], []>} : vector<8x64xf32>, vector<64x256xf32>, vector<8x256xf32> -> vector<8x256xf32>
      %c0_34 = arith.constant 0 : index
      %c0_35 = arith.constant 0 : index
      %61 = vector.load %arg12[%c0_34, %c0_35] : memref<1x256xf32, #tpu.memory_space<vmem>>, vector<1x256xf32>
      %62 = vector.broadcast %61 : vector<1x256xf32> to vector<8x256xf32>
      %63 = arith.addf %60, %62 : vector<8x256xf32>
      %cst_36 = arith.constant 5.000000e-01 : f32
      %64 = vector.broadcast %cst_36 : f32 to vector<8x256xf32>
      %65 = arith.mulf %64, %63 : vector<8x256xf32>
      %cst_37 = arith.constant 4.471500e-02 : f32
      %66 = vector.broadcast %cst_37 : f32 to vector<8x256xf32>
      %67 = arith.mulf %66, %63 : vector<8x256xf32>
      %68 = arith.mulf %67, %63 : vector<8x256xf32>
      %69 = arith.mulf %68, %63 : vector<8x256xf32>
      %70 = arith.addf %63, %69 : vector<8x256xf32>
      %cst_38 = arith.constant 0.797884583 : f32
      %71 = vector.broadcast %cst_38 : f32 to vector<8x256xf32>
      %72 = arith.mulf %71, %70 : vector<8x256xf32>
      %73 = math.tanh %72 : vector<8x256xf32>
      %cst_39 = arith.constant 1.000000e+00 : f32
      %74 = vector.broadcast %cst_39 : f32 to vector<8x256xf32>
      %75 = arith.addf %74, %73 : vector<8x256xf32>
      %76 = arith.mulf %65, %75 : vector<8x256xf32>
      %c0_40 = arith.constant 0 : index
      %c0_41 = arith.constant 0 : index
      %77 = vector.load %arg13[%c0_40, %c0_41] : memref<256x64xf32, #tpu.memory_space<vmem>>, vector<256x64xf32>
      %cst_42 = arith.constant dense<0.000000e+00> : vector<8x64xf32>
      %78 = tpu.matmul %76, %77, %cst_42 {dimension_numbers = #tpu.dot_dimension_numbers<[1], [0], [0], [1], [0, 0, 1, 1], [], []>} : vector<8x256xf32>, vector<256x64xf32>, vector<8x64xf32> -> vector<8x64xf32>
      %c0_43 = arith.constant 0 : index
      %c0_44 = arith.constant 0 : index
      %79 = vector.load %arg14[%c0_43, %c0_44] : memref<1x64xf32, #tpu.memory_space<vmem>>, vector<1x64xf32>
      %80 = vector.broadcast %79 : vector<1x64xf32> to vector<8x64xf32>
      %81 = arith.addf %78, %80 : vector<8x64xf32>
      %82 = arith.addf %58, %81 : vector<8x64xf32>
      %c0_45 = arith.constant 0 : index
      %c0_46 = arith.constant 0 : index
      %c0_47 = arith.constant 0 : index
      %83 = vector.load %arg15[%c0_45, %c0_46, %c0_47] : memref<1x8x64xf32, #tpu.memory_space<vmem>>, vector<1x8x64xf32>
      %84 = vector.shape_cast %83 : vector<1x8x64xf32> to vector<8x64xf32>
      %85 = vector.shape_cast %82 : vector<8x64xf32> to vector<1x8x64xf32>
      tpu.vector_store %arg15[%c0_45, %c0_46, %c0_47], %85 {strides = array<i32>} : memref<1x8x64xf32, #tpu.memory_space<vmem>>, vector<1x8x64xf32>,
    } else {
    }
    return
  }
  func.func @transform_0(%arg0: i32, %arg1: i32, %arg2: i32) -> (i32, i32, i32) {
    %c0_i32 = arith.constant 0 : i32
    %c0_i32_0 = arith.constant 0 : i32
    return %arg0, %arg1, %c0_i32 : i32, i32, i32
  }
  func.func @transform_1(%arg0: i32, %arg1: i32, %arg2: i32) -> (i32, i32, i32, i32) {
    %c0_i32 = arith.constant 0 : i32
    %c0_i32_0 = arith.constant 0 : i32
    %c0_i32_1 = arith.constant 0 : i32
    return %arg0, %c0_i32, %arg1, %c0_i32_0 : i32, i32, i32, i32
  }
  func.func @transform_2(%arg0: i32, %arg1: i32, %arg2: i32) -> (i32, i32, i32, i32) {
    %0 = arith.minsi %arg2, %arg1 : i32
    %c0_i32 = arith.constant 0 : i32
    %c0_i32_0 = arith.constant 0 : i32
    %c0_i32_1 = arith.constant 0 : i32
    return %arg0, %c0_i32, %0, %c0_i32_0 : i32, i32, i32, i32
  }
  func.func @transform_3(%arg0: i32, %arg1: i32, %arg2: i32) -> (i32, i32, i32, i32) {
    %0 = arith.minsi %arg2, %arg1 : i32
    %c0_i32 = arith.constant 0 : i32
    %c0_i32_0 = arith.constant 0 : i32
    %c0_i32_1 = arith.constant 0 : i32
    return %arg0, %c0_i32, %0, %c0_i32_0 : i32, i32, i32, i32
  }
  func.func @transform_4(%arg0: i32, %arg1: i32, %arg2: i32) -> (i32, i32) {
    %c0_i32 = arith.constant 0 : i32
    %c0_i32_0 = arith.constant 0 : i32
    %c0_i32_1 = arith.constant 0 : i32
    return %c0_i32, %c0_i32_0 : i32, i32
  }
  func.func @transform_5(%arg0: i32, %arg1: i32, %arg2: i32) -> (i32, i32) {
    %c0_i32 = arith.constant 0 : i32
    %c0_i32_0 = arith.constant 0 : i32
    %c0_i32_1 = arith.constant 0 : i32
    return %c0_i32, %c0_i32_0 : i32, i32
  }
  func.func @transform_6(%arg0: i32, %arg1: i32, %arg2: i32) -> (i32, i32) {
    %c0_i32 = arith.constant 0 : i32
    %c0_i32_0 = arith.constant 0 : i32
    %c0_i32_1 = arith.constant 0 : i32
    return %c0_i32, %c0_i32_0 : i32, i32
  }
  func.func @transform_7(%arg0: i32, %arg1: i32, %arg2: i32) -> (i32, i32) {
    %c0_i32 = arith.constant 0 : i32
    %c0_i32_0 = arith.constant 0 : i32
    %c0_i32_1 = arith.constant 0 : i32
    return %c0_i32, %c0_i32_0 : i32, i32
  }
  func.func @transform_8(%arg0: i32, %arg1: i32, %arg2: i32) -> (i32, i32) {
    %c0_i32 = arith.constant 0 : i32
    %c0_i32_0 = arith.constant 0 : i32
    %c0_i32_1 = arith.constant 0 : i32
    return %c0_i32, %c0_i32_0 : i32, i32
  }
  func.func @transform_9(%arg0: i32, %arg1: i32, %arg2: i32) -> (i32, i32) {
    %c0_i32 = arith.constant 0 : i32
    %c0_i32_0 = arith.constant 0 : i32
    %c0_i32_1 = arith.constant 0 : i32
    return %c0_i32, %c0_i32_0 : i32, i32
  }
  func.func @transform_10(%arg0: i32, %arg1: i32, %arg2: i32) -> (i32, i32) {
    %c0_i32 = arith.constant 0 : i32
    %c0_i32_0 = arith.constant 0 : i32
    %c0_i32_1 = arith.constant 0 : i32
    return %c0_i32, %c0_i32_0 : i32, i32
  }
  func.func @transform_11(%arg0: i32, %arg1: i32, %arg2: i32) -> (i32, i32) {
    %c0_i32 = arith.constant 0 : i32
    %c0_i32_0 = arith.constant 0 : i32
    %c0_i32_1 = arith.constant 0 : i32
    return %c0_i32, %c0_i32_0 : i32, i32
  }
  func.func @transform_12(%arg0: i32, %arg1: i32, %arg2: i32) -> (i32, i32, i32) {
    %c0_i32 = arith.constant 0 : i32
    %c0_i32_0 = arith.constant 0 : i32
    return %arg0, %arg1, %c0_i32 : i32, i32, i32
  }
}

</mosaic_0001>

<bundles_post_ra>
// kernel: _block_forward_impl.2
= control target key start
LH: loop header
LB: loop body
LE: loop exit
PB: predicated region body
PF: predicated region fallthrough
CT: control target
= control target key end

     0   :  { %s1455_s0 = inlined_call_operand.vmem [shape: f32[2,32,64], index: 0, kind: input, shape index: {}]   ;;  %s1456_s1 = inlined_call_operand.vmem [shape: f32[1,64], index: 1, kind: input, shape index: {}]   ;;  %s1457_s2 = inlined_call_operand.vmem [shape: f32[1,64], index: 2, kind: input, shape index: {}]   ;;  %s1458_s3 = inlined_call_operand.vmem [shape: f32[64,192], index: 3, kind: input, shape index: {}]   ;;  %s1459_s4 = inlined_call_operand.vmem [shape: f32[1,192], index: 4, kind: input, shape index: {}]   ;;  %s1460_s5 = inlined_call_operand.hbm [shape: f32[2,32,64], index: 5, kind: output, shape index: {0}]   ;;  %s1461_s6 = inlined_call_operand.vmem [shape: f32[2,4,32,16], index: 6, kind: output, shape index: {1}]   ;;  %s1462_s7 = inlined_call_operand.vmem [shape: f32[2,4,32,16], index: 7, kind: output, shape index: {2}]   ;;  %s1463_s8 = inlined_call_operand.vmem [shape: f32[2,4,32,16], index: 8, kind: output, shape index: {3}]  }
   0x1   :  { %1468 = sst [smem:[#allocation11_spill]] %s1455_s0 }
   0x2   :  { %1469 = sst [smem:[#allocation12_spill]] %s1456_s1 }
   0x3   :  { %1470 = sst [smem:[#allocation13_spill]] %s1457_s2 }
   0x4   :  { %1471 = sst [smem:[#allocation14_spill]] %s1458_s3 }
   0x5   :  { %1472 = sst [smem:[#allocation15_spill]] %s1459_s4 }
   0x6   :  { %14 = vsyncpa [#allocation3], 0 }
   0x7   :  { %16 = vsyncpa [#allocation3 + $0x1], 0  ;;  %s1176_s27 = smov 0   ;;  %s1178_s28 = smov 0  }
   0x8   :  { %s1180_s29 = smov 0   ;;  %s1182_s30 = smov 0  }
   0x9   :  { %s1184_s9 = smov 0   ;;  %s1186_s10 = smov 0  }
   0xa   :  { %s1188_s11 = smov 0   ;;  %s1190_s12 = smov 0  }
   0xb LB: > { %1473 = sst [smem:[#allocation8_spill]] %s1116_s11  ;;  %s892_s13 = sadd.s32 4294967295, %s1120_s12   ;;  %s1120_s12 = sphi %s1190_s12, %s22_s12   ;;  %s1116_s11 = sphi %s1188_s11, %s1486_s11   ;;  %s1112_s10 = sphi %s1186_s10, %s1491_s10   ;;  %s1108_s9 = sphi %s1184_s9, %s1484_s9   ;;  %s1104_s30 = sphi %s1182_s30, %s1490_s30   ;;  %s1100_s29 = sphi %s1180_s29, %s1489_s29   ;;  %s1096_s28 = sphi %s1178_s28, %s1488_s28   ;;  %s1092_s27 = sphi %s1176_s27, %s1487_s27  }
   0xc   : > { %s893_s14 = sadd.s32 4294967294, %s1120_s12   ;;  %s31_s15 = sadd.s32 1, %s1112_s10 }
   0xd   : > { %p32_p0 = scmp.ge.s32.totalorder %s31_s15, 4  ;;  %s34_s16 = sadd.s32 1, %s1116_s11 }
   0xe   : > { %p165_p1 = scmp.ne.s32.totalorder %s1100_s29, %s1096_s28  ;;  %p166_p2 = scmp.eq.s32.totalorder %s892_s13, 7 }
   0xf   : > { %s1493_s15 = smov (%p32_p0, %s31_s15), 0  ;;  %s1495_s16 = smov (!%p32_p0, %s34_s16), %s1116_s11 }
  0x10   : > { %1474 = sst [smem:[#allocation9_spill]] %s1493_s15  ;;  %s151_s17 = ssub.s32 %s1112_s10, %s1493_s15 }
  0x11   : > { %p1227_p3 = por %p166_p2, %p165_p1  ;;  %p36_p4 = scmp.ge.s32.totalorder %s1495_s16, 2 }
  0x12   : > { %p171_p5 = scmp.ne.s32.totalorder %s1096_s28, %s1092_s27  ;;  %p172_p6 = scmp.eq.s32.totalorder %s893_s14, 7 }
  0x13   : > { %p896_p7 = scmp.ge.s32.totalorder %s1120_s12, 1  ;;  %s1497_s16 = smov (%p36_p4, %s1495_s16), 0 }
  0x14   : > { %1476 = sst [smem:[#allocation10_spill]] %s1497_s16  ;;  %p1236_p8 = por %p172_p6, %p171_p5 }
  0x15   : > { %p297_p9 = scmp.lt.s32.totalorder %s1120_s12, 9  ;;  %s150_s20 = ssub.s32 %s1116_s11, %s1497_s16 }
  0x16   : > { %s155_s21 = sadd.s32 1, %s1100_s29  ;;  %s152_s22 = sor.u32 %s151_s17, %s150_s20 }
  0x17   : > { %p298_p10 = pnand %p896_p7, %p297_p9  ;;  %p153_p11 = scmp.eq.s32.totalorder %s152_s22, 0 }
  0x18   : > { %p346_p12 = scmp.lt.s32.totalorder (!%p298_p10), %s1108_s9, 1  ;;  %p348_p13 = scmp.lt.s32.totalorder (!%p298_p10), %s1104_s30, 3  ;;  %vm357_vm0 = vcmask (!%p298_p10), 523264   ;;  %v1122_v20 = vmov (!%p298_p10), 0.0   ;;  %v405_v41 = vlaneseq (!%p298_p10)  ;;  %vm489_vm1 = vcmask (!%p298_p10), 130048  }
  0x19   : > { %s1245_s23 = scalar_select %p153_p11, %s1100_s29, %s155_s21  }
  0x1a   : > { %301 = sbr.rel (%p298_p10) target bundleno = 740 (0x2e4), region = 40  ;;  %s1478_s0 = sld [smem:[#allocation11_spill]] (!%p298_p10)  ;;  %482 = vmatprep.mubr.f32.mxu0 (!%p298_p10), %v1122_v20  ;;  %v406_v42 = vshrl.u32 (!%p298_p10), %v405_v41, 7 }
  0x1b   : > { %s1479_s3 = sld [smem:[#allocation14_spill]] (!%p298_p10)  ;;  %s1480_s1 = sld [smem:[#allocation12_spill]] (!%p298_p10) }
  0x1c   : > { %s1481_s2 = sld [smem:[#allocation13_spill]] (!%p298_p10)  ;;  %v407_v43 = vsub.s32 (!%p298_p10), 0, %v406_v42  ;;  %s1482_s4 = sld [smem:[#allocation15_spill]] (!%p298_p10)  ;;  %v411_v45 = vsub.s32 (!%p298_p10), 1, %v406_v42 }
  0x1d   : > { %s1124_s20 = smov (!%p298_p10), 64   ;;  %s1466_s15 = smov (!%p298_p10), 112  }
  0x21   : > { %s347_s24 = scalar_select %p346_p12, %s1108_s9, 1  ;;  %v388_v7 = vld [vmem:[%s1479_s3 + $0x8] sm:$0xff]  ;;  %v390_v8 = vld [vmem:[%s1479_s3 + $0x18] sm:$0xff]  ;;  %v387_v10 = vld [vmem:[%s1479_s3] sm:$0xff] }
  0x22   : > { %s349_s25 = scalar_select %p348_p13, %s1104_s30, 3  ;;  %v929_v9 = vpack.c.bf16 %v390_v8, %v388_v7  ;;  %v389_v11 = vld [vmem:[%s1479_s3 + $0x10] sm:$0xff]  ;;  %v392_v13 = vld [vmem:[%s1479_s3 + $0x28] sm:$0xff]  ;;  %v394_v14 = vld [vmem:[%s1479_s3 + $0x38] sm:$0xff] }
  0x23   : > { %s901_s26 = sshll.u32 %s347_s24, 2  ;;  %v931_v12 = vpack.c.bf16 %v389_v11, %v387_v10  ;;  %v391_v15 = vld [vmem:[%s1479_s3 + $0x20] sm:$0xff]  ;;  %v933_v16 = vpack.c.bf16 %v394_v14, %v392_v13  ;;  %v393_v17 = vld [vmem:[%s1479_s3 + $0x30] sm:$0xff]  ;;  %v396_v18 = vld [vmem:[%s1479_s3 + $0x48] sm:$0xff]  ;;  %s1125_s24 = smov 80  }
  0x24   : > { %s351_s13 = sadd.s32 %s901_s26, %s349_s25  ;;  %930 = vmatprep.subr.bf16.mxu0 %v929_v9  ;;  %v398_v19 = vld [vmem:[%s1479_s3 + $0x58] sm:$0xff]  ;;  %v935_v21 = vpack.c.bf16 %v393_v17, %v391_v15  ;;  %v395_v23 = vld [vmem:[%s1479_s3 + $0x40] sm:$0xff]  ;;  %v397_v24 = vld [vmem:[%s1479_s3 + $0x50] sm:$0xff]  ;;  %s1127_s25 = smov 96  }
  0x25   : > { %s902_s14 = sshll.u32 %s351_s13, 3  ;;  %932 = vmatpush1.bf16.msra.mxu0 %v931_v12  ;;  %v937_v22 = vpack.c.bf16 %v398_v19, %v396_v18  ;;  %v400_v25 = vld [vmem:[%s1479_s3 + $0x68] sm:$0xff]  ;;  %v402_v26 = vld [vmem:[%s1479_s3 + $0x78] sm:$0xff]  ;;  %v939_v27 = vpack.c.bf16 %v397_v24, %v395_v23  ;;  %v399_v29 = vld [vmem:[%s1479_s3 + $0x60] sm:$0xff]  ;;  %s919_s26 = sshll.u32 %s1108_s9, 2 }
  0x26   : > { %s353_s17 = scalar_lea.vmem %s1478_s0, %s902_s14  ;;  %934 = vmatprep.subr.bf16.mxu0 %v933_v16  ;;  %v941_v28 = vpack.c.bf16 %v402_v26, %v400_v25  ;;  %v401_v30 = vld [vmem:[%s1479_s3 + $0x70] sm:$0xff]  ;;  %v903_v36 = vld [vmem:[%s1480_s1] ss:$0 sm:$0xff]  ;;  %s1123_s14 = smov 48  }
  0x27   : > { %v354_v0 = vld [vmem:[%s353_s17] sm:$0xff]  ;;  %v943_v31 = vpack.c.bf16 %v401_v30, %v399_v29  ;;  %s1305_s17 = sand.u32 1, %s1096_s28  }
  0x28   : > { %v358_v1 = vsel %vm357_vm0, %v354_v0, 0.0  ;;  %s897_s22 = sshll.u32 %s1305_s17, 3  ;;  %v904_v38 = vld [vmem:[%s1481_s2] ss:$0 sm:$0xff]  ;;  %s1323_s13 = sshll.u32 %s1305_s17, 5 }
  0x29   : > { %359 = vadd.xlane.f32.xlu0 %v358_v1  ;;  %936 = vmatpush1.bf16.msra.mxu0 %v935_v21  ;;  %s1315_s16 = scalar_lea.vmem [#allocation2], %s897_s22  ;;  %v403_v44 = vld [vmem:[%s1482_s4] sm:$0x3]  ;;  %s1326_s21 = scalar_lea.vmem [#allocation4], %s1323_s13 }
  0x2a   : > { %938 = vmatprep.subr.bf16.mxu0 %v937_v22  ;;  %v408_v46 = vrot.slane %v403_v44, %v407_v43  ;;  %v412_v47 = vrot.slane %v403_v44, %v411_v45  ;;  %s1331_s22 = scalar_lea.vmem [#allocation6], %s1323_s13  ;;  %s571_s1 = sshll.u32 %s1315_s16, 4  ;;  %s1345_s1 = int_to_ptr.vmem [resolvable:$true] %s571_s1 }
  0x2b   : > { %s1026_s11 = scalar_lea.vmem %s1345_s1, 128 }
  0x2c   : > { %p1027_p0 = scmp.ne.s32.totalorder %s1345_s1, %s1026_s11 }
  0x2d   : > { %940 = vmatpush1.bf16.msra.mxu0 %v939_v27 }
  0x2e   : > { %942 = vmatprep.subr.bf16.mxu0 %v941_v28  ;;  %p1028_p1 = pnand %p1027_p0, %p1227_p3 }
  0x30   : > { %p1029_p2 = pneg %p1028_p1 }
  0x31   : > { %944 = vmatpush1.bf16.msra.mxu0 %v943_v31 }
  0xb6   : > { %v360_v2 = vpop.xlane.xlu0 %359 }
  0xb7   : > { %v362_v3 = vmul.f32 0.015625, %v360_v2 }
  0xb9   : > { %v363_v4 = vsub.f32 %v354_v0, %v362_v3 }
  0xbb   : > { %v364_v5 = vmul.f32 %v363_v4, %v363_v4 }
  0xbd   : > { %v365_v6 = vsel %vm357_vm0, %v364_v5, 0.0 }
  0xbe   : > { %366 = vadd.xlane.f32.xlu0 %v365_v6 }
 0x14b   : > { %v367_v32 = vpop.xlane.xlu0 %366 }
 0x14c   : > { %v368_v33 = vmul.f32 0.015625, %v367_v32 }
 0x14e   : > { %v369_v34 = vadd.f32 1e-05, %v368_v33 }
 0x150   : > { %1024 = vrsqrt.f32 %v369_v34 }
 0x15a   : > { %v1025_v35 = vpop.eup %1024 }
 0x15b   : > { %v371_v37 = vmul.f32 %v1025_v35, %v363_v4 }
 0x15d   : > { %v378_v39 = vmul.f32 %v903_v36, %v371_v37 }
 0x15f   : > { %v385_v40 = vadd.f32 %v904_v38, %v378_v39 }
 0x161   : > { %905 = vmatmul.mubr.msk.f32.vlgmr.msra.gmra.mrb[0].mxu0 %vm357_vm0, %v385_v40  ;;  %386 = vst.msk [vmem:[%s1315_s16] sm:$0xff] %vm357_vm0, %v385_v40 }
 0x234   : > { %v484_v48 = vpop.f32.mrb[0].mxu0 }
 0x235   : > { %v485_v49 = vadd.f32 %v484_v48, %v408_v46  ;;  %v486_v50 = vpop.f32.mrb[1].mxu0 }
 0x236   : > { %v487_v51 = vadd.f32 %v486_v50, %v412_v47 }
 0x237   : > { %502 = vrot.lane.b32.xlu0 %v485_v49, %s1123_s14  ;;  %492 = vrot.lane.b32.xlu1 %v485_v49, %s1124_s20  ;;  %490 = vst.msk [vmem:[%s1326_s21] sm:$0xff] %vm489_vm1, %v485_v49  ;;  %s1128_s14 = smov 32   ;;  %s567_s20 = sadd.s32 %s1104_s30, %s919_s26 }
 0x238   : > { %496 = vst.msk [vmem:[%s1331_s22] sm:$0xff] %vm489_vm1, %v487_v51  ;;  %s920_s0 = sshll.u32 %s567_s20, 7  ;;  %s1129_s26 = smov [#allocation2]  }
 0x239   : > { %s1343_s4 = scalar_lea.hbm %s1460_s5, %s920_s0 }
 0x23b   : > { %538 = vrot.lane.b32.xlu0 %v487_v51, %s1125_s24  ;;  %497 = vrot.lane.b32.xlu1 %v485_v49, %s1466_s15  ;;  %s544_s15 = scalar_lea.sflag [#allocation3], %s1305_s17 }
 0x23f   : > { %513 = vrot.lane.b32.xlu1 %v485_v49, %s1127_s25 }
 0x243   : > { %518 = vrot.lane.b32.xlu1 %v485_v49, %s1128_s14  ;;  %s1030_s14 = sshll.u32 %s1129_s26, 4  ;;  %s1031_s14 = int_to_ptr.vmem [resolvable:$false] %s1030_s14 }
 0x244   : > { %s1032_s16 = scalar_lea.vmem %s1031_s14, 256  ;;  %p1033_p4 = scmp.lt.s32.totalorder %s1345_s1, %s1031_s14 }
 0x245   : > { %p1034_p5 = scmp.lt.s32.totalorder %s1032_s16, %s1026_s11 }
 0x247   : > { %528 = vrot.lane.b32.xlu1 %v485_v49, %s1125_s24  ;;  %p1035_p6 = por %p1034_p5, %p1033_p4 }
 0x249   : > { %p1036_p7 = pnand %p1035_p6, %p1029_p2 }
 0x24b   : > { %1039 = shalt.err (!%p1036_p7)
}
 0x24c   : > { %s1040_s0 = scalar_lea.hbm %s1343_s4, 128  ;;  %s1044_s17 = scalar_lea.hbm %s1460_s5, 1024 }
 0x24d   : > { %p1041_p9 = scmp.ne.s32.totalorder %s1343_s4, %s1040_s0  ;;  %p1045_p12 = scmp.lt.u32.totalorder %s1343_s4, %s1460_s5 }
 0x24e   : > { %p1046_p13 = scmp.lt.u32.totalorder %s1044_s17, %s1040_s0  ;;  %p1048_p1 = scmp.lt.u32.totalorder %s1040_s0, %s1343_s4 }
 0x24f   : > { %p1042_p10 = pnand %p1041_p9, %p1227_p3 }
 0x250   : > { %p1047_p0 = por %p1046_p13, %p1045_p12 }
 0x251   : > { %p1043_p11 = pneg %p1042_p10 }
 0x252   : > { %p1049_p2 = por %p1048_p1, %p1047_p0 }
 0x254   : > { %p1050_p4 = pnand %p1049_p2, %p1043_p11 }
 0x256   : > { %1053 = shalt.err (!%p1050_p4)
}
 0x257   : > { %945 = dma.vmem_to_hbm [thread:$0]  (%p1227_p3), %s1345_s1, 128, %s1343_s4, %s544_s15   ;;  %v615_v62 = vld [vmem:[%s1326_s21] sm:$0xff] (%p1227_p3) }
 0x258   : > { %s1483_s11 = smov 112   ;;  %s1130_s26 = smov 16  }
 0x259   : > { %508 = vrot.lane.b32.xlu1 %v487_v51, %s1483_s11  ;;  %s1372_s14 = scalar_lea.vmem [#allocation5], %s1323_s13  ;;  %s921_s1 = sshll.u32 (%p1227_p3), %s1108_s9, 4 }
 0x25a   : > { %s579_s4 = sadd.s32 (%p1227_p3), %s1104_s30, %s921_s1 }
 0x25b   : > { %s922_s13 = sshll.u32 (%p1227_p3), %s579_s4, 3 }
 0x25c   : > { %s581_s16 = scalar_lea.vmem (%p1227_p3), %s1461_s6, %s922_s13 }
 0x25d   : > { %523 = vrot.lane.b32.xlu1 %v487_v51, %s1127_s25  ;;  %616 = vst [vmem:[%s581_s16] sm:$0xff] (%p1227_p3), %v615_v62 }
 0x261   : > { %533 = vrot.lane.b32.xlu1 %v485_v49, %s1130_s26 }
 0x2a9   : > { %v503_v52 = vpop.permute.xlu0 %502  ;;  %v493_v53 = vpop.permute.xlu1 %492 }
 0x2aa   : > { %907 = vst.msk [vmem:[%s1372_s14 + $0x8] sm:$0xff] %vm489_vm1, %v503_v52  ;;  %495 = vst.msk [vmem:[%s1372_s14] sm:$0xff] %vm489_vm1, %v493_v53 }
 0x2ad   : > { %v539_v54 = vpop.permute.xlu0 %538  ;;  %v498_v55 = vpop.permute.xlu1 %497 }
 0x2ae   : > { %914 = vst.msk [vmem:[%s1331_s22 + $0x18] sm:$0xff] %vm489_vm1, %v539_v54  ;;  %906 = vst.msk [vmem:[%s1326_s21 + $0x8] sm:$0xff] %vm489_vm1, %v498_v55 }
 0x2b1   : > { %v514_v56 = vpop.permute.xlu1 %513 }
 0x2b2   : > { %909 = vst.msk [vmem:[%s1326_s21 + $0x10] sm:$0xff] %vm489_vm1, %v514_v56 }
 0x2b5   : > { %v519_v57 = vpop.permute.xlu1 %518  ;;  %v617_v63 = vld [vmem:[%s1326_s21 + $0x8] sm:$0xff] (%p1227_p3) }
 0x2b6   : > { %910 = vst.msk [vmem:[%s1372_s14 + $0x10] sm:$0xff] %vm489_vm1, %v519_v57  ;;  %618 = vst [vmem:[%s581_s16 + $0x20] sm:$0xff] (%p1227_p3), %v617_v63 }
 0x2b9   : > { %v529_v58 = vpop.permute.xlu1 %528  ;;  %v619_v0 = vld [vmem:[%s1326_s21 + $0x10] sm:$0xff] (%p1227_p3) }
 0x2ba   : > { %912 = vst.msk [vmem:[%s1326_s21 + $0x18] sm:$0xff] %vm489_vm1, %v529_v58  ;;  %620 = vst [vmem:[%s581_s16 + $0x40] sm:$0xff] (%p1227_p3), %v619_v0 }
 0x2c1   : > { %v621_v1 = vld [vmem:[%s1326_s21 + $0x18] sm:$0xff] (%p1227_p3) }
 0x2c2   : > { %622 = vst [vmem:[%s581_s16 + $0x60] sm:$0xff] (%p1227_p3), %v621_v1 }
 0x2cb   : > { %v509_v59 = vpop.permute.xlu1 %508 }
 0x2cc   : > { %908 = vst.msk [vmem:[%s1331_s22 + $0x8] sm:$0xff] %vm489_vm1, %v509_v59 }
 0x2ce   : > { %577 = sbr.rel (!%p1227_p3) target bundleno = 725 (0x2d5), region = 48 }
 0x2cf   : > { %v524_v60 = vpop.permute.xlu1 %523 }
 0x2d0   : > { %911 = vst.msk [vmem:[%s1331_s22 + $0x10] sm:$0xff] %vm489_vm1, %v524_v60 }
 0x2d3   : > { %v534_v61 = vpop.permute.xlu1 %533 }
 0x2d4   : > { %913 = vst.msk [vmem:[%s1372_s14 + $0x18] sm:$0xff] %vm489_vm1, %v534_v61 }
 0x2d5 PF: > { %628 = sbr.rel (!%p1227_p3) target bundleno = 733 (0x2dd), region = 86  ;;  %s923_s21 = sshll.u32 (%p1227_p3), %s1108_s9, 4  ;;  %v666_v2 = vld [vmem:[%s1372_s14] sm:$0xff] (%p1227_p3)  ;;  %v668_v3 = vld [vmem:[%s1372_s14 + $0x8] sm:$0xff] (%p1227_p3)  ;;  %v670_v4 = vld [vmem:[%s1372_s14 + $0x10] sm:$0xff] (%p1227_p3) }
 0x2d6   : > { %s630_s0 = sadd.s32 (%p1227_p3), %s1104_s30, %s923_s21 }
 0x2d7   : > { %s924_s2 = sshll.u32 (%p1227_p3), %s630_s0, 3 }
 0x2d8   : > { %s632_s24 = scalar_lea.vmem (%p1227_p3), %s1462_s7, %s924_s2 }
 0x2d9   : > { %667 = vst [vmem:[%s632_s24] sm:$0xff] (%p1227_p3), %v666_v2  ;;  %669 = vst [vmem:[%s632_s24 + $0x20] sm:$0xff] (%p1227_p3), %v668_v3 }
 0x2da   : > { %671 = vst [vmem:[%s632_s24 + $0x40] sm:$0xff] (%p1227_p3), %v670_v4 }
 0x2db   : > { %v672_v5 = vld [vmem:[%s1372_s14 + $0x18] sm:$0xff] (%p1227_p3) }
 0x2dc   : > { %673 = vst [vmem:[%s632_s24 + $0x60] sm:$0xff] %v672_v5 }
 0x2dd PF: > { %679 = sbr.rel (!%p1227_p3) target bundleno = 740 (0x2e4), region = 124  ;;  %s925_s20 = sshll.u32 (%p1227_p3), %s1108_s9, 4  ;;  %v717_v6 = vld [vmem:[%s1331_s22] sm:$0xff] (%p1227_p3)  ;;  %v719_v7 = vld [vmem:[%s1331_s22 + $0x8] sm:$0xff] (%p1227_p3)  ;;  %v721_v8 = vld [vmem:[%s1331_s22 + $0x10] sm:$0xff] (%p1227_p3) }
 0x2de   : > { %s681_s11 = sadd.s32 (%p1227_p3), %s1104_s30, %s925_s20  ;;  %v723_v9 = vld [vmem:[%s1331_s22 + $0x18] sm:$0xff] (%p1227_p3) }
 0x2df   : > { %s926_s26 = sshll.u32 (%p1227_p3), %s681_s11, 3 }
 0x2e0   : > { %s683_s4 = scalar_lea.vmem (%p1227_p3), %s1463_s8, %s926_s26 }
 0x2e1   : > { %718 = vst [vmem:[%s683_s4] sm:$0xff] (%p1227_p3), %v717_v6  ;;  %720 = vst [vmem:[%s683_s4 + $0x20] sm:$0xff] (%p1227_p3), %v719_v7 }
 0x2e2   : > { %722 = vst [vmem:[%s683_s4 + $0x40] sm:$0xff] (%p1227_p3), %v721_v8  ;;  %724 = vst [vmem:[%s683_s4 + $0x60] sm:$0xff] (%p1227_p3), %v723_v9 }
 0x2e4 PF: > { %p951_p3 = scmp.ge.s32.totalorder %s1120_s12, 2  ;;  %s736_s9 = sand.u32 1, %s1092_s27  }
 0x2e5   : > { %s737_s30 = scalar_lea.sflag [#allocation3], %s736_s9 }
 0x2e6   : > { %p948_p5 = pnand %p951_p3, %p1236_p8 }
 0x2e8   : > { %1087 = dma.done.wait (!%p948_p5), %s737_s30, 128  }
 0x2e9   : > { %1089 = vsyncadd (!%p948_p5), %s737_s30, 4294967168  ;;  %s22_s12 = sadd.s32 1, %s1120_s12   ;;  %s1484_s9 = sld [smem:[#allocation8_spill]] }
 0x2ea   : > { %p19_p6 = scmp.ge.s32.totalorder %s22_s12, 10   ;;  %s1485_s18 = sld [smem:[#allocation9_spill]] }
 0x2eb   : > { %s1486_s11 = sld [smem:[#allocation10_spill]]  ;;  %s1487_s27 = smov %s1096_s28 }
 0x2ec   : > { %s1488_s28 = smov %s1100_s29  ;;  %s1489_s29 = smov %s1245_s23 }
 0x2ed   : > { %s1490_s30 = smov %s1112_s10  ;;  %21 = sbr.rel (!%p19_p6) target bundleno = 11 (0xb), region = 234 }
 0x2f0   : > { %s1491_s10 = smov %s1485_s18 }
 0x2f4   :  { %763 = vsyncpa [#allocation3], 1 }
 0x2f5   :  { %765 = vsyncpa [#allocation3 + $0x1], 1 }

// kernel: _block_forward_impl.3
= control target key start
LH: loop header
LB: loop body
LE: loop exit
PB: predicated region body
PF: predicated region fallthrough
CT: control target
= control target key end

     0   :  { %s3232_s0 = inlined_call_operand.hbm [shape: f32[2,32,64], index: 0, kind: input, shape index: {}, may-alias: {0,12}]   ;;  %s3233_s1 = inlined_call_operand.vmem [shape: f32[2,4,32,16], index: 1, kind: input, shape index: {}]   ;;  %s3234_s2 = inlined_call_operand.vmem [shape: f32[2,4,32,16], index: 2, kind: input, shape index: {}]   ;;  %s3235_s3 = inlined_call_operand.vmem [shape: f32[2,4,32,16], index: 3, kind: input, shape index: {}]   ;;  %s3236_s4 = inlined_call_operand.vmem [shape: f32[64,64], index: 4, kind: input, shape index: {}]   ;;  %s3237_s5 = inlined_call_operand.vmem [shape: f32[1,64], index: 5, kind: input, shape index: {}]   ;;  %s3238_s6 = inlined_call_operand.vmem [shape: f32[1,64], index: 6, kind: input, shape index: {}]   ;;  %s3239_s7 = inlined_call_operand.vmem [shape: f32[1,64], index: 7, kind: input, shape index: {}]   ;;  %s3240_s8 = inlined_call_operand.vmem [shape: f32[64,256], index: 8, kind: input, shape index: {}]   ;;  %s3241_s9 = inlined_call_operand.vmem [shape: f32[1,256], index: 9, kind: input, shape index: {}]   ;;  %s3242_s10 = inlined_call_operand.vmem [shape: f32[256,64], index: 10, kind: input, shape index: {}]   ;;  %s3243_s11 = inlined_call_operand.vmem [shape: f32[1,64], index: 11, kind: input, shape index: {}]   ;;  %s3244_s12 = inlined_call_operand.hbm [shape: f32[2,32,64], index: 12, kind: output, shape index: {}, may-alias: {0,12}]  }
   0x1   :  { %3257 = sst [smem:[#allocation24_spill]] %s3236_s4 }
   0x2   :  { %3258 = sst [smem:[#allocation25_spill]] %s3237_s5 }
   0x3   :  { %3259 = sst [smem:[#allocation26_spill]] %s3238_s6 }
   0x4   :  { %3260 = sst [smem:[#allocation27_spill]] %s3239_s7 }
   0x5   :  { %3261 = sst [smem:[#allocation28_spill]] %s3240_s8 }
   0x6   :  { %3262 = sst [smem:[#allocation29_spill]] %s3241_s9 }
   0x7   :  { %3263 = sst [smem:[#allocation30_spill]] %s3242_s10 }
   0x8   :  { %3264 = sst [smem:[#allocation31_spill]] %s3243_s11 }
   0x9   :  { %3265 = sst [smem:[#allocation32_spill]] %s3244_s12 }
   0xa   :  { %17 = vsyncpa [#allocation7], 0 }
   0xb   :  { %19 = vsyncpa [#allocation7 + $0x1], 0 }
   0xc   :  { %20 = vsyncpa [#allocation8], 0 }
   0xd   :  { %22 = vsyncpa [#allocation8 + $0x1], 0  ;;  %s2665_s21 = smov 0   ;;  %s2667_s22 = smov 0  }
   0xe   :  { %s2669_s23 = smov 0   ;;  %s2671_s24 = smov 0  }
   0xf   :  { %s2673_s25 = smov 0   ;;  %s2675_s26 = smov 0  }
  0x10   :  { %s2677_s27 = smov 0   ;;  %s2679_s28 = smov 0  }
  0x11   :  { %s2681_s29 = smov 0   ;;  %s2683_s30 = smov 0  }
  0x12   :  { %s2685_s13 = smov 0   ;;  %s2687_s14 = smov 0  }
  0x13 LB: > { %3266 = sst [smem:[#allocation15_spill]] %s2556_s25  ;;  %s3246_s15 = sadd.s32 4294967295, %s2584_s14   ;;  %s2584_s14 = sphi %s2687_s14, %s28_s14   ;;  %s2580_s13 = sphi %s2685_s13, %s3317_s13   ;;  %s2576_s30 = sphi %s2683_s30, %s3316_s30   ;;  %s2572_s29 = sphi %s2681_s29, %s3306_s29   ;;  %s2568_s28 = sphi %s2679_s28, %s3315_s28   ;;  %s2564_s27 = sphi %s2677_s27, %s3314_s27   ;;  %s2560_s26 = sphi %s2675_s26, %s3313_s26   ;;  %s2556_s25 = sphi %s2673_s25, %s3304_s25   ;;  %s2552_s24 = sphi %s2671_s24, %s3312_s24   ;;  %s2548_s23 = sphi %s2669_s23, %s3311_s23   ;;  %s2544_s22 = sphi %s2667_s22, %s3310_s22   ;;  %s2540_s21 = sphi %s2665_s21, %s3309_s21  }
  0x14   : > { %3267 = sst [smem:[#allocation16_spill]] %s2564_s27  ;;  %s40_s17 = sadd.s32 1, %s2572_s29 }
  0x15   : > { %3268 = sst [smem:[#allocation17_spill]] %s2568_s28  ;;  %s43_s18 = sadd.s32 1, %s2576_s30 }
  0x16   : > { %3269 = sst [smem:[#allocation18_spill]] %s2572_s29  ;;  %p41_p0 = scmp.ge.s32.totalorder %s40_s17, 4 }
  0x17   : > { %s47_s19 = sadd.s32 1, %s2580_s13  ;;  %s56_s20 = sadd.s32 1, %s2556_s25 }
  0x18   : > { %p63_p1 = scmp.ne.s32.totalorder %s2556_s25, %s2552_s24  ;;  %s3319_s17 = smov (%p41_p0, %s40_s17), 0 }
  0x19   : > { %3270 = sst [smem:[#allocation19_spill]] %s3319_s17  ;;  %s3321_s18 = smov (!%p41_p0, %s43_s18), %s2576_s30 }
  0x1a   : > { %p64_p2 = scmp.eq.s32.totalorder %s2584_s14, 0  ;;  %p69_p3 = scmp.ne.s32.totalorder %s2552_s24, %s2548_s23 }
  0x1b   : > { %p45_p4 = scmp.ge.s32.totalorder %s3321_s18, 4  ;;  %p70_p5 = scmp.eq.s32.totalorder %s3246_s15, 0 }
  0x1c   : > { %p2746_p6 = por %p64_p2, %p63_p1  ;;  %p107_p7 = scmp.lt.s32.totalorder %s2572_s29, %s2576_s30 }
  0x1d   : > { %s3323_s18 = smov (%p45_p4, %s3321_s18), 0  ;;  %s3325_s19 = smov (!%p45_p4, %s47_s19), %s2580_s13 }
  0x1e   : > { %3272 = sst [smem:[#allocation20_spill]] %s3323_s18  ;;  %s52_s12 = ssub.s32 %s2576_s30, %s3323_s18 }
  0x1f   : > { %p2760_p8 = por %p70_p5, %p69_p3  ;;  %p49_p9 = scmp.ge.s32.totalorder %s3325_s19, 2 }
  0x20   : > { %p109_p10 = scmp.lt.s32.totalorder %s3319_s17, %s3323_s18  ;;  %s116_s7 = sadd.s32 1, %s2544_s22 }
  0x21   : > { %s3273_s15 = scalar_select %p2760_p8, 1, 0 }
  0x22   : > { %s2768_s28 = scalar_select %p107_p7, %s2572_s29, %s2576_s30 }
  0x23   : > { %s3327_s19 = smov (%p49_p9, %s3325_s19), 0  ;;  %p123_p13 = scmp.ne.s32.totalorder %s2544_s22, %s2540_s21 }
  0x24   : > { %3274 = sst [smem:[#allocation21_spill]] %s3327_s19  ;;  %s51_s9 = ssub.s32 %s2580_s13, %s3327_s19 }
  0x25   : > { %s110_s11 = scalar_select %p109_p10, %s3319_s17, %s3323_s18 }
  0x26   : > { %s53_s6 = sor.u32 %s52_s12, %s51_s9  ;;  %p2788_p0 = por %p123_p13, %p64_p2 }
  0x27   : > { %s112_s10 = ssub.s32 %s2768_s28, %s110_s11  ;;  %p54_p11 = scmp.eq.s32.totalorder %s53_s6, 0 }
  0x28   : > { %s113_s8 = sor.u32 %s112_s10, %s51_s9  ;;  %s3278_s27 = sadd.s32 4294967295, %s2584_s14  }
  0x29   : > { %p114_p12 = scmp.eq.s32.totalorder %s113_s8, 0  ;;  %p355_p4 = scmp.eq.s32.totalorder %s3278_s27, 31 }
  0x2a   : > { %s2781_s5 = scalar_select %p54_p11, %s2556_s25, %s56_s20  }
  0x2b   : > { %s2784_s29 = scalar_select %p114_p12, %s2544_s22, %s116_s7  }
  0x2c   : > { %3275 = sst [smem:[#allocation22_spill]] %s2781_s5  ;;  %s3279_s18 = sadd.s32 4294967294, %s2584_s14  }
  0x2d   : > { %3276 = sst [smem:[#allocation23_spill]] %s2784_s29  ;;  %p361_p5 = scmp.eq.s32.totalorder %s3279_s18, 31 }
  0x2e   : > { %s3277_s4 = scalar_select %p2788_p0, 1, 0 }
  0x2f   : > { %p2799_p7 = por %p355_p4, %p63_p1  ;;  %p2806_p9 = por %p361_p5, %p69_p3 }
  0x30   : > { %p2049_p10 = scmp.ge.s32.totalorder %s2584_s14, 32 }
  0x31   : > { %s3280_s11 = scalar_select %p2799_p7, 1, 0 }
  0x32   : > { %s3281_s6 = scalar_select %p2806_p9, 1, 0 }
  0x33   : > { %401 = sbr.rel (%p2049_p10) target bundleno = 110 (0x6e), region = 48  ;;  %s2812_s7 = sand.u32 (!%p2049_p10), 1, %s2556_s25  }
  0x34   : > { %s2051_s8 = sshll.u32 (!%p2049_p10), %s2580_s13, 2  ;;  %s2050_s9 = sshll.u32 (!%p2049_p10), %s2812_s7, 3 }
  0x35   : > { %s414_s10 = sadd.s32 (!%p2049_p10), %s2576_s30, %s2051_s8  ;;  %s409_s27 = scalar_lea.vmem (!%p2049_p10), [#allocation6], %s2050_s9 }
  0x36   : > { %s2052_s12 = sshll.u32 (!%p2049_p10), %s414_s10, 7  ;;  %s418_s18 = sshll.u32 (!%p2049_p10), %s409_s27, 4  ;;  %s419_s18 = int_to_ptr.vmem [resolvable:$true] %s418_s18 }
  0x37   : > { %s2820_s17 = scalar_lea.hbm (!%p2049_p10), %s3232_s0, %s2052_s12  ;;  %s406_s5 = scalar_lea.sflag (!%p2049_p10), [#allocation7], %s2812_s7 }
  0x38   : > { %s2426_s25 = scalar_lea.hbm (!%p2049_p10), %s2820_s17, 128  ;;  %s2430_s9 = scalar_lea.hbm (!%p2049_p10), %s3232_s0, 1024 }
  0x39   : > { %p2427_p1 = scmp.ne.s32.totalorder (!%p2049_p10), %s2820_s17, %s2426_s25  ;;  %p2431_p11 = scmp.lt.u32.totalorder (!%p2049_p10), %s2820_s17, %s3232_s0 }
  0x3a   : > { %p2432_p12 = scmp.lt.u32.totalorder %s2430_s9, %s2426_s25  ;;  %p2434_p4 = scmp.lt.u32.totalorder %s2426_s25, %s2820_s17 }
  0x3b   : > { %p2428_p2 = pnand %p2427_p1, %p2746_p6 }
  0x3c   : > { %p2433_p13 = por %p2432_p12, %p2431_p11 }
  0x3d   : > { %p2429_p3 = pneg %p2428_p2 }
  0x3e   : > { %p2435_p5 = por %p2434_p4, %p2433_p13 }
  0x40   : > { %p2436_p10 = pnand %p2435_p5, %p2429_p3 }
  0x42   : > { %2439 = shalt.err (!%p2436_p10)
}
  0x43   : > { %s2440_s19 = scalar_lea.vmem %s419_s18, 128  ;;  %s2586_s12 = smov [#allocation6]  }
  0x44   : > { %p2441_p9 = scmp.ne.s32.totalorder %s419_s18, %s2440_s19  ;;  %s2444_s20 = sshll.u32 %s2586_s12, 4  ;;  %s2445_s20 = int_to_ptr.vmem [resolvable:$false] %s2444_s20 }
  0x45   : > { %s2446_s8 = scalar_lea.vmem %s2445_s20, 256  ;;  %p2447_p7 = scmp.lt.s32.totalorder %s419_s18, %s2445_s20 }
  0x46   : > { %p2442_p1 = pnand %p2441_p9, %p2746_p6  ;;  %p2448_p8 = scmp.lt.s32.totalorder %s2446_s8, %s2440_s19 }
  0x48   : > { %p2443_p2 = pneg %p2442_p1  ;;  %p2449_p0 = por %p2448_p8, %p2447_p7 }
  0x4a   : > { %p2450_p11 = pnand %p2449_p0, %p2443_p2 }
  0x4c   : > { %2453 = shalt.err (!%p2450_p11)
}
  0x4d   : > { %2275 = dma.hbm_to_vmem [thread:$0]  (%p2746_p6), %s2820_s17, 128, %s419_s18, %s406_s5  }
  0x4e   : > { %424 = sbr.rel (!%p2746_p6) target bundleno = 88 (0x58), region = 56  ;;  %s2053_s25 = sshll.u32 (%p2746_p6), %s2812_s7, 5 }
  0x4f   : > { %s2054_s29 = sshll.u32 (%p2746_p6), %s2580_s13, 4  ;;  %s428_s20 = scalar_lea.vmem (%p2746_p6), [#allocation9], %s2053_s25 }
  0x50   : > { %s430_s10 = sadd.s32 (%p2746_p6), %s2576_s30, %s2054_s29 }
  0x51   : > { %s2055_s9 = sshll.u32 (%p2746_p6), %s430_s10, 3 }
  0x52   : > { %s432_s19 = scalar_lea.vmem (%p2746_p6), %s3233_s1, %s2055_s9 }
  0x53   : > { %v466_v0 = vld [vmem:[%s432_s19] sm:$0xff] (%p2746_p6) }
  0x54   : > { %v468_v1 = vld [vmem:[%s432_s19 + $0x20] sm:$0xff] (%p2746_p6)  ;;  %467 = vst [vmem:[%s428_s20] sm:$0xff] (%p2746_p6), %v466_v0 }
  0x55   : > { %v470_v2 = vld [vmem:[%s432_s19 + $0x40] sm:$0xff]  ;;  %469 = vst [vmem:[%s428_s20 + $0x8] sm:$0xff] %v468_v1 }
  0x56   : > { %471 = vst [vmem:[%s428_s20 + $0x10] sm:$0xff] %v470_v2  ;;  %v472_v3 = vld [vmem:[%s432_s19 + $0x60] sm:$0xff] }
  0x57   : > { %473 = vst [vmem:[%s428_s20 + $0x18] sm:$0xff] %v472_v3 }
  0x58 PF: > { %p3282_p6 = scmp.ne.s32.totalorder %s3277_s4, 0 }
  0x59   : > { %s481_s5 = sand.u32 (%p3282_p6), 1, %s2544_s22   ;;  %s2057_s16 = sshll.u32 (%p3282_p6), %s2580_s13, 4 }
  0x5a   : > { %479 = sbr.rel (!%p3282_p6) target bundleno = 99 (0x63), region = 94  ;;  %s2056_s17 = sshll.u32 (%p3282_p6), %s481_s5, 5 }
  0x5b   : > { %s487_s7 = sadd.s32 (%p3282_p6), %s2057_s16, %s2768_s28  ;;  %s483_s10 = scalar_lea.vmem (%p3282_p6), [#allocation10], %s2056_s17 }
  0x5c   : > { %s2058_s18 = sshll.u32 (%p3282_p6), %s487_s7, 3 }
  0x5d   : > { %s489_s25 = scalar_lea.vmem (%p3282_p6), %s3234_s2, %s2058_s18 }
  0x5e   : > { %v523_v4 = vld [vmem:[%s489_s25] sm:$0xff] (%p3282_p6) }
  0x5f   : > { %v525_v5 = vld [vmem:[%s489_s25 + $0x20] sm:$0xff] (%p3282_p6)  ;;  %524 = vst [vmem:[%s483_s10] sm:$0xff] (%p3282_p6), %v523_v4 }
  0x60   : > { %v527_v6 = vld [vmem:[%s489_s25 + $0x40] sm:$0xff] (%p3282_p6)  ;;  %526 = vst [vmem:[%s483_s10 + $0x8] sm:$0xff] (%p3282_p6), %v525_v5 }
  0x61   : > { %528 = vst [vmem:[%s483_s10 + $0x10] sm:$0xff] %v527_v6  ;;  %v529_v7 = vld [vmem:[%s489_s25 + $0x60] sm:$0xff] }
  0x62   : > { %530 = vst [vmem:[%s483_s10 + $0x18] sm:$0xff] %v529_v7 }
  0x63 PF: > { %p3283_p8 = scmp.ne.s32.totalorder %s3277_s4, 0 }
  0x64   : > { %s538_s9 = sand.u32 (%p3283_p8), 1, %s2544_s22   ;;  %s2060_s27 = sshll.u32 (%p3283_p8), %s2580_s13, 4 }
  0x65   : > { %536 = sbr.rel (!%p3283_p8) target bundleno = 110 (0x6e), region = 132  ;;  %s2059_s12 = sshll.u32 (%p3283_p8), %s538_s9, 5 }
  0x66   : > { %s544_s19 = sadd.s32 (%p3283_p8), %s2060_s27, %s2768_s28  ;;  %s540_s7 = scalar_lea.vmem (%p3283_p8), [#allocation11], %s2059_s12 }
  0x67   : > { %s2061_s20 = sshll.u32 (%p3283_p8), %s544_s19, 3 }
  0x68   : > { %s546_s17 = scalar_lea.vmem (%p3283_p8), %s3235_s3, %s2061_s20 }
  0x69   : > { %v580_v8 = vld [vmem:[%s546_s17] sm:$0xff] (%p3283_p8) }
  0x6a   : > { %v582_v9 = vld [vmem:[%s546_s17 + $0x20] sm:$0xff] (%p3283_p8)  ;;  %581 = vst [vmem:[%s540_s7] sm:$0xff] (%p3283_p8), %v580_v8 }
  0x6b   : > { %v584_v10 = vld [vmem:[%s546_s17 + $0x40] sm:$0xff] (%p3283_p8)  ;;  %583 = vst [vmem:[%s540_s7 + $0x8] sm:$0xff] (%p3283_p8), %v582_v9 }
  0x6c   : > { %585 = vst [vmem:[%s540_s7 + $0x10] sm:$0xff] %v584_v10  ;;  %v586_v11 = vld [vmem:[%s546_s17 + $0x60] sm:$0xff] }
  0x6d   : > { %587 = vst [vmem:[%s540_s7 + $0x18] sm:$0xff] %v586_v11 }
  0x6e PF: > { %p2062_p0 = scmp.ge.s32.totalorder %s2584_s14, 1  ;;  %p592_p7 = scmp.lt.s32.totalorder %s2584_s14, 33 }
  0x70   : > { %p593_p9 = pnand %p2062_p0, %p592_p7 }
  0x71   : > { %s2867_s4 = sand.u32 (!%p593_p9), 1, %s2552_s24   ;;  %p3284_p3 = scmp.ne.s32.totalorder (!%p593_p9), %s3273_s15, 0 }
  0x72   : > { %596 = sbr.rel (%p593_p9) target bundleno = 2166 (0x876), region = 170  ;;  %s2063_s28 = sshll.u32 (!%p593_p9), %s2867_s4, 3 }
  0x73   : > { %s599_s18 = scalar_lea.sflag (!%p593_p9), [#allocation7], %s2867_s4  ;;  %s2871_s8 = scalar_lea.vmem (!%p593_p9), [#allocation6], %s2063_s28 }
  0x79   : > { %2531 = dma.done.wait (%p3284_p3), %s599_s18, 128  }
  0x7a   : > { %2533 = vsyncadd (%p3284_p3), %s599_s18, 4294967168  ;;  %s2064_s29 = sshll.u32 %s2867_s4, 5  ;;  %s615_s25 = sand.u32 1, %s2540_s21  }
  0x7b   : > { %s2065_s10 = sshll.u32 %s615_s25, 5  ;;  %s2879_s9 = scalar_lea.vmem [#allocation9], %s2064_s29 }
  0x7c   : > { %s2881_s27 = scalar_lea.vmem [#allocation10], %s2065_s10  ;;  %s2883_s12 = scalar_lea.vmem [#allocation11], %s2065_s10 }
  0x7d   : > { %s2885_s19 = scalar_lea.vmem [#allocation12], %s2063_s28  ;;  %p2068_p12 = scmp.ne.s32.totalorder %s2560_s26, 0 }
  0x7e   : > { %vm684_vm0 = vcmask (!%p2068_p12), 7168   ;;  %vm693_vm1 = vcmask (!%p2068_p12), 130048   ;;  %v2587_v12 = vmov (!%p2068_p12), -inf   ;;  %v2588_v13 = vmov (!%p2068_p12), 0.0  }
  0x7f   : > { %683 = sbr.rel (%p2068_p12) target bundleno = 134 (0x86), region = 190  ;;  %685 = vst.msk [vmem:[#allocation2] sm:$0xff] (!%p2068_p12), %vm684_vm0, %v2587_v12  ;;  %686 = vst.msk [vmem:[#allocation2 + $0x8] sm:$0xff] (!%p2068_p12), %vm684_vm0, %v2587_v12 }
  0x80   : > { %687 = vst.msk [vmem:[#allocation2 + $0x10] sm:$0xff] (!%p2068_p12), %vm684_vm0, %v2587_v12  ;;  %688 = vst.msk [vmem:[#allocation2 + $0x18] sm:$0xff] (!%p2068_p12), %vm684_vm0, %v2587_v12 }
  0x81   : > { %689 = vst.msk [vmem:[#allocation3] sm:$0xff] (!%p2068_p12), %vm684_vm0, %v2588_v13  ;;  %690 = vst.msk [vmem:[#allocation3 + $0x8] sm:$0xff] (!%p2068_p12), %vm684_vm0, %v2588_v13 }
  0x82   : > { %691 = vst.msk [vmem:[#allocation3 + $0x10] sm:$0xff] (!%p2068_p12), %vm684_vm0, %v2588_v13  ;;  %692 = vst.msk [vmem:[#allocation3 + $0x18] sm:$0xff] (!%p2068_p12), %vm684_vm0, %v2588_v13 }
  0x83   : > { %694 = vst.msk [vmem:[#allocation4] sm:$0xff] (!%p2068_p12), %vm693_vm1, %v2588_v13  ;;  %695 = vst.msk [vmem:[#allocation4 + $0x8] sm:$0xff] (!%p2068_p12), %vm693_vm1, %v2588_v13 }
  0x84   : > { %696 = vst.msk [vmem:[#allocation4 + $0x10] sm:$0xff] (!%p2068_p12), %vm693_vm1, %v2588_v13  ;;  %697 = vst.msk [vmem:[#allocation4 + $0x18] sm:$0xff] (!%p2068_p12), %vm693_vm1, %v2588_v13 }
  0x86 PF: > { %s3285_s21 = sld [smem:[#allocation16_spill]] }
  0x8c   : > { %p2069_p13 = scmp.gt.s32.totalorder %s2560_s26, %s3285_s21 }
  0x8d   : > { %v706_v14 = vld [vmem:[%s2881_s27] sm:$0xff] (!%p2069_p13)  ;;  %vm714_vm2 = vcmask (!%p2069_p13), 130048   ;;  %v707_v15 = vld [vmem:[%s2881_s27 + $0x8] sm:$0xff] (!%p2069_p13)  ;;  %v2589_v16 = vmov (!%p2069_p13), 0.0   ;;  %vm2590_vm3 = vmmov (!%p2069_p13), 0   ;;  %v708_v19 = vld [vmem:[%s2881_s27 + $0x10] sm:$0xff] (!%p2069_p13)  ;;  %v1024_v23 = vlaneseq (!%p2069_p13) }
  0x8e   : > { %701 = sbr.rel (%p2069_p13) target bundleno = 876 (0x36c), region = 194  ;;  %2156 = vmatprep.subr.mxu0 (!%p2069_p13), %v2589_v16  ;;  %2158 = vmatprep.mubr.msk.f32.mxu0 (!%p2069_p13), %vm2590_vm3, %v2589_v16  ;;  %v702_v17 = vld [vmem:[%s2879_s9] sm:$0xff] (!%p2069_p13)  ;;  %v703_v18 = vld [vmem:[%s2879_s9 + $0x8] sm:$0xff] (!%p2069_p13)  ;;  %v709_v20 = vld [vmem:[%s2881_s27 + $0x18] sm:$0xff] (!%p2069_p13)  ;;  %s3286_s15 = sld [smem:[#allocation16_spill]] (!%p2069_p13)  ;;  %vm1044_vm5 = vcmask (!%p2069_p13), 64512  }
  0x8f   : > { %2157 = vmatpush3.xpose.msk.msra.mxu0 (!%p2069_p13), %vm714_vm2, %v706_v14  ;;  %2161 = vmatprep.subr.mxu1 (!%p2069_p13), %v2589_v16  ;;  %v704_v21 = vld [vmem:[%s2879_s9 + $0x10] sm:$0xff] (!%p2069_p13)  ;;  %v705_v22 = vld [vmem:[%s2879_s9 + $0x18] sm:$0xff] (!%p2069_p13)  ;;  %s2079_s5 = sshll.u32 (!%p2069_p13), %s2560_s26, 3  ;;  %v1025_v24 = vshrl.u32 (!%p2069_p13), %v1024_v23, 7  ;;  %v1030_v25 = vand.u32 (!%p2069_p13), 127, %v1024_v23  ;;  %v2591_v50 = vmov (!%p2069_p13), 0  }
  0x90   : > { %2162 = vmatpush3.xpose.msk.msra.mxu1 (!%p2069_p13), %vm714_vm2, %v707_v15  ;;  %2163 = vmatprep.mubr.msk.f32.mxu1 (!%p2069_p13), %vm2590_vm3, %v2589_v16  ;;  %v1031_v27 = vstv (!%p2069_p13), %s2079_s5  ;;  %v1040_v51 = vld [vmem:[#allocation2] sm:$0xff] (!%p2069_p13)  ;;  %vm1129_vm6 = vcmask (!%p2069_p13), 7168   ;;  %v2934_v54 = vld [vmem:[#allocation2 + $0x8] sm:$0xff] (!%p2069_p13)  ;;  %v1042_v55 = vld [vmem:[#allocation2 + $0x10] sm:$0xff] (!%p2069_p13) }
  0x91   : > { %2166 = vmatprep.subr.mxu0 (!%p2069_p13), %v2589_v16  ;;  %2171 = vmatprep.subr.mxu1 (!%p2069_p13), %v2589_v16  ;;  %v1032_v29 = vadd.s32 (!%p2069_p13), %v1031_v27, %v1030_v25  ;;  %v2938_v62 = vld [vmem:[#allocation2 + $0x18] sm:$0xff] (!%p2069_p13)  ;;  %v711_v6 = vld [vmem:[%s2883_s12 + $0x8] sm:$0xff] (!%p2069_p13)  ;;  %v713_v23 = vld [vmem:[%s2883_s12 + $0x18] sm:$0xff] (!%p2069_p13) }
  0x92   : > { %2159 = vmatmul.mubr.msk.f32.vlgmr.msra.gmra.mrb[0].mxu0 (!%p2069_p13), %vm714_vm2, %v702_v17  ;;  %2392 = vset.pattern.permute.xlu0 (!%p2069_p13), %v2591_v50  ;;  %v710_v4 = vld [vmem:[%s2883_s12] sm:$0xff] (!%p2069_p13) }
  0x93   : > { %2164 = vmatmul.mubr.msk.f32.vlgmr.msra.gmra.mrb[0].mxu1 (!%p2069_p13), %vm714_vm2, %v703_v18  ;;  %2167 = vmatpush3.xpose.msk.msra.mxu0 (!%p2069_p13), %vm714_vm2, %v708_v19  ;;  %v712_v19 = vld [vmem:[%s2883_s12 + $0x10] sm:$0xff] (!%p2069_p13) }
  0x94   : > { %2168 = vmatprep.mubr.msk.f32.mxu0 (!%p2069_p13), %vm2590_vm3, %v2589_v16  ;;  %2172 = vmatpush3.xpose.msk.msra.mxu1 (!%p2069_p13), %vm714_vm2, %v709_v20  ;;  %s2078_s20 = sshll.u32 (!%p2069_p13), %s3286_s15, 3 }
  0x95   : > { %2173 = vmatprep.mubr.msk.f32.mxu1 %vm2590_vm3, %v2589_v16  ;;  %2176 = vmatprep.subr.mxu0 %v2589_v16  ;;  %v1026_v26 = vstv %s2078_s20 }
  0x96   : > { %2169 = vmatmul.mubr.msk.f32.vlgmr.msra.gmra.mrb[2].mxu0 %vm714_vm2, %v704_v21  ;;  %2181 = vmatprep.subr.mxu1 %v2589_v16  ;;  %v1027_v28 = vadd.s32 %v1026_v26, %v1025_v24 }
  0x97   : > { %2174 = vmatmul.mubr.msk.f32.vlgmr.msra.gmra.mrb[2].mxu1 %vm714_vm2, %v705_v22  ;;  %2178 = vmatprep.mubr.msk.f32.mxu0 %vm2590_vm3, %v2589_v16 }
  0x98   : > { %2183 = vmatprep.mubr.msk.f32.mxu1 %vm2590_vm3, %v2589_v16  ;;  %vm1033_vm4 = vcmp.le.s32.totalorder %v1032_v29, %v1027_v28  ;;  %2393 = vset.pattern.permute.xlu1 %v2591_v50 }
  0x99   : > { %2177 = vmatpush3.msra.mxu0 %v710_v4  ;;  %2182 = vmatpush3.msra.mxu1 %v711_v6 }
  0x9a   : > { %2186 = vmatprep.subr.mxu0 %v2589_v16  ;;  %2191 = vmatprep.subr.mxu1 %v2589_v16 }
 0x165   : > { %v787_v30 = vpop.f32.mrb[0].mxu0 }
 0x166   : > { %v1019_v31 = vmul.f32 0.25, %v787_v30  ;;  %v2160_v32 = vpop.f32.mrb[1].mxu0  ;;  %v863_v33 = vpop.f32.mrb[0].mxu1 }
 0x167   : > { %v1020_v34 = vmul.f32 0.25, %v863_v33  ;;  %v2165_v35 = vpop.f32.mrb[1].mxu1 }
 0x168   : > { %v1036_v36 = vsel %vm1033_vm4, %v1019_v31, -inf }
 0x169   : > { %v1045_v37 = vsel %vm1044_vm5, %v1036_v36, -inf  ;;  %v939_v38 = vpop.f32.mrb[2].mxu0  ;;  %v1037_v39 = vsel %vm1033_vm4, %v1020_v34, -inf }
 0x16a   : > { %1046 = vmax.xlane.f32.xlu0 %v1045_v37  ;;  %v1021_v40 = vmul.f32 0.25, %v939_v38  ;;  %v2170_v41 = vpop.f32.mrb[3].mxu0  ;;  %v1015_v42 = vpop.f32.mrb[2].mxu1  ;;  %v1048_v43 = vsel %vm1044_vm5, %v1037_v39, -inf }
 0x16b   : > { %v1022_v44 = vmul.f32 0.25, %v1015_v42  ;;  %v2175_v45 = vpop.f32.mrb[3].mxu1 }
 0x16c   : > { %v1038_v46 = vsel %vm1033_vm4, %v1021_v40, -inf  ;;  %v1107_v45 = vld [vmem:[#allocation3 + $0x10] sm:$0xff] }
 0x16d   : > { %v1051_v47 = vsel %vm1044_vm5, %v1038_v46, -inf  ;;  %v1039_v48 = vsel %vm1033_vm4, %v1022_v44, -inf }
 0x16e   : > { %1049 = vmax.xlane.f32.xlu0 %v1048_v43  ;;  %1052 = vmax.xlane.f32.xlu1 %v1051_v47  ;;  %v1054_v49 = vsel %vm1044_vm5, %v1039_v48, -inf }
 0x172   : > { %1055 = vmax.xlane.f32.xlu1 %v1054_v49 }
 0x1f7   : > { %v1047_v52 = vpop.xlane.xlu0 %1046 }
 0x1f8   : > { %v1057_v53 = vmax.f32 %v1040_v51, %v1047_v52 }
 0x1fa   : > { %v1061_v56 = vsub.f32 %v1040_v51, %v1057_v53  ;;  %1462 = vst.msk [vmem:[#allocation2] sm:$0xff] %vm1129_vm6, %v1057_v53  ;;  %1075 = vperm.xlu0 %2392, %v1057_v53   ;;  %v1134_v53 = vld [vmem:[#allocation4] sm:$0xff] }
 0x1fb   : > { %v1050_v57 = vpop.xlane.xlu0 %1049  ;;  %v1053_v58 = vpop.xlane.xlu1 %1052 }
 0x1fc   : > { %v1065_v59 = vmul.f32 1.442695, %v1061_v56  ;;  %v1058_v60 = vmax.f32 %v2934_v54, %v1050_v57  ;;  %v1059_v61 = vmax.f32 %v1042_v55, %v1053_v58 }
 0x1fe   : > { %2394 = vpow2.f32 %v1065_v59  ;;  %v1062_v63 = vsub.f32 %v2934_v54, %v1058_v60  ;;  %1463 = vst.msk [vmem:[#allocation2 + $0x8] sm:$0xff] %vm1129_vm6, %v1058_v60  ;;  %1080 = vperm.xlu1 %2393, %v1058_v60   ;;  %v1063_v0 = vsub.f32 %v1042_v55, %v1059_v61  ;;  %1464 = vst.msk [vmem:[#allocation2 + $0x10] sm:$0xff] %vm1129_vm6, %v1059_v61  ;;  %v1135_v55 = vld [vmem:[#allocation4 + $0x8] sm:$0xff] }
 0x1ff   : > { %v1056_v1 = vpop.xlane.xlu1 %1055 }
 0x200   : > { %v1060_v2 = vmax.f32 %v2938_v62, %v1056_v1  ;;  %v1069_v25 = vmul.f32 1.442695, %v1063_v0  ;;  %v1067_v29 = vmul.f32 1.442695, %v1062_v63 }
 0x202   : > { %1085 = vperm.xlu1 %2393, %v1059_v61   ;;  %v1064_v3 = vsub.f32 %v2938_v62, %v1060_v2  ;;  %1465 = vst.msk [vmem:[#allocation2 + $0x18] sm:$0xff] %vm1129_vm6, %v1060_v2  ;;  %v1136_v61 = vld [vmem:[#allocation4 + $0x10] sm:$0xff] }
 0x206   : > { %1090 = vperm.xlu1 %2393, %v1060_v2   ;;  %v1137_v2 = vld [vmem:[#allocation4 + $0x18] sm:$0xff] }
 0x208   : > { %v2395_v5 = vpop.eup %2394 }
 0x20a   : > { %1140 = vperm.xlu1 %2393, %v2395_v5  }
 0x279   : > { %v1076_v7 = vpop.permute.xlu0 %1075 }
 0x27a   : > { %v1093_v8 = vsub.f32 %v1036_v36, %v1076_v7  ;;  %v1105_v36 = vld [vmem:[#allocation3] sm:$0xff] }
 0x27b   : > { %v1109_v37 = vmul.f32 %v2395_v5, %v1105_v36 }
 0x27c   : > { %v1097_v9 = vmul.f32 1.442695, %v1093_v8 }
 0x27d   : > { %v1081_v10 = vpop.permute.xlu1 %1080 }
 0x27e   : > { %2396 = vpow2.f32 %v1097_v9  ;;  %v1094_v11 = vsub.f32 %v1037_v39, %v1081_v10  ;;  %v1106_v39 = vld [vmem:[#allocation3 + $0x8] sm:$0xff] }
 0x280   : > { %v1099_v12 = vmul.f32 1.442695, %v1094_v11 }
 0x281   : > { %v1086_v13 = vpop.permute.xlu1 %1085 }
 0x282   : > { %2398 = vpow2.f32 %v1099_v12  ;;  %v1095_v14 = vsub.f32 %v1038_v46, %v1086_v13 }
 0x284   : > { %v1101_v15 = vmul.f32 1.442695, %v1095_v14 }
 0x285   : > { %v1091_v17 = vpop.permute.xlu1 %1090 }
 0x286   : > { %2400 = vpow2.f32 %v1101_v15  ;;  %v1096_v18 = vsub.f32 %v1039_v48, %v1091_v17  ;;  %v1108_v48 = vld [vmem:[#allocation3 + $0x18] sm:$0xff] }
 0x288   : > { %v2397_v20 = vpop.eup %2396  ;;  %v1103_v21 = vmul.f32 1.442695, %v1096_v18 }
 0x289   : > { %2179 = vmatmul.mubr.msk.f32.vlgmr.msra.gmra.mrb[4].mxu0 %vm1044_vm5, %v2397_v20  ;;  %v1113_v22 = vsel %vm1044_vm5, %v2397_v20, 0.0  ;;  %v1141_v35 = vpop.permute.xlu1 %1140 }
 0x28a   : > { %2402 = vpow2.f32 %v1103_v21  ;;  %1114 = vadd.xlane.f32.xlu1 %v1113_v22  ;;  %2187 = vmatpush3.msra.mxu0 %v712_v19  ;;  %v1158_v54 = vmul.f32 %v1141_v35, %v1134_v53 }
 0x28b   : > { %2188 = vmatprep.mubr.msk.f32.mxu0 %vm2590_vm3, %v2589_v16  ;;  %2404 = vpow2.f32 %v1069_v25 }
 0x28c   : > { %v2399_v24 = vpop.eup %2398  ;;  %2406 = vpow2.f32 %v1067_v29 }
 0x28d   : > { %2184 = vmatmul.mubr.msk.f32.vlgmr.msra.gmra.mrb[4].mxu1 %vm1044_vm5, %v2399_v24  ;;  %v1116_v26 = vsel %vm1044_vm5, %v2399_v24, 0.0 }
 0x28e   : > { %1117 = vadd.xlane.f32.xlu0 %v1116_v26  ;;  %2192 = vmatpush3.msra.mxu1 %v713_v23 }
 0x28f   : > { %2193 = vmatprep.mubr.msk.f32.mxu1 %vm2590_vm3, %v2589_v16  ;;  %v1071_v16 = vmul.f32 1.442695, %v1064_v3 }
 0x290   : > { %v2401_v27 = vpop.eup %2400 }
 0x291   : > { %2189 = vmatmul.mubr.msk.f32.vlgmr.msra.gmra.mrb[6].mxu0 %vm1044_vm5, %v2401_v27  ;;  %v1119_v32 = vsel %vm1044_vm5, %v2401_v27, 0.0  ;;  %2408 = vpow2.f32 %v1071_v16 }
 0x294   : > { %v2403_v28 = vpop.eup %2402 }
 0x295   : > { %2194 = vmatmul.mubr.msk.f32.vlgmr.msra.gmra.mrb[6].mxu1 %vm1044_vm5, %v2403_v28  ;;  %v2405_v30 = vpop.eup %2404  ;;  %v1122_v33 = vsel %vm1044_vm5, %v2403_v28, 0.0 }
 0x296   : > { %v2407_v31 = vpop.eup %2406  ;;  %v1111_v46 = vmul.f32 %v2405_v30, %v1107_v45 }
 0x297   : > { %v1110_v41 = vmul.f32 %v2407_v31, %v1106_v39 }
 0x29b   : > { %1150 = vperm.xlu1 %2393, %v2405_v30   ;;  %v2409_v34 = vpop.eup %2408 }
 0x29c   : > { %v1112_v50 = vmul.f32 %v2409_v34, %v1108_v48 }
 0x2a4   : > { %1145 = vperm.xlu0 %2392, %v2407_v31  }
 0x2bf   : > { %1120 = vadd.xlane.f32.xlu1 %v1119_v32 }
 0x2c3   : > { %1123 = vadd.xlane.f32.xlu1 %v1122_v33 }
 0x2d4   : > { %1155 = vperm.xlu1 %2393, %v2409_v34  }
 0x317   : > { %v1115_v38 = vpop.xlane.xlu1 %1114 }
 0x318   : > { %v1125_v40 = vadd.f32 %v1115_v38, %v1109_v37 }
 0x31a   : > { %1130 = vst.msk [vmem:[#allocation3] sm:$0xff] %vm1129_vm6, %v1125_v40 }
 0x31b   : > { %v1118_v42 = vpop.xlane.xlu0 %1117  ;;  %v1151_v44 = vpop.permute.xlu1 %1150 }
 0x31c   : > { %v1126_v43 = vadd.f32 %v1118_v42, %v1110_v41  ;;  %v1160_v1 = vmul.f32 %v1151_v44, %v1136_v61 }
 0x31e   : > { %1131 = vst.msk [vmem:[#allocation3 + $0x8] sm:$0xff] %vm1129_vm6, %v1126_v43 }
 0x323   : > { %v1146_v56 = vpop.permute.xlu0 %1145 }
 0x324   : > { %v1159_v60 = vmul.f32 %v1146_v56, %v1135_v55 }
 0x34c   : > { %v1121_v47 = vpop.xlane.xlu1 %1120 }
 0x34d   : > { %v1127_v49 = vadd.f32 %v1121_v47, %v1111_v46 }
 0x34f   : > { %1132 = vst.msk [vmem:[#allocation3 + $0x10] sm:$0xff] %vm1129_vm6, %v1127_v49 }
 0x350   : > { %v1124_v51 = vpop.xlane.xlu1 %1123 }
 0x351   : > { %v1128_v52 = vadd.f32 %v1124_v51, %v1112_v50 }
 0x353   : > { %1133 = vst.msk [vmem:[#allocation3 + $0x18] sm:$0xff] %vm1129_vm6, %v1128_v52 }
 0x354   : > { %v1156_v3 = vpop.permute.xlu1 %1155 }
 0x355   : > { %v1161_v7 = vmul.f32 %v1156_v3, %v1137_v2 }
 0x35c   : > { %v1231_v57 = vpop.f32.mrb[4].mxu0 }
 0x35d   : > { %v1454_v58 = vadd.f32 %v1231_v57, %v1158_v54  ;;  %v2180_v59 = vpop.f32.mrb[5].mxu0 }
 0x35f   : > { %1458 = vst.msk [vmem:[#allocation4] sm:$0xff] %vm714_vm2, %v1454_v58 }
 0x360   : > { %v1304_v62 = vpop.f32.mrb[4].mxu1 }
 0x361   : > { %v1455_v63 = vadd.f32 %v1304_v62, %v1159_v60  ;;  %v2185_v0 = vpop.f32.mrb[5].mxu1 }
 0x363   : > { %1459 = vst.msk [vmem:[#allocation4 + $0x8] sm:$0xff] %vm714_vm2, %v1455_v63 }
 0x364   : > { %v1377_v4 = vpop.f32.mrb[6].mxu0 }
 0x365   : > { %v1456_v5 = vadd.f32 %v1377_v4, %v1160_v1  ;;  %v2190_v6 = vpop.f32.mrb[7].mxu0 }
 0x367   : > { %1460 = vst.msk [vmem:[#allocation4 + $0x10] sm:$0xff] %vm714_vm2, %v1456_v5 }
 0x368   : > { %v1450_v8 = vpop.f32.mrb[6].mxu1 }
 0x369   : > { %v1457_v9 = vadd.f32 %v1450_v8, %v1161_v7  ;;  %v2195_v10 = vpop.f32.mrb[7].mxu1 }
 0x36b   : > { %1461 = vst.msk [vmem:[#allocation4 + $0x18] sm:$0xff] %vm714_vm2, %v1457_v9 }
 0x36c PF: > { %p2084_p4 = scmp.ne.s32.totalorder %s2560_s26, 3 }
 0x36d   : > { %v1471_v11 = vld [vmem:[#allocation3 + $0x8] sm:$0xff] (!%p2084_p4)  ;;  %v1473_v12 = vld [vmem:[#allocation3 + $0x18] sm:$0xff] (!%p2084_p4)  ;;  %v1472_v13 = vld [vmem:[#allocation3 + $0x10] sm:$0xff] (!%p2084_p4)  ;;  %v2592_v14 = vmov (!%p2084_p4), 0   ;;  %s3287_s17 = sld [smem:[#allocation24_spill]] (!%p2084_p4)  ;;  %v2593_v23 = vmov (!%p2084_p4), 0.0|0.0  }
 0x36e   : > { %1469 = sbr.rel (%p2084_p4) target bundleno = 2137 (0x859), region = 198  ;;  %2410 = vset.pattern.permute.xlu0 (!%p2084_p4), %v2592_v14  ;;  %2411 = vset.pattern.permute.xlu1 (!%p2084_p4), %v2592_v14  ;;  %2412 = vrcp.f32 (!%p2084_p4), %v1471_v11  ;;  %v1470_v15 = vld [vmem:[#allocation3] sm:$0xff] (!%p2084_p4)  ;;  %vm2594_vm7 = vmmov (!%p2084_p4), 0   ;;  %v2595_v16 = vmov (!%p2084_p4), 0.0   ;;  %v1479_v34 = vld [vmem:[#allocation4 + $0x8] sm:$0xff] (!%p2084_p4)  ;;  %v1480_v39 = vld [vmem:[#allocation4 + $0x10] sm:$0xff] (!%p2084_p4) }
 0x36f   : > { %2414 = vrcp.f32 (!%p2084_p4), %v1473_v12  ;;  %2215 = vmatprep.subr.bf16.mxu1 (!%p2084_p4), %v2593_v23  ;;  %2212 = vmatprep.mubr.msk.f32.mxu1 (!%p2084_p4), %vm2594_vm7, %v2595_v16  ;;  %s2596_s16 = smov (!%p2084_p4), 16   ;;  %v1478_v41 = vld [vmem:[#allocation4] sm:$0xff] (!%p2084_p4)  ;;  %vm1506_vm8 = vcmask (!%p2084_p4), 130048   ;;  %s2597_s7 = smov (!%p2084_p4), 32   ;;  %vm1512_vm9 = vcmask (!%p2084_p4), 261248   ;;  %vm1518_vm10 = vcmask (!%p2084_p4), 392448  }
 0x370   : > { %2416 = vrcp.f32 (!%p2084_p4), %v1472_v13  ;;  %s2598_s28 = smov (!%p2084_p4), 48   ;;  %vm1524_vm11 = vcmask (!%p2084_p4), 523648   ;;  %vm1542_vm12 = vcmask (!%p2084_p4), 523264   ;;  %s3288_s25 = sld [smem:[#allocation25_spill]] (!%p2084_p4)  ;;  %v1616_v52 = vld [vmem:[%s2871_s8] sm:$0xff] (!%p2084_p4) }
 0x371   : > { %2418 = vrcp.f32 (!%p2084_p4), %v1470_v15  ;;  %s3289_s27 = sld [smem:[#allocation28_spill]] (!%p2084_p4)  ;;  %s3291_s8 = sld [smem:[#allocation30_spill]] (!%p2084_p4) }
 0x372   : > { %v1481_v36 = vld [vmem:[#allocation4 + $0x18] sm:$0xff] (!%p2084_p4)  ;;  %s3294_s20 = sld [smem:[#allocation29_spill]] (!%p2084_p4) }
 0x373   : > { %v1526_v21 = vld [vmem:[%s3287_s17] sm:$0xff] (!%p2084_p4)  ;;  %v1527_v22 = vld [vmem:[%s3287_s17 + $0x8] sm:$0xff] (!%p2084_p4)  ;;  %v1528_v25 = vld [vmem:[%s3287_s17 + $0x10] sm:$0xff] (!%p2084_p4) }
 0x374   : > { %v2216_v24 = vpack.c.bf16 (!%p2084_p4), %v1527_v22, %v1526_v21  ;;  %v1529_v26 = vld [vmem:[%s3287_s17 + $0x18] sm:$0xff] (!%p2084_p4)  ;;  %v1530_v28 = vld [vmem:[%s3287_s17 + $0x20] sm:$0xff] (!%p2084_p4)  ;;  %v1531_v29 = vld [vmem:[%s3287_s17 + $0x28] sm:$0xff] (!%p2084_p4) }
 0x375   : > { %v2219_v27 = vpack.c.bf16 %v1529_v26, %v1528_v25  ;;  %v2222_v30 = vpack.c.bf16 %v1531_v29, %v1530_v28  ;;  %v1532_v31 = vld [vmem:[%s3287_s17 + $0x30] sm:$0xff]  ;;  %v1533_v32 = vld [vmem:[%s3287_s17 + $0x38] sm:$0xff] }
 0x376   : > { %2217 = vmatpush3.bf16.msra.mxu1 %v2216_v24  ;;  %v2225_v33 = vpack.c.bf16 %v1533_v32, %v1532_v31  ;;  %v2085_v50 = vld [vmem:[%s3288_s25] ss:$0 sm:$0xff]  ;;  %s3292_s25 = sld [smem:[#allocation26_spill]] }
 0x377   : > { %2218 = vmatprep.subr.bf16.mxu1 %v2593_v23  ;;  %s3290_s12 = smov %s3289_s27  ;;  %v1649_v62 = vld [vmem:[%s3289_s27 + $0x8] sm:$0xff]  ;;  %v1768_v25 = vld [vmem:[%s3291_s8] sm:$0xff]  ;;  %s3293_s27 = sld [smem:[#allocation27_spill]] }
 0x378   : > { %v2413_v17 = vpop.eup %2412  ;;  %v1651_v63 = vld [vmem:[%s3290_s12 + $0x18] sm:$0xff]  ;;  %v1648_v1 = vld [vmem:[%s3290_s12] sm:$0xff]  ;;  %v1650_v2 = vld [vmem:[%s3290_s12 + $0x10] sm:$0xff] }
 0x379   : > { %v2415_v18 = vpop.eup %2414  ;;  %1489 = vperm.xlu0 %2410, %v2413_v17   ;;  %v2227_v0 = vpack.c.bf16 %v1651_v63, %v1649_v62  ;;  %v2229_v3 = vpack.c.bf16 %v1650_v2, %v1648_v1  ;;  %v1653_v4 = vld [vmem:[%s3290_s12 + $0x28] sm:$0xff]  ;;  %v1655_v5 = vld [vmem:[%s3290_s12 + $0x38] sm:$0xff]  ;;  %v1652_v7 = vld [vmem:[%s3290_s12 + $0x20] sm:$0xff] }
 0x37a   : > { %v2417_v19 = vpop.eup %2416  ;;  %1499 = vperm.xlu1 %2411, %v2415_v18   ;;  %2220 = vmatpush3.bf16.msra.mxu1 %v2219_v27  ;;  %v2231_v6 = vpack.c.bf16 %v1655_v5, %v1653_v4  ;;  %v1654_v8 = vld [vmem:[%s3290_s12 + $0x30] sm:$0xff]  ;;  %v1657_v10 = vld [vmem:[%s3290_s12 + $0x48] sm:$0xff]  ;;  %v1659_v11 = vld [vmem:[%s3290_s12 + $0x58] sm:$0xff] }
 0x37b   : > { %v2419_v20 = vpop.eup %2418  ;;  %2221 = vmatprep.subr.bf16.mxu1 %v2593_v23  ;;  %v2233_v9 = vpack.c.bf16 %v1654_v8, %v1652_v7  ;;  %v2235_v12 = vpack.c.bf16 %v1659_v11, %v1657_v10  ;;  %v1656_v13 = vld [vmem:[%s3290_s12 + $0x40] sm:$0xff]  ;;  %v1658_v14 = vld [vmem:[%s3290_s12 + $0x50] sm:$0xff]  ;;  %v1661_v17 = vld [vmem:[%s3290_s12 + $0x68] sm:$0xff] }
 0x37c   : > { %v2237_v15 = vpack.c.bf16 %v1658_v14, %v1656_v13  ;;  %v1663_v18 = vld [vmem:[%s3290_s12 + $0x78] sm:$0xff]  ;;  %v1662_v21 = vld [vmem:[%s3290_s12 + $0x70] sm:$0xff]  ;;  %v1785_v24 = vld [vmem:[%s3291_s8 + $0x88] sm:$0xff] }
 0x37d   : > { %1494 = vperm.xlu0 %2410, %v2417_v19   ;;  %v2239_v19 = vpack.c.bf16 %v1663_v18, %v1661_v17  ;;  %v1769_v27 = vld [vmem:[%s3291_s8 + $0x8] sm:$0xff]  ;;  %v1779_v1 = vld [vmem:[%s3291_s8 + $0x58] sm:$0xff]  ;;  %v1796_v2 = vld [vmem:[%s3291_s8 + $0xe0] sm:$0xff] }
 0x37e   : > { %1484 = vperm.xlu1 %2411, %v2419_v20   ;;  %2223 = vmatpush3.bf16.msra.mxu1 %v2222_v30  ;;  %v1660_v20 = vld [vmem:[%s3290_s12 + $0x60] sm:$0xff]  ;;  %v2245_v28 = vpack.c.bf16 %v1769_v27, %v1768_v25  ;;  %v1781_v7 = vld [vmem:[%s3291_s8 + $0x68] sm:$0xff]  ;;  %v1798_v8 = vld [vmem:[%s3291_s8 + $0xf0] sm:$0xff] }
 0x37f   : > { %2224 = vmatprep.subr.bf16.mxu1 %v2593_v23  ;;  %v2241_v22 = vpack.c.bf16 %v1662_v21, %v1660_v20  ;;  %v1784_v23 = vld [vmem:[%s3291_s8 + $0x80] sm:$0xff]  ;;  %v1783_v13 = vld [vmem:[%s3291_s8 + $0x78] sm:$0xff] }
 0x380   : > { %v2243_v26 = vpack.c.bf16 %v1785_v24, %v1784_v23 }
 0x382   : > { %2226 = vmatpush3.bf16.msra.mxu1 %v2225_v33  ;;  %2244 = vmatprep.subr.bf16.mxu0 %v2243_v26  ;;  %v2087_v33 = vld [vmem:[%s3292_s25] ss:$0 sm:$0xff] }
 0x383   : > { %2228 = vmatprep.subr.bf16.mxu1 %v2227_v0  ;;  %2246 = vmatpush3.bf16.msra.mxu0 %v2245_v28  ;;  %v1778_v0 = vld [vmem:[%s3291_s8 + $0x50] sm:$0xff] }
 0x384   : > { %v2265_v4 = vpack.c.bf16 %v1779_v1, %v1778_v0 }
 0x3f8   : > { %v1490_v35 = vpop.permute.xlu0 %1489 }
 0x3f9   : > { %v1503_v37 = vmul.f32 %v1490_v35, %v1479_v34  ;;  %v1500_v38 = vpop.permute.xlu1 %1499  ;;  %v2088_v34 = vld [vmem:[%s3293_s27] ss:$0 sm:$0xff] }
 0x3fa   : > { %v1505_v40 = vmul.f32 %v1500_v38, %v1481_v36  ;;  %v1787_v38 = vld [vmem:[%s3291_s8 + $0x98] sm:$0xff] }
 0x3fb   : > { %1509 = vrot.lane.b32.xlu0 %v1503_v37, %s2596_s16  ;;  %v1786_v37 = vld [vmem:[%s3291_s8 + $0x90] sm:$0xff]  ;;  %s3295_s16 = sld [smem:[#allocation31_spill]] }
 0x3fc   : > { %v1495_v42 = vpop.permute.xlu0 %1494 }
 0x3fd   : > { %v1504_v43 = vmul.f32 %v1495_v42, %v1480_v39  ;;  %v1485_v44 = vpop.permute.xlu1 %1484  ;;  %v2247_v39 = vpack.c.bf16 %v1787_v38, %v1786_v37 }
 0x3fe   : > { %v1502_v45 = vmul.f32 %v1485_v44, %v1478_v41  ;;  %v1771_v41 = vld [vmem:[%s3291_s8 + $0x18] sm:$0xff]  ;;  %v1789_v44 = vld [vmem:[%s3291_s8 + $0xa8] sm:$0xff] }
 0x3ff   : > { %1515 = vrot.lane.b32.xlu1 %v1504_v43, %s2597_s7  ;;  %1521 = vrot.lane.b32.xlu0 %v1505_v40, %s2598_s28  ;;  %v1770_v40 = vld [vmem:[%s3291_s8 + $0x10] sm:$0xff]  ;;  %v1788_v43 = vld [vmem:[%s3291_s8 + $0xa0] sm:$0xff] }
 0x400   : > { %1507 = vst.msk [vmem:[#allocation5] sm:$0xff] %vm1506_vm8, %v1502_v45  ;;  %v2249_v42 = vpack.c.bf16 %v1771_v41, %v1770_v40  ;;  %2248 = vmatprep.subr.bf16.mxu0 %v2247_v39  ;;  %v2251_v45 = vpack.c.bf16 %v1789_v44, %v1788_v43 }
 0x402   : > { %2250 = vmatpush3.bf16.msra.mxu0 %v2249_v42 }
 0x403   : > { %2252 = vmatprep.subr.bf16.mxu0 %v2251_v45 }
 0x46d   : > { %v1510_v46 = vpop.permute.xlu0 %1509 }
 0x46e   : > { %1513 = vst.msk [vmem:[#allocation5] sm:$0xff] %vm1512_vm9, %v1510_v46  ;;  %v1772_v46 = vld [vmem:[%s3291_s8 + $0x20] sm:$0xff] }
 0x471   : > { %v1516_v47 = vpop.permute.xlu1 %1515  ;;  %v1522_v48 = vpop.permute.xlu0 %1521 }
 0x472   : > { %1519 = vst.msk [vmem:[#allocation5] sm:$0xff] %vm1518_vm10, %v1516_v47  ;;  %v1773_v47 = vld [vmem:[%s3291_s8 + $0x28] sm:$0xff] }
 0x473   : > { %1525 = vst.msk [vmem:[#allocation5] sm:$0xff] %vm1524_vm11, %v1522_v48  ;;  %v2253_v48 = vpack.c.bf16 %v1773_v47, %v1772_v46  ;;  %v2090_v46 = vld [vmem:[%s3295_s16] ss:$0 sm:$0xff] }
 0x475   : > { %2254 = vmatpush3.bf16.msra.mxu0 %v2253_v48 }
 0x47a   : > { %v1534_v49 = vld [vmem:[#allocation5] sm:$0xff] }
 0x47b   : > { %2213 = vmatmul.mubr.msk.f32.vlgmr.msra.gmra.mrb[0].mxu1 %vm1542_vm12, %v1534_v49  ;;  %v1790_v49 = vld [vmem:[%s3291_s8 + $0xb0] sm:$0xff] }
 0x47c   : > { %1743 = vmatprep.mubr.f32.mxu1 %v2595_v16  ;;  %2230 = vmatpush1.bf16.msra.mxu1 %v2229_v3  ;;  %v1797_v3 = vld [vmem:[%s3291_s8 + $0xe8] sm:$0xff] }
 0x47d   : > { %2232 = vmatprep.subr.bf16.mxu1 %v2231_v6  ;;  %v2267_v5 = vpack.c.bf16 %v1797_v3, %v1796_v2  ;;  %v1780_v6 = vld [vmem:[%s3291_s8 + $0x60] sm:$0xff] }
 0x47e   : > { %v2269_v10 = vpack.c.bf16 %v1781_v7, %v1780_v6 }
 0x480   : > { %2234 = vmatpush1.bf16.msra.mxu1 %v2233_v9  ;;  %v1799_v9 = vld [vmem:[%s3291_s8 + $0xf8] sm:$0xff] }
 0x481   : > { %2236 = vmatprep.subr.bf16.mxu1 %v2235_v12  ;;  %v2271_v11 = vpack.c.bf16 %v1799_v9, %v1798_v8  ;;  %v1782_v12 = vld [vmem:[%s3291_s8 + $0x70] sm:$0xff] }
 0x482   : > { %v2273_v14 = vpack.c.bf16 %v1783_v13, %v1782_v12 }
 0x484   : > { %2238 = vmatpush1.bf16.msra.mxu1 %v2237_v15  ;;  %v1666_v15 = vlaneseq }
 0x485   : > { %2240 = vmatprep.subr.bf16.mxu1 %v2239_v19  ;;  %v1664_v19 = vld [vmem:[%s3294_s20] sm:$0x3] }
 0x486   : > { %v1667_v17 = vshrl.u32 %v1666_v15, 7 }
 0x488   : > { %2242 = vmatpush1.bf16.msra.mxu1 %v2241_v22  ;;  %v1668_v18 = vsub.s32 0, %v1667_v17  ;;  %v1672_v20 = vsub.s32 1, %v1667_v17 }
 0x48a   : > { %v1669_v21 = vrot.slane %v1664_v19, %v1668_v18  ;;  %v1673_v22 = vrot.slane %v1664_v19, %v1672_v20 }
 0x54e   : > { %v1612_v51 = vpop.f32.mrb[0].mxu1 }
 0x54f   : > { %v1613_v53 = vadd.f32 %v2085_v50, %v1612_v51  ;;  %v2214_v54 = vpop.f32.mrb[1].mxu1  ;;  %v1791_v50 = vld [vmem:[%s3291_s8 + $0xb8] sm:$0xff]  ;;  %v1774_v51 = vld [vmem:[%s3291_s8 + $0x30] sm:$0xff] }
 0x550   : > { %v1792_v54 = vld [vmem:[%s3291_s8 + $0xc0] sm:$0xff] }
 0x551   : > { %v1617_v55 = vadd.f32 %v1616_v52, %v1613_v53  ;;  %v2255_v52 = vpack.c.bf16 %v1791_v50, %v1790_v49  ;;  %v1775_v53 = vld [vmem:[%s3291_s8 + $0x38] sm:$0xff] }
 0x553   : > { %v1620_v56 = vsel %vm1542_vm12, %v1617_v55, 0.0  ;;  %2256 = vmatprep.subr.bf16.mxu0 %v2255_v52 }
 0x554   : > { %1621 = vadd.xlane.f32.xlu1 %v1620_v56  ;;  %v2257_v56 = vpack.c.bf16 %v1775_v53, %v1774_v51 }
 0x556   : > { %2258 = vmatpush3.bf16.msra.mxu0 %v2257_v56 }
 0x5e1   : > { %v1622_v57 = vpop.xlane.xlu1 %1621 }
 0x5e2   : > { %v1624_v58 = vmul.f32 0.015625, %v1622_v57 }
 0x5e4   : > { %v1625_v59 = vsub.f32 %v1617_v55, %v1624_v58  ;;  %v1793_v55 = vld [vmem:[%s3291_s8 + $0xc8] sm:$0xff]  ;;  %v1776_v58 = vld [vmem:[%s3291_s8 + $0x40] sm:$0xff] }
 0x5e5   : > { %v2259_v57 = vpack.c.bf16 %v1793_v55, %v1792_v54 }
 0x5e6   : > { %v1626_v60 = vmul.f32 %v1625_v59, %v1625_v59 }
 0x5e7   : > { %2260 = vmatprep.subr.bf16.mxu0 %v2259_v57 }
 0x5e8   : > { %v1627_v61 = vsel %vm1542_vm12, %v1626_v60, 0.0  ;;  %v1794_v60 = vld [vmem:[%s3291_s8 + $0xd0] sm:$0xff] }
 0x5e9   : > { %1628 = vadd.xlane.f32.xlu0 %v1627_v61  ;;  %v1795_v61 = vld [vmem:[%s3291_s8 + $0xd8] sm:$0xff] }
 0x5ea   : > { %v2263_v63 = vpack.c.bf16 %v1795_v61, %v1794_v60 }
 0x676   : > { %v1629_v29 = vpop.xlane.xlu0 %1628 }
 0x677   : > { %v1630_v30 = vmul.f32 0.015625, %v1629_v29 }
 0x679   : > { %v1631_v31 = vadd.f32 1e-05, %v1630_v30 }
 0x67b   : > { %2420 = vrsqrt.f32 %v1631_v31 }
 0x685   : > { %v2421_v32 = vpop.eup %2420 }
 0x686   : > { %v1633_v16 = vmul.f32 %v2421_v32, %v1625_v59  ;;  %v1777_v59 = vld [vmem:[%s3291_s8 + $0x48] sm:$0xff] }
 0x687   : > { %v2261_v62 = vpack.c.bf16 %v1777_v59, %v1776_v58 }
 0x688   : > { %v1640_v35 = vmul.f32 %v2087_v33, %v1633_v16 }
 0x689   : > { %2262 = vmatpush3.bf16.msra.mxu0 %v2261_v62 }
 0x68a   : > { %v3070_v36 = vadd.f32 %v2088_v34, %v1640_v35  ;;  %2264 = vmatprep.subr.bf16.mxu0 %v2263_v63 }
 0x68c   : > { %2089 = vmatmul.mubr.msk.f32.vlgmr.msra.gmra.mrb[2].mxu1 %vm1542_vm12, %v3070_v36 }
 0x68d   : > { %2266 = vmatpush3.bf16.msra.mxu0 %v2265_v4 }
 0x68e   : > { %2268 = vmatprep.subr.bf16.mxu0 %v2267_v5 }
 0x691   : > { %2270 = vmatpush3.bf16.msra.mxu0 %v2269_v10 }
 0x692   : > { %2272 = vmatprep.subr.bf16.mxu0 %v2271_v11 }
 0x695   : > { %2274 = vmatpush3.bf16.msra.mxu0 %v2273_v14 }
 0x75f   : > { %v1745_v23 = vpop.f32.mrb[2].mxu1 }
 0x760   : > { %v1746_v24 = vadd.f32 %v1745_v23, %v1669_v21  ;;  %v1747_v25 = vpop.f32.mrb[3].mxu1 }
 0x761   : > { %v1748_v26 = vadd.f32 %v1747_v25, %v1673_v22 }
 0x762   : > { %v1752_v27 = vmul.f32 0.044715, %v1746_v24  ;;  %v1750_v42 = vmul.f32 0.5, %v1746_v24 }
 0x763   : > { %v1753_v28 = vmul.f32 0.044715, %v1748_v26  ;;  %v1751_v40 = vmul.f32 0.5, %v1748_v26 }
 0x764   : > { %v1754_v29 = vmul.f32 %v1752_v27, %v1746_v24 }
 0x765   : > { %v1755_v30 = vmul.f32 %v1753_v28, %v1748_v26 }
 0x766   : > { %v1756_v31 = vmul.f32 %v1754_v29, %v1746_v24 }
 0x767   : > { %v1757_v32 = vmul.f32 %v1755_v30, %v1748_v26 }
 0x768   : > { %v1758_v33 = vadd.f32 %v1756_v31, %v1746_v24 }
 0x769   : > { %v1759_v16 = vadd.f32 %v1757_v32, %v1748_v26 }
 0x76a   : > { %v1760_v34 = vmul.f32 0.7978846, %v1758_v33 }
 0x76b   : > { %v1761_v35 = vmul.f32 0.7978846, %v1759_v16 }
 0x76c   : > { %2422 = vtanh.f32 %v1760_v34 }
 0x76d   : > { %2424 = vtanh.f32 %v1761_v35 }
 0x776   : > { %v2423_v37 = vpop.eup %2422 }
 0x777   : > { %v2425_v38 = vpop.eup %2424  ;;  %v1764_v39 = vadd.f32 1.0, %v2423_v37 }
 0x778   : > { %v1765_v41 = vadd.f32 1.0, %v2425_v38 }
 0x779   : > { %v1766_v44 = vmul.f32 %v1764_v39, %v1750_v42 }
 0x77a   : > { %v1767_v43 = vmul.f32 %v1765_v41, %v1751_v40 }
 0x77c   : > { %1871 = vmatprep.mubr.f32.mxu0 %v1767_v43 }
 0x77d   : > { %1872 = vmatmul.mubr.f32.vlgmr.msra.gmra.mrb[0].mxu0 %v1766_v44 }
 0x850   : > { %v2153_v45 = vpop.f32.mrb[0].mxu0 }
 0x851   : > { %v2154_v47 = vpop.f32.mrb[1].mxu0 }
 0x852   : > { %v2155_v48 = vadd.f32 %v2154_v47, %v2153_v45 }
 0x854   : > { %v1874_v49 = vadd.f32 %v2155_v48, %v2090_v46 }
 0x856   : > { %v1877_v50 = vadd.f32 %v1874_v49, %v3070_v36 }
 0x858   : > { %1878 = vst.msk [vmem:[%s2885_s19] sm:$0xff] %vm1542_vm12, %v1877_v50 }
 0x859 PF: > { %s3296_s7 = sld [smem:[#allocation17_spill]]  ;;  %s3297_s28 = sld [smem:[#allocation16_spill]] }
 0x85a   : > { %s1895_s25 = sshll.u32 %s2885_s19, 4  ;;  %s3298_s21 = sld [smem:[#allocation32_spill]]  ;;  %s3170_s25 = int_to_ptr.vmem [resolvable:$true] %s1895_s25 }
 0x85b   : > { %s1880_s5 = scalar_lea.sflag [#allocation8], %s2867_s4  ;;  %s2454_s26 = scalar_lea.vmem %s3170_s25, 128 }
 0x85c   : > { %p2455_p5 = scmp.ne.s32.totalorder %s3170_s25, %s2454_s26  ;;  %p3300_p10 = scmp.ne.s32.totalorder %s3280_s11, 0 }
 0x85d   : > { %s2599_s16 = smov [#allocation12]  }
 0x85e   : > { %p2456_p1 = pnand %p2455_p5, %p3300_p10 }
 0x85f   : > { %s2092_s18 = sshll.u32 %s3296_s7, 2  ;;  %s2458_s7 = sshll.u32 %s2599_s16, 4  ;;  %s2459_s7 = int_to_ptr.vmem [resolvable:$false] %s2458_s7 }
 0x860   : > { %s1891_s29 = sadd.s32 %s3297_s28, %s2092_s18  ;;  %s3299_s15 = smov %s3298_s21 }
 0x861   : > { %s2093_s10 = sshll.u32 %s1891_s29, 7  ;;  %p2457_p2 = pneg %p2456_p1 }
 0x862   : > { %s1893_s20 = scalar_lea.hbm %s3298_s21, %s2093_s10  ;;  %s2460_s19 = scalar_lea.vmem %s2459_s7, 256 }
 0x863   : > { %p2461_p11 = scmp.lt.s32.totalorder %s3170_s25, %s2459_s7  ;;  %p2462_p6 = scmp.lt.s32.totalorder %s2460_s19, %s2454_s26 }
 0x865   : > { %p2463_p8 = por %p2462_p6, %p2461_p11 }
 0x867   : > { %p2464_p0 = pnand %p2463_p8, %p2457_p2 }
 0x869   : > { %2467 = shalt.err (!%p2464_p0)
}
 0x86a   : > { %s2468_s28 = scalar_lea.hbm %s1893_s20, 128  ;;  %s2472_s29 = scalar_lea.hbm %s3299_s15, 1024 }
 0x86b   : > { %p2469_p7 = scmp.ne.s32.totalorder %s1893_s20, %s2468_s28  ;;  %p2473_p12 = scmp.lt.u32.totalorder %s1893_s20, %s3299_s15 }
 0x86c   : > { %p2474_p13 = scmp.lt.u32.totalorder %s2472_s29, %s2468_s28  ;;  %p2476_p5 = scmp.lt.u32.totalorder %s2468_s28, %s1893_s20 }
 0x86d   : > { %p2470_p9 = pnand %p2469_p7, %p3300_p10 }
 0x86e   : > { %p2475_p4 = por %p2474_p13, %p2473_p12 }
 0x86f   : > { %p2471_p3 = pneg %p2470_p9 }
 0x870   : > { %p2477_p1 = por %p2476_p5, %p2475_p4 }
 0x872   : > { %p2478_p2 = pnand %p2477_p1, %p2471_p3 }
 0x874   : > { %2481 = shalt.err (!%p2478_p2)
}
 0x875   : > { %2277 = dma.vmem_to_hbm [thread:$0]  (%p3300_p10), %s3170_s25, 128, %s1893_s20, %s1880_s5  }
 0x876 PF: > { %p2283_p11 = scmp.ge.s32.totalorder %s2584_s14, 2  ;;  %s1907_s27 = sand.u32 1, %s2548_s23  }
 0x877   : > { %p3301_p6 = scmp.ne.s32.totalorder %s3281_s6, 0  ;;  %s1908_s21 = scalar_lea.sflag [#allocation8], %s1907_s27 }
 0x879   : > { %p2280_p8 = pnand %p2283_p11, %p3301_p6 }
 0x87b   : > { %2535 = dma.done.wait (!%p2280_p8), %s1908_s21, 128  }
 0x87c   : > { %2537 = vsyncadd (!%p2280_p8), %s1908_s21, 4294967168  ;;  %s28_s14 = sadd.s32 1, %s2584_s14   ;;  %s3302_s26 = sld [smem:[#allocation23_spill]] }
 0x87d   : > { %p25_p0 = scmp.ge.s32.totalorder %s28_s14, 34   ;;  %s3303_s11 = sld [smem:[#allocation15_spill]] }
 0x87e   : > { %s3304_s25 = sld [smem:[#allocation22_spill]]  ;;  %s3305_s20 = sld [smem:[#allocation18_spill]] }
 0x87f   : > { %s3306_s29 = sld [smem:[#allocation19_spill]]  ;;  %s3307_s5 = sld [smem:[#allocation20_spill]] }
 0x880   : > { %s3308_s16 = sld [smem:[#allocation21_spill]]  ;;  %s3309_s21 = smov %s2544_s22 }
 0x881   : > { %s3311_s23 = smov %s2552_s24  ;;  %s3314_s27 = smov %s2576_s30 }
 0x882   : > { %s3310_s22 = smov %s3302_s26  ;;  %s3315_s28 = smov %s2580_s13 }
 0x883   : > { %s3312_s24 = smov %s3303_s11  ;;  %27 = sbr.rel (!%p25_p0) target bundleno = 19 (0x13), region = 263 }
 0x884   : > { %s3313_s26 = smov %s3305_s20 }
 0x885   : > { %s3316_s30 = smov %s3307_s5 }
 0x886   : > { %s3317_s13 = smov %s3308_s16 }
 0x88a   :  { %1913 = vsyncpa [#allocation7], 1 }
 0x88b   :  { %1915 = vsyncpa [#allocation7 + $0x1], 1 }
 0x88c   :  { %1916 = vsyncpa [#allocation8], 1 }
 0x88d   :  { %1918 = vsyncpa [#allocation8 + $0x1], 1 }

// kernel: _block_forward_impl.2
= control target key start
LH: loop header
LB: loop body
LE: loop exit
PB: predicated region body
PF: predicated region fallthrough
CT: control target
= control target key end

     0   :  { %s1455_s0 = inlined_call_operand.vmem [shape: f32[2,32,64], index: 0, kind: input, shape index: {}]   ;;  %s1456_s1 = inlined_call_operand.vmem [shape: f32[1,64], index: 1, kind: input, shape index: {}]   ;;  %s1457_s2 = inlined_call_operand.vmem [shape: f32[1,64], index: 2, kind: input, shape index: {}]   ;;  %s1458_s3 = inlined_call_operand.vmem [shape: f32[64,192], index: 3, kind: input, shape index: {}]   ;;  %s1459_s4 = inlined_call_operand.vmem [shape: f32[1,192], index: 4, kind: input, shape index: {}]   ;;  %s1460_s5 = inlined_call_operand.hbm [shape: f32[2,32,64], index: 5, kind: output, shape index: {0}]   ;;  %s1461_s6 = inlined_call_operand.vmem [shape: f32[2,4,32,16], index: 6, kind: output, shape index: {1}]   ;;  %s1462_s7 = inlined_call_operand.vmem [shape: f32[2,4,32,16], index: 7, kind: output, shape index: {2}]   ;;  %s1463_s8 = inlined_call_operand.vmem [shape: f32[2,4,32,16], index: 8, kind: output, shape index: {3}]  }
   0x1   :  { %1468 = sst [smem:[#allocation11_spill]] %s1455_s0 }
   0x2   :  { %1469 = sst [smem:[#allocation12_spill]] %s1456_s1 }
   0x3   :  { %1470 = sst [smem:[#allocation13_spill]] %s1457_s2 }
   0x4   :  { %1471 = sst [smem:[#allocation14_spill]] %s1458_s3 }
   0x5   :  { %1472 = sst [smem:[#allocation15_spill]] %s1459_s4 }
   0x6   :  { %14 = vsyncpa [#allocation3], 0 }
   0x7   :  { %16 = vsyncpa [#allocation3 + $0x1], 0  ;;  %s1176_s27 = smov 0   ;;  %s1178_s28 = smov 0  }
   0x8   :  { %s1180_s29 = smov 0   ;;  %s1182_s30 = smov 0  }
   0x9   :  { %s1184_s9 = smov 0   ;;  %s1186_s10 = smov 0  }
   0xa   :  { %s1188_s11 = smov 0   ;;  %s1190_s12 = smov 0  }
   0xb LB: > { %1473 = sst [smem:[#allocation8_spill]] %s1116_s11  ;;  %s892_s13 = sadd.s32 4294967295, %s1120_s12   ;;  %s1120_s12 = sphi %s1190_s12, %s22_s12   ;;  %s1116_s11 = sphi %s1188_s11, %s1486_s11   ;;  %s1112_s10 = sphi %s1186_s10, %s1491_s10   ;;  %s1108_s9 = sphi %s1184_s9, %s1484_s9   ;;  %s1104_s30 = sphi %s1182_s30, %s1490_s30   ;;  %s1100_s29 = sphi %s1180_s29, %s1489_s29   ;;  %s1096_s28 = sphi %s1178_s28, %s1488_s28   ;;  %s1092_s27 = sphi %s1176_s27, %s1487_s27  }
   0xc   : > { %s893_s14 = sadd.s32 4294967294, %s1120_s12   ;;  %s31_s15 = sadd.s32 1, %s1112_s10 }
   0xd   : > { %p32_p0 = scmp.ge.s32.totalorder %s31_s15, 4  ;;  %s34_s16 = sadd.s32 1, %s1116_s11 }
   0xe   : > { %p165_p1 = scmp.ne.s32.totalorder %s1100_s29, %s1096_s28  ;;  %p166_p2 = scmp.eq.s32.totalorder %s892_s13, 7 }
   0xf   : > { %s1493_s15 = smov (%p32_p0, %s31_s15), 0  ;;  %s1495_s16 = smov (!%p32_p0, %s34_s16), %s1116_s11 }
  0x10   : > { %1474 = sst [smem:[#allocation9_spill]] %s1493_s15  ;;  %s151_s17 = ssub.s32 %s1112_s10, %s1493_s15 }
  0x11   : > { %p1227_p3 = por %p166_p2, %p165_p1  ;;  %p36_p4 = scmp.ge.s32.totalorder %s1495_s16, 2 }
  0x12   : > { %p171_p5 = scmp.ne.s32.totalorder %s1096_s28, %s1092_s27  ;;  %p172_p6 = scmp.eq.s32.totalorder %s893_s14, 7 }
  0x13   : > { %p896_p7 = scmp.ge.s32.totalorder %s1120_s12, 1  ;;  %s1497_s16 = smov (%p36_p4, %s1495_s16), 0 }
  0x14   : > { %1476 = sst [smem:[#allocation10_spill]] %s1497_s16  ;;  %p1236_p8 = por %p172_p6, %p171_p5 }
  0x15   : > { %p297_p9 = scmp.lt.s32.totalorder %s1120_s12, 9  ;;  %s150_s20 = ssub.s32 %s1116_s11, %s1497_s16 }
  0x16   : > { %s155_s21 = sadd.s32 1, %s1100_s29  ;;  %s152_s22 = sor.u32 %s151_s17, %s150_s20 }
  0x17   : > { %p298_p10 = pnand %p896_p7, %p297_p9  ;;  %p153_p11 = scmp.eq.s32.totalorder %s152_s22, 0 }
  0x18   : > { %p346_p12 = scmp.lt.s32.totalorder (!%p298_p10), %s1108_s9, 1  ;;  %p348_p13 = scmp.lt.s32.totalorder (!%p298_p10), %s1104_s30, 3  ;;  %vm357_vm0 = vcmask (!%p298_p10), 523264   ;;  %v1122_v20 = vmov (!%p298_p10), 0.0   ;;  %v405_v41 = vlaneseq (!%p298_p10)  ;;  %vm489_vm1 = vcmask (!%p298_p10), 130048  }
  0x19   : > { %s1245_s23 = scalar_select %p153_p11, %s1100_s29, %s155_s21  }
  0x1a   : > { %301 = sbr.rel (%p298_p10) target bundleno = 740 (0x2e4), region = 40  ;;  %s1478_s0 = sld [smem:[#allocation11_spill]] (!%p298_p10)  ;;  %482 = vmatprep.mubr.f32.mxu0 (!%p298_p10), %v1122_v20  ;;  %v406_v42 = vshrl.u32 (!%p298_p10), %v405_v41, 7 }
  0x1b   : > { %s1479_s3 = sld [smem:[#allocation14_spill]] (!%p298_p10)  ;;  %s1480_s1 = sld [smem:[#allocation12_spill]] (!%p298_p10) }
  0x1c   : > { %s1481_s2 = sld [smem:[#allocation13_spill]] (!%p298_p10)  ;;  %v407_v43 = vsub.s32 (!%p298_p10), 0, %v406_v42  ;;  %s1482_s4 = sld [smem:[#allocation15_spill]] (!%p298_p10)  ;;  %v411_v45 = vsub.s32 (!%p298_p10), 1, %v406_v42 }
  0x1d   : > { %s1124_s20 = smov (!%p298_p10), 64   ;;  %s1466_s15 = smov (!%p298_p10), 112  }
  0x21   : > { %s347_s24 = scalar_select %p346_p12, %s1108_s9, 1  ;;  %v388_v7 = vld [vmem:[%s1479_s3 + $0x8] sm:$0xff]  ;;  %v390_v8 = vld [vmem:[%s1479_s3 + $0x18] sm:$0xff]  ;;  %v387_v10 = vld [vmem:[%s1479_s3] sm:$0xff] }
  0x22   : > { %s349_s25 = scalar_select %p348_p13, %s1104_s30, 3  ;;  %v929_v9 = vpack.c.bf16 %v390_v8, %v388_v7  ;;  %v389_v11 = vld [vmem:[%s1479_s3 + $0x10] sm:$0xff]  ;;  %v392_v13 = vld [vmem:[%s1479_s3 + $0x28] sm:$0xff]  ;;  %v394_v14 = vld [vmem:[%s1479_s3 + $0x38] sm:$0xff] }
  0x23   : > { %s901_s26 = sshll.u32 %s347_s24, 2  ;;  %v931_v12 = vpack.c.bf16 %v389_v11, %v387_v10  ;;  %v391_v15 = vld [vmem:[%s1479_s3 + $0x20] sm:$0xff]  ;;  %v933_v16 = vpack.c.bf16 %v394_v14, %v392_v13  ;;  %v393_v17 = vld [vmem:[%s1479_s3 + $0x30] sm:$0xff]  ;;  %v396_v18 = vld [vmem:[%s1479_s3 + $0x48] sm:$0xff]  ;;  %s1125_s24 = smov 80  }
  0x24   : > { %s351_s13 = sadd.s32 %s901_s26, %s349_s25  ;;  %930 = vmatprep.subr.bf16.mxu0 %v929_v9  ;;  %v398_v19 = vld [vmem:[%s1479_s3 + $0x58] sm:$0xff]  ;;  %v935_v21 = vpack.c.bf16 %v393_v17, %v391_v15  ;;  %v395_v23 = vld [vmem:[%s1479_s3 + $0x40] sm:$0xff]  ;;  %v397_v24 = vld [vmem:[%s1479_s3 + $0x50] sm:$0xff]  ;;  %s1127_s25 = smov 96  }
  0x25   : > { %s902_s14 = sshll.u32 %s351_s13, 3  ;;  %932 = vmatpush1.bf16.msra.mxu0 %v931_v12  ;;  %v937_v22 = vpack.c.bf16 %v398_v19, %v396_v18  ;;  %v400_v25 = vld [vmem:[%s1479_s3 + $0x68] sm:$0xff]  ;;  %v402_v26 = vld [vmem:[%s1479_s3 + $0x78] sm:$0xff]  ;;  %v939_v27 = vpack.c.bf16 %v397_v24, %v395_v23  ;;  %v399_v29 = vld [vmem:[%s1479_s3 + $0x60] sm:$0xff]  ;;  %s919_s26 = sshll.u32 %s1108_s9, 2 }
  0x26   : > { %s353_s17 = scalar_lea.vmem %s1478_s0, %s902_s14  ;;  %934 = vmatprep.subr.bf16.mxu0 %v933_v16  ;;  %v941_v28 = vpack.c.bf16 %v402_v26, %v400_v25  ;;  %v401_v30 = vld [vmem:[%s1479_s3 + $0x70] sm:$0xff]  ;;  %v903_v36 = vld [vmem:[%s1480_s1] ss:$0 sm:$0xff]  ;;  %s1123_s14 = smov 48  }
  0x27   : > { %v354_v0 = vld [vmem:[%s353_s17] sm:$0xff]  ;;  %v943_v31 = vpack.c.bf16 %v401_v30, %v399_v29  ;;  %s1305_s17 = sand.u32 1, %s1096_s28  }
  0x28   : > { %v358_v1 = vsel %vm357_vm0, %v354_v0, 0.0  ;;  %s897_s22 = sshll.u32 %s1305_s17, 3  ;;  %v904_v38 = vld [vmem:[%s1481_s2] ss:$0 sm:$0xff]  ;;  %s1323_s13 = sshll.u32 %s1305_s17, 5 }
  0x29   : > { %359 = vadd.xlane.f32.xlu0 %v358_v1  ;;  %936 = vmatpush1.bf16.msra.mxu0 %v935_v21  ;;  %s1315_s16 = scalar_lea.vmem [#allocation2], %s897_s22  ;;  %v403_v44 = vld [vmem:[%s1482_s4] sm:$0x3]  ;;  %s1326_s21 = scalar_lea.vmem [#allocation4], %s1323_s13 }
  0x2a   : > { %938 = vmatprep.subr.bf16.mxu0 %v937_v22  ;;  %v408_v46 = vrot.slane %v403_v44, %v407_v43  ;;  %v412_v47 = vrot.slane %v403_v44, %v411_v45  ;;  %s1331_s22 = scalar_lea.vmem [#allocation6], %s1323_s13  ;;  %s571_s1 = sshll.u32 %s1315_s16, 4  ;;  %s1345_s1 = int_to_ptr.vmem [resolvable:$true] %s571_s1 }
  0x2b   : > { %s1026_s11 = scalar_lea.vmem %s1345_s1, 128 }
  0x2c   : > { %p1027_p0 = scmp.ne.s32.totalorder %s1345_s1, %s1026_s11 }
  0x2d   : > { %940 = vmatpush1.bf16.msra.mxu0 %v939_v27 }
  0x2e   : > { %942 = vmatprep.subr.bf16.mxu0 %v941_v28  ;;  %p1028_p1 = pnand %p1027_p0, %p1227_p3 }
  0x30   : > { %p1029_p2 = pneg %p1028_p1 }
  0x31   : > { %944 = vmatpush1.bf16.msra.mxu0 %v943_v31 }
  0xb6   : > { %v360_v2 = vpop.xlane.xlu0 %359 }
  0xb7   : > { %v362_v3 = vmul.f32 0.015625, %v360_v2 }
  0xb9   : > { %v363_v4 = vsub.f32 %v354_v0, %v362_v3 }
  0xbb   : > { %v364_v5 = vmul.f32 %v363_v4, %v363_v4 }
  0xbd   : > { %v365_v6 = vsel %vm357_vm0, %v364_v5, 0.0 }
  0xbe   : > { %366 = vadd.xlane.f32.xlu0 %v365_v6 }
 0x14b   : > { %v367_v32 = vpop.xlane.xlu0 %366 }
 0x14c   : > { %v368_v33 = vmul.f32 0.015625, %v367_v32 }
 0x14e   : > { %v369_v34 = vadd.f32 1e-05, %v368_v33 }
 0x150   : > { %1024 = vrsqrt.f32 %v369_v34 }
 0x15a   : > { %v1025_v35 = vpop.eup %1024 }
 0x15b   : > { %v371_v37 = vmul.f32 %v1025_v35, %v363_v4 }
 0x15d   : > { %v378_v39 = vmul.f32 %v903_v36, %v371_v37 }
 0x15f   : > { %v385_v40 = vadd.f32 %v904_v38, %v378_v39 }
 0x161   : > { %905 = vmatmul.mubr.msk.f32.vlgmr.msra.gmra.mrb[0].mxu0 %vm357_vm0, %v385_v40  ;;  %386 = vst.msk [vmem:[%s1315_s16] sm:$0xff] %vm357_vm0, %v385_v40 }
 0x234   : > { %v484_v48 = vpop.f32.mrb[0].mxu0 }
 0x235   : > { %v485_v49 = vadd.f32 %v484_v48, %v408_v46  ;;  %v486_v50 = vpop.f32.mrb[1].mxu0 }
 0x236   : > { %v487_v51 = vadd.f32 %v486_v50, %v412_v47 }
 0x237   : > { %502 = vrot.lane.b32.xlu0 %v485_v49, %s1123_s14  ;;  %492 = vrot.lane.b32.xlu1 %v485_v49, %s1124_s20  ;;  %490 = vst.msk [vmem:[%s1326_s21] sm:$0xff] %vm489_vm1, %v485_v49  ;;  %s1128_s14 = smov 32   ;;  %s567_s20 = sadd.s32 %s1104_s30, %s919_s26 }
 0x238   : > { %496 = vst.msk [vmem:[%s1331_s22] sm:$0xff] %vm489_vm1, %v487_v51  ;;  %s920_s0 = sshll.u32 %s567_s20, 7  ;;  %s1129_s26 = smov [#allocation2]  }
 0x239   : > { %s1343_s4 = scalar_lea.hbm %s1460_s5, %s920_s0 }
 0x23b   : > { %538 = vrot.lane.b32.xlu0 %v487_v51, %s1125_s24  ;;  %497 = vrot.lane.b32.xlu1 %v485_v49, %s1466_s15  ;;  %s544_s15 = scalar_lea.sflag [#allocation3], %s1305_s17 }
 0x23f   : > { %513 = vrot.lane.b32.xlu1 %v485_v49, %s1127_s25 }
 0x243   : > { %518 = vrot.lane.b32.xlu1 %v485_v49, %s1128_s14  ;;  %s1030_s14 = sshll.u32 %s1129_s26, 4  ;;  %s1031_s14 = int_to_ptr.vmem [resolvable:$false] %s1030_s14 }
 0x244   : > { %s1032_s16 = scalar_lea.vmem %s1031_s14, 256  ;;  %p1033_p4 = scmp.lt.s32.totalorder %s1345_s1, %s1031_s14 }
 0x245   : > { %p1034_p5 = scmp.lt.s32.totalorder %s1032_s16, %s1026_s11 }
 0x247   : > { %528 = vrot.lane.b32.xlu1 %v485_v49, %s1125_s24  ;;  %p1035_p6 = por %p1034_p5, %p1033_p4 }
 0x249   : > { %p1036_p7 = pnand %p1035_p6, %p1029_p2 }
 0x24b   : > { %1039 = shalt.err (!%p1036_p7)
}
 0x24c   : > { %s1040_s0 = scalar_lea.hbm %s1343_s4, 128  ;;  %s1044_s17 = scalar_lea.hbm %s1460_s5, 1024 }
 0x24d   : > { %p1041_p9 = scmp.ne.s32.totalorder %s1343_s4, %s1040_s0  ;;  %p1045_p12 = scmp.lt.u32.totalorder %s1343_s4, %s1460_s5 }
 0x24e   : > { %p1046_p13 = scmp.lt.u32.totalorder %s1044_s17, %s1040_s0  ;;  %p1048_p1 = scmp.lt.u32.totalorder %s1040_s0, %s1343_s4 }
 0x24f   : > { %p1042_p10 = pnand %p1041_p9, %p1227_p3 }
 0x250   : > { %p1047_p0 = por %p1046_p13, %p1045_p12 }
 0x251   : > { %p1043_p11 = pneg %p1042_p10 }
 0x252   : > { %p1049_p2 = por %p1048_p1, %p1047_p0 }
 0x254   : > { %p1050_p4 = pnand %p1049_p2, %p1043_p11 }
 0x256   : > { %1053 = shalt.err (!%p1050_p4)
}
 0x257   : > { %945 = dma.vmem_to_hbm [thread:$0]  (%p1227_p3), %s1345_s1, 128, %s1343_s4, %s544_s15   ;;  %v615_v62 = vld [vmem:[%s1326_s21] sm:$0xff] (%p1227_p3) }
 0x258   : > { %s1483_s11 = smov 112   ;;  %s1130_s26 = smov 16  }
 0x259   : > { %508 = vrot.lane.b32.xlu1 %v487_v51, %s1483_s11  ;;  %s1372_s14 = scalar_lea.vmem [#allocation5], %s1323_s13  ;;  %s921_s1 = sshll.u32 (%p1227_p3), %s1108_s9, 4 }
 0x25a   : > { %s579_s4 = sadd.s32 (%p1227_p3), %s1104_s30, %s921_s1 }
 0x25b   : > { %s922_s13 = sshll.u32 (%p1227_p3), %s579_s4, 3 }
 0x25c   : > { %s581_s16 = scalar_lea.vmem (%p1227_p3), %s1461_s6, %s922_s13 }
 0x25d   : > { %523 = vrot.lane.b32.xlu1 %v487_v51, %s1127_s25  ;;  %616 = vst [vmem:[%s581_s16] sm:$0xff] (%p1227_p3), %v615_v62 }
 0x261   : > { %533 = vrot.lane.b32.xlu1 %v485_v49, %s1130_s26 }
 0x2a9   : > { %v503_v52 = vpop.permute.xlu0 %502  ;;  %v493_v53 = vpop.permute.xlu1 %492 }
 0x2aa   : > { %907 = vst.msk [vmem:[%s1372_s14 + $0x8] sm:$0xff] %vm489_vm1, %v503_v52  ;;  %495 = vst.msk [vmem:[%s1372_s14] sm:$0xff] %vm489_vm1, %v493_v53 }
 0x2ad   : > { %v539_v54 = vpop.permute.xlu0 %538  ;;  %v498_v55 = vpop.permute.xlu1 %497 }
 0x2ae   : > { %914 = vst.msk [vmem:[%s1331_s22 + $0x18] sm:$0xff] %vm489_vm1, %v539_v54  ;;  %906 = vst.msk [vmem:[%s1326_s21 + $0x8] sm:$0xff] %vm489_vm1, %v498_v55 }
 0x2b1   : > { %v514_v56 = vpop.permute.xlu1 %513 }
 0x2b2   : > { %909 = vst.msk [vmem:[%s1326_s21 + $0x10] sm:$0xff] %vm489_vm1, %v514_v56 }
 0x2b5   : > { %v519_v57 = vpop.permute.xlu1 %518  ;;  %v617_v63 = vld [vmem:[%s1326_s21 + $0x8] sm:$0xff] (%p1227_p3) }
 0x2b6   : > { %910 = vst.msk [vmem:[%s1372_s14 + $0x10] sm:$0xff] %vm489_vm1, %v519_v57  ;;  %618 = vst [vmem:[%s581_s16 + $0x20] sm:$0xff] (%p1227_p3), %v617_v63 }
 0x2b9   : > { %v529_v58 = vpop.permute.xlu1 %528  ;;  %v619_v0 = vld [vmem:[%s1326_s21 + $0x10] sm:$0xff] (%p1227_p3) }
 0x2ba   : > { %912 = vst.msk [vmem:[%s1326_s21 + $0x18] sm:$0xff] %vm489_vm1, %v529_v58  ;;  %620 = vst [vmem:[%s581_s16 + $0x40] sm:$0xff] (%p1227_p3), %v619_v0 }
 0x2c1   : > { %v621_v1 = vld [vmem:[%s1326_s21 + $0x18] sm:$0xff] (%p1227_p3) }
 0x2c2   : > { %622 = vst [vmem:[%s581_s16 + $0x60] sm:$0xff] (%p1227_p3), %v621_v1 }
 0x2cb   : > { %v509_v59 = vpop.permute.xlu1 %508 }
 0x2cc   : > { %908 = vst.msk [vmem:[%s1331_s22 + $0x8] sm:$0xff] %vm489_vm1, %v509_v59 }
 0x2ce   : > { %577 = sbr.rel (!%p1227_p3) target bundleno = 725 (0x2d5), region = 48 }
 0x2cf   : > { %v524_v60 = vpop.permute.xlu1 %523 }
 0x2d0   : > { %911 = vst.msk [vmem:[%s1331_s22 + $0x10] sm:$0xff] %vm489_vm1, %v524_v60 }
 0x2d3   : > { %v534_v61 = vpop.permute.xlu1 %533 }
 0x2d4   : > { %913 = vst.msk [vmem:[%s1372_s14 + $0x18] sm:$0xff] %vm489_vm1, %v534_v61 }
 0x2d5 PF: > { %628 = sbr.rel (!%p1227_p3) target bundleno = 733 (0x2dd), region = 86  ;;  %s923_s21 = sshll.u32 (%p1227_p3), %s1108_s9, 4  ;;  %v666_v2 = vld [vmem:[%s1372_s14] sm:$0xff] (%p1227_p3)  ;;  %v668_v3 = vld [vmem:[%s1372_s14 + $0x8] sm:$0xff] (%p1227_p3)  ;;  %v670_v4 = vld [vmem:[%s1372_s14 + $0x10] sm:$0xff] (%p1227_p3) }
 0x2d6   : > { %s630_s0 = sadd.s32 (%p1227_p3), %s1104_s30, %s923_s21 }
 0x2d7   : > { %s924_s2 = sshll.u32 (%p1227_p3), %s630_s0, 3 }
 0x2d8   : > { %s632_s24 = scalar_lea.vmem (%p1227_p3), %s1462_s7, %s924_s2 }
 0x2d9   : > { %667 = vst [vmem:[%s632_s24] sm:$0xff] (%p1227_p3), %v666_v2  ;;  %669 = vst [vmem:[%s632_s24 + $0x20] sm:$0xff] (%p1227_p3), %v668_v3 }
 0x2da   : > { %671 = vst [vmem:[%s632_s24 + $0x40] sm:$0xff] (%p1227_p3), %v670_v4 }
 0x2db   : > { %v672_v5 = vld [vmem:[%s1372_s14 + $0x18] sm:$0xff] (%p1227_p3) }
 0x2dc   : > { %673 = vst [vmem:[%s632_s24 + $0x60] sm:$0xff] %v672_v5 }
 0x2dd PF: > { %679 = sbr.rel (!%p1227_p3) target bundleno = 740 (0x2e4), region = 124  ;;  %s925_s20 = sshll.u32 (%p1227_p3), %s1108_s9, 4  ;;  %v717_v6 = vld [vmem:[%s1331_s22] sm:$0xff] (%p1227_p3)  ;;  %v719_v7 = vld [vmem:[%s1331_s22 + $0x8] sm:$0xff] (%p1227_p3)  ;;  %v721_v8 = vld [vmem:[%s1331_s22 + $0x10] sm:$0xff] (%p1227_p3) }
 0x2de   : > { %s681_s11 = sadd.s32 (%p1227_p3), %s1104_s30, %s925_s20  ;;  %v723_v9 = vld [vmem:[%s1331_s22 + $0x18] sm:$0xff] (%p1227_p3) }
 0x2df   : > { %s926_s26 = sshll.u32 (%p1227_p3), %s681_s11, 3 }
 0x2e0   : > { %s683_s4 = scalar_lea.vmem (%p1227_p3), %s1463_s8, %s926_s26 }
 0x2e1   : > { %718 = vst [vmem:[%s683_s4] sm:$0xff] (%p1227_p3), %v717_v6  ;;  %720 = vst [vmem:[%s683_s4 + $0x20] sm:$0xff] (%p1227_p3), %v719_v7 }
 0x2e2   : > { %722 = vst [vmem:[%s683_s4 + $0x40] sm:$0xff] (%p1227_p3), %v721_v8  ;;  %724 = vst [vmem:[%s683_s4 + $0x60] sm:$0xff] (%p1227_p3), %v723_v9 }
 0x2e4 PF: > { %p951_p3 = scmp.ge.s32.totalorder %s1120_s12, 2  ;;  %s736_s9 = sand.u32 1, %s1092_s27  }
 0x2e5   : > { %s737_s30 = scalar_lea.sflag [#allocation3], %s736_s9 }
 0x2e6   : > { %p948_p5 = pnand %p951_p3, %p1236_p8 }
 0x2e8   : > { %1087 = dma.done.wait (!%p948_p5), %s737_s30, 128  }
 0x2e9   : > { %1089 = vsyncadd (!%p948_p5), %s737_s30, 4294967168  ;;  %s22_s12 = sadd.s32 1, %s1120_s12   ;;  %s1484_s9 = sld [smem:[#allocation8_spill]] }
 0x2ea   : > { %p19_p6 = scmp.ge.s32.totalorder %s22_s12, 10   ;;  %s1485_s18 = sld [smem:[#allocation9_spill]] }
 0x2eb   : > { %s1486_s11 = sld [smem:[#allocation10_spill]]  ;;  %s1487_s27 = smov %s1096_s28 }
 0x2ec   : > { %s1488_s28 = smov %s1100_s29  ;;  %s1489_s29 = smov %s1245_s23 }
 0x2ed   : > { %s1490_s30 = smov %s1112_s10  ;;  %21 = sbr.rel (!%p19_p6) target bundleno = 11 (0xb), region = 234 }
 0x2f0   : > { %s1491_s10 = smov %s1485_s18 }
 0x2f4   :  { %763 = vsyncpa [#allocation3], 1 }
 0x2f5   :  { %765 = vsyncpa [#allocation3 + $0x1], 1 }

// kernel: _block_forward_impl.3
= control target key start
LH: loop header
LB: loop body
LE: loop exit
PB: predicated region body
PF: predicated region fallthrough
CT: control target
= control target key end

     0   :  { %s3232_s0 = inlined_call_operand.hbm [shape: f32[2,32,64], index: 0, kind: input, shape index: {}, may-alias: {0,12}]   ;;  %s3233_s1 = inlined_call_operand.vmem [shape: f32[2,4,32,16], index: 1, kind: input, shape index: {}]   ;;  %s3234_s2 = inlined_call_operand.vmem [shape: f32[2,4,32,16], index: 2, kind: input, shape index: {}]   ;;  %s3235_s3 = inlined_call_operand.vmem [shape: f32[2,4,32,16], index: 3, kind: input, shape index: {}]   ;;  %s3236_s4 = inlined_call_operand.vmem [shape: f32[64,64], index: 4, kind: input, shape index: {}]   ;;  %s3237_s5 = inlined_call_operand.vmem [shape: f32[1,64], index: 5, kind: input, shape index: {}]   ;;  %s3238_s6 = inlined_call_operand.vmem [shape: f32[1,64], index: 6, kind: input, shape index: {}]   ;;  %s3239_s7 = inlined_call_operand.vmem [shape: f32[1,64], index: 7, kind: input, shape index: {}]   ;;  %s3240_s8 = inlined_call_operand.vmem [shape: f32[64,256], index: 8, kind: input, shape index: {}]   ;;  %s3241_s9 = inlined_call_operand.vmem [shape: f32[1,256], index: 9, kind: input, shape index: {}]   ;;  %s3242_s10 = inlined_call_operand.vmem [shape: f32[256,64], index: 10, kind: input, shape index: {}]   ;;  %s3243_s11 = inlined_call_operand.vmem [shape: f32[1,64], index: 11, kind: input, shape index: {}]   ;;  %s3244_s12 = inlined_call_operand.hbm [shape: f32[2,32,64], index: 12, kind: output, shape index: {}, may-alias: {0,12}]  }
   0x1   :  { %3257 = sst [smem:[#allocation24_spill]] %s3236_s4 }
   0x2   :  { %3258 = sst [smem:[#allocation25_spill]] %s3237_s5 }
   0x3   :  { %3259 = sst [smem:[#allocation26_spill]] %s3238_s6 }
   0x4   :  { %3260 = sst [smem:[#allocation27_spill]] %s3239_s7 }
   0x5   :  { %3261 = sst [smem:[#allocation28_spill]] %s3240_s8 }
   0x6   :  { %3262 = sst [smem:[#allocation29_spill]] %s3241_s9 }
   0x7   :  { %3263 = sst [smem:[#allocation30_spill]] %s3242_s10 }
   0x8   :  { %3264 = sst [smem:[#allocation31_spill]] %s3243_s11 }
   0x9   :  { %3265 = sst [smem:[#allocation32_spill]] %s3244_s12 }
   0xa   :  { %17 = vsyncpa [#allocation7], 0 }
   0xb   :  { %19 = vsyncpa [#allocation7 + $0x1], 0 }
   0xc   :  { %20 = vsyncpa [#allocation8], 0 }
   0xd   :  { %22 = vsyncpa [#allocation8 + $0x1], 0  ;;  %s2665_s21 = smov 0   ;;  %s2667_s22 = smov 0  }
   0xe   :  { %s2669_s23 = smov 0   ;;  %s2671_s24 = smov 0  }
   0xf   :  { %s2673_s25 = smov 0   ;;  %s2675_s26 = smov 0  }
  0x10   :  { %s2677_s27 = smov 0   ;;  %s2679_s28 = smov 0  }
  0x11   :  { %s2681_s29 = smov 0   ;;  %s2683_s30 = smov 0  }
  0x12   :  { %s2685_s13 = smov 0   ;;  %s2687_s14 = smov 0  }
  0x13 LB: > { %3266 = sst [smem:[#allocation15_spill]] %s2556_s25  ;;  %s3246_s15 = sadd.s32 4294967295, %s2584_s14   ;;  %s2584_s14 = sphi %s2687_s14, %s28_s14   ;;  %s2580_s13 = sphi %s2685_s13, %s3317_s13   ;;  %s2576_s30 = sphi %s2683_s30, %s3316_s30   ;;  %s2572_s29 = sphi %s2681_s29, %s3306_s29   ;;  %s2568_s28 = sphi %s2679_s28, %s3315_s28   ;;  %s2564_s27 = sphi %s2677_s27, %s3314_s27   ;;  %s2560_s26 = sphi %s2675_s26, %s3313_s26   ;;  %s2556_s25 = sphi %s2673_s25, %s3304_s25   ;;  %s2552_s24 = sphi %s2671_s24, %s3312_s24   ;;  %s2548_s23 = sphi %s2669_s23, %s3311_s23   ;;  %s2544_s22 = sphi %s2667_s22, %s3310_s22   ;;  %s2540_s21 = sphi %s2665_s21, %s3309_s21  }
  0x14   : > { %3267 = sst [smem:[#allocation16_spill]] %s2564_s27  ;;  %s40_s17 = sadd.s32 1, %s2572_s29 }
  0x15   : > { %3268 = sst [smem:[#allocation17_spill]] %s2568_s28  ;;  %s43_s18 = sadd.s32 1, %s2576_s30 }
  0x16   : > { %3269 = sst [smem:[#allocation18_spill]] %s2572_s29  ;;  %p41_p0 = scmp.ge.s32.totalorder %s40_s17, 4 }
  0x17   : > { %s47_s19 = sadd.s32 1, %s2580_s13  ;;  %s56_s20 = sadd.s32 1, %s2556_s25 }
  0x18   : > { %p63_p1 = scmp.ne.s32.totalorder %s2556_s25, %s2552_s24  ;;  %s3319_s17 = smov (%p41_p0, %s40_s17), 0 }
  0x19   : > { %3270 = sst [smem:[#allocation19_spill]] %s3319_s17  ;;  %s3321_s18 = smov (!%p41_p0, %s43_s18), %s2576_s30 }
  0x1a   : > { %p64_p2 = scmp.eq.s32.totalorder %s2584_s14, 0  ;;  %p69_p3 = scmp.ne.s32.totalorder %s2552_s24, %s2548_s23 }
  0x1b   : > { %p45_p4 = scmp.ge.s32.totalorder %s3321_s18, 4  ;;  %p70_p5 = scmp.eq.s32.totalorder %s3246_s15, 0 }
  0x1c   : > { %p2746_p6 = por %p64_p2, %p63_p1  ;;  %p107_p7 = scmp.lt.s32.totalorder %s2572_s29, %s2576_s30 }
  0x1d   : > { %s3323_s18 = smov (%p45_p4, %s3321_s18), 0  ;;  %s3325_s19 = smov (!%p45_p4, %s47_s19), %s2580_s13 }
  0x1e   : > { %3272 = sst [smem:[#allocation20_spill]] %s3323_s18  ;;  %s52_s12 = ssub.s32 %s2576_s30, %s3323_s18 }
  0x1f   : > { %p2760_p8 = por %p70_p5, %p69_p3  ;;  %p49_p9 = scmp.ge.s32.totalorder %s3325_s19, 2 }
  0x20   : > { %p109_p10 = scmp.lt.s32.totalorder %s3319_s17, %s3323_s18  ;;  %s116_s7 = sadd.s32 1, %s2544_s22 }
  0x21   : > { %s3273_s15 = scalar_select %p2760_p8, 1, 0 }
  0x22   : > { %s2768_s28 = scalar_select %p107_p7, %s2572_s29, %s2576_s30 }
  0x23   : > { %s3327_s19 = smov (%p49_p9, %s3325_s19), 0  ;;  %p123_p13 = scmp.ne.s32.totalorder %s2544_s22, %s2540_s21 }
  0x24   : > { %3274 = sst [smem:[#allocation21_spill]] %s3327_s19  ;;  %s51_s9 = ssub.s32 %s2580_s13, %s3327_s19 }
  0x25   : > { %s110_s11 = scalar_select %p109_p10, %s3319_s17, %s3323_s18 }
  0x26   : > { %s53_s6 = sor.u32 %s52_s12, %s51_s9  ;;  %p2788_p0 = por %p123_p13, %p64_p2 }
  0x27   : > { %s112_s10 = ssub.s32 %s2768_s28, %s110_s11  ;;  %p54_p11 = scmp.eq.s32.totalorder %s53_s6, 0 }
  0x28   : > { %s113_s8 = sor.u32 %s112_s10, %s51_s9  ;;  %s3278_s27 = sadd.s32 4294967295, %s2584_s14  }
  0x29   : > { %p114_p12 = scmp.eq.s32.totalorder %s113_s8, 0  ;;  %p355_p4 = scmp.eq.s32.totalorder %s3278_s27, 31 }
  0x2a   : > { %s2781_s5 = scalar_select %p54_p11, %s2556_s25, %s56_s20  }
  0x2b   : > { %s2784_s29 = scalar_select %p114_p12, %s2544_s22, %s116_s7  }
  0x2c   : > { %3275 = sst [smem:[#allocation22_spill]] %s2781_s5  ;;  %s3279_s18 = sadd.s32 4294967294, %s2584_s14  }
  0x2d   : > { %3276 = sst [smem:[#allocation23_spill]] %s2784_s29  ;;  %p361_p5 = scmp.eq.s32.totalorder %s3279_s18, 31 }
  0x2e   : > { %s3277_s4 = scalar_select %p2788_p0, 1, 0 }
  0x2f   : > { %p2799_p7 = por %p355_p4, %p63_p1  ;;  %p2806_p9 = por %p361_p5, %p69_p3 }
  0x30   : > { %p2049_p10 = scmp.ge.s32.totalorder %s2584_s14, 32 }
  0x31   : > { %s3280_s11 = scalar_select %p2799_p7, 1, 0 }
  0x32   : > { %s3281_s6 = scalar_select %p2806_p9, 1, 0 }
  0x33   : > { %401 = sbr.rel (%p2049_p10) target bundleno = 110 (0x6e), region = 48  ;;  %s2812_s7 = sand.u32 (!%p2049_p10), 1, %s2556_s25  }
  0x34   : > { %s2051_s8 = sshll.u32 (!%p2049_p10), %s2580_s13, 2  ;;  %s2050_s9 = sshll.u32 (!%p2049_p10), %s2812_s7, 3 }
  0x35   : > { %s414_s10 = sadd.s32 (!%p2049_p10), %s2576_s30, %s2051_s8  ;;  %s409_s27 = scalar_lea.vmem (!%p2049_p10), [#allocation6], %s2050_s9 }
  0x36   : > { %s2052_s12 = sshll.u32 (!%p2049_p10), %s414_s10, 7  ;;  %s418_s18 = sshll.u32 (!%p2049_p10), %s409_s27, 4  ;;  %s419_s18 = int_to_ptr.vmem [resolvable:$true] %s418_s18 }
  0x37   : > { %s2820_s17 = scalar_lea.hbm (!%p2049_p10), %s3232_s0, %s2052_s12  ;;  %s406_s5 = scalar_lea.sflag (!%p2049_p10), [#allocation7], %s2812_s7 }
  0x38   : > { %s2426_s25 = scalar_lea.hbm (!%p2049_p10), %s2820_s17, 128  ;;  %s2430_s9 = scalar_lea.hbm (!%p2049_p10), %s3232_s0, 1024 }
  0x39   : > { %p2427_p1 = scmp.ne.s32.totalorder (!%p2049_p10), %s2820_s17, %s2426_s25  ;;  %p2431_p11 = scmp.lt.u32.totalorder (!%p2049_p10), %s2820_s17, %s3232_s0 }
  0x3a   : > { %p2432_p12 = scmp.lt.u32.totalorder %s2430_s9, %s2426_s25  ;;  %p2434_p4 = scmp.lt.u32.totalorder %s2426_s25, %s2820_s17 }
  0x3b   : > { %p2428_p2 = pnand %p2427_p1, %p2746_p6 }
  0x3c   : > { %p2433_p13 = por %p2432_p12, %p2431_p11 }
  0x3d   : > { %p2429_p3 = pneg %p2428_p2 }
  0x3e   : > { %p2435_p5 = por %p2434_p4, %p2433_p13 }
  0x40   : > { %p2436_p10 = pnand %p2435_p5, %p2429_p3 }
  0x42   : > { %2439 = shalt.err (!%p2436_p10)
}
  0x43   : > { %s2440_s19 = scalar_lea.vmem %s419_s18, 128  ;;  %s2586_s12 = smov [#allocation6]  }
  0x44   : > { %p2441_p9 = scmp.ne.s32.totalorder %s419_s18, %s2440_s19  ;;  %s2444_s20 = sshll.u32 %s2586_s12, 4  ;;  %s2445_s20 = int_to_ptr.vmem [resolvable:$false] %s2444_s20 }
  0x45   : > { %s2446_s8 = scalar_lea.vmem %s2445_s20, 256  ;;  %p2447_p7 = scmp.lt.s32.totalorder %s419_s18, %s2445_s20 }
  0x46   : > { %p2442_p1 = pnand %p2441_p9, %p2746_p6  ;;  %p2448_p8 = scmp.lt.s32.totalorder %s2446_s8, %s2440_s19 }
  0x48   : > { %p2443_p2 = pneg %p2442_p1  ;;  %p2449_p0 = por %p2448_p8, %p2447_p7 }
  0x4a   : > { %p2450_p11 = pnand %p2449_p0, %p2443_p2 }
  0x4c   : > { %2453 = shalt.err (!%p2450_p11)
}
  0x4d   : > { %2275 = dma.hbm_to_vmem [thread:$0]  (%p2746_p6), %s2820_s17, 128, %s419_s18, %s406_s5  }
  0x4e   : > { %424 = sbr.rel (!%p2746_p6) target bundleno = 88 (0x58), region = 56  ;;  %s2053_s25 = sshll.u32 (%p2746_p6), %s2812_s7, 5 }
  0x4f   : > { %s2054_s29 = sshll.u32 (%p2746_p6), %s2580_s13, 4  ;;  %s428_s20 = scalar_lea.vmem (%p2746_p6), [#allocation9], %s2053_s25 }
  0x50   : > { %s430_s10 = sadd.s32 (%p2746_p6), %s2576_s30, %s2054_s29 }
  0x51   : > { %s2055_s9 = sshll.u32 (%p2746_p6), %s430_s10, 3 }
  0x52   : > { %s432_s19 = scalar_lea.vmem (%p2746_p6), %s3233_s1, %s2055_s9 }
  0x53   : > { %v466_v0 = vld [vmem:[%s432_s19] sm:$0xff] (%p2746_p6) }
  0x54   : > { %v468_v1 = vld [vmem:[%s432_s19 + $0x20] sm:$0xff] (%p2746_p6)  ;;  %467 = vst [vmem:[%s428_s20] sm:$0xff] (%p2746_p6), %v466_v0 }
  0x55   : > { %v470_v2 = vld [vmem:[%s432_s19 + $0x40] sm:$0xff]  ;;  %469 = vst [vmem:[%s428_s20 + $0x8] sm:$0xff] %v468_v1 }
  0x56   : > { %471 = vst [vmem:[%s428_s20 + $0x10] sm:$0xff] %v470_v2  ;;  %v472_v3 = vld [vmem:[%s432_s19 + $0x60] sm:$0xff] }
  0x57   : > { %473 = vst [vmem:[%s428_s20 + $0x18] sm:$0xff] %v472_v3 }
  0x58 PF: > { %p3282_p6 = scmp.ne.s32.totalorder %s3277_s4, 0 }
  0x59   : > { %s481_s5 = sand.u32 (%p3282_p6), 1, %s2544_s22   ;;  %s2057_s16 = sshll.u32 (%p3282_p6), %s2580_s13, 4 }
  0x5a   : > { %479 = sbr.rel (!%p3282_p6) target bundleno = 99 (0x63), region = 94  ;;  %s2056_s17 = sshll.u32 (%p3282_p6), %s481_s5, 5 }
  0x5b   : > { %s487_s7 = sadd.s32 (%p3282_p6), %s2057_s16, %s2768_s28  ;;  %s483_s10 = scalar_lea.vmem (%p3282_p6), [#allocation10], %s2056_s17 }
  0x5c   : > { %s2058_s18 = sshll.u32 (%p3282_p6), %s487_s7, 3 }
  0x5d   : > { %s489_s25 = scalar_lea.vmem (%p3282_p6), %s3234_s2, %s2058_s18 }
  0x5e   : > { %v523_v4 = vld [vmem:[%s489_s25] sm:$0xff] (%p3282_p6) }
  0x5f   : > { %v525_v5 = vld [vmem:[%s489_s25 + $0x20] sm:$0xff] (%p3282_p6)  ;;  %524 = vst [vmem:[%s483_s10] sm:$0xff] (%p3282_p6), %v523_v4 }
  0x60   : > { %v527_v6 = vld [vmem:[%s489_s25 + $0x40] sm:$0xff] (%p3282_p6)  ;;  %526 = vst [vmem:[%s483_s10 + $0x8] sm:$0xff] (%p3282_p6), %v525_v5 }
  0x61   : > { %528 = vst [vmem:[%s483_s10 + $0x10] sm:$0xff] %v527_v6  ;;  %v529_v7 = vld [vmem:[%s489_s25 + $0x60] sm:$0xff] }
  0x62   : > { %530 = vst [vmem:[%s483_s10 + $0x18] sm:$0xff] %v529_v7 }
  0x63 PF: > { %p3283_p8 = scmp.ne.s32.totalorder %s3277_s4, 0 }
  0x64   : > { %s538_s9 = sand.u32 (%p3283_p8), 1, %s2544_s22   ;;  %s2060_s27 = sshll.u32 (%p3283_p8), %s2580_s13, 4 }
  0x65   : > { %536 = sbr.rel (!%p3283_p8) target bundleno = 110 (0x6e), region = 132  ;;  %s2059_s12 = sshll.u32 (%p3283_p8), %s538_s9, 5 }
  0x66   : > { %s544_s19 = sadd.s32 (%p3283_p8), %s2060_s27, %s2768_s28  ;;  %s540_s7 = scalar_lea.vmem (%p3283_p8), [#allocation11], %s2059_s12 }
  0x67   : > { %s2061_s20 = sshll.u32 (%p3283_p8), %s544_s19, 3 }
  0x68   : > { %s546_s17 = scalar_lea.vmem (%p3283_p8), %s3235_s3, %s2061_s20 }
  0x69   : > { %v580_v8 = vld [vmem:[%s546_s17] sm:$0xff] (%p3283_p8) }
  0x6a   : > { %v582_v9 = vld [vmem:[%s546_s17 + $0x20] sm:$0xff] (%p3283_p8)  ;;  %581 = vst [vmem:[%s540_s7] sm:$0xff] (%p3283_p8), %v580_v8 }
  0x6b   : > { %v584_v10 = vld [vmem:[%s546_s17 + $0x40] sm:$0xff] (%p3283_p8)  ;;  %583 = vst [vmem:[%s540_s7 + $0x8] sm:$0xff] (%p3283_p8), %v582_v9 }
  0x6c   : > { %585 = vst [vmem:[%s540_s7 + $0x10] sm:$0xff] %v584_v10  ;;  %v586_v11 = vld [vmem:[%s546_s17 + $0x60] sm:$0xff] }
  0x6d   : > { %587 = vst [vmem:[%s540_s7 + $0x18] sm:$0xff] %v586_v11 }
  0x6e PF: > { %p2062_p0 = scmp.ge.s32.totalorder %s2584_s14, 1  ;;  %p592_p7 = scmp.lt.s32.totalorder %s2584_s14, 33 }
  0x70   : > { %p593_p9 = pnand %p2062_p0, %p592_p7 }
  0x71   : > { %s2867_s4 = sand.u32 (!%p593_p9), 1, %s2552_s24   ;;  %p3284_p3 = scmp.ne.s32.totalorder (!%p593_p9), %s3273_s15, 0 }
  0x72   : > { %596 = sbr.rel (%p593_p9) target bundleno = 2166 (0x876), region = 170  ;;  %s2063_s28 = sshll.u32 (!%p593_p9), %s2867_s4, 3 }
  0x73   : > { %s599_s18 = scalar_lea.sflag (!%p593_p9), [#allocation7], %s2867_s4  ;;  %s2871_s8 = scalar_lea.vmem (!%p593_p9), [#allocation6], %s2063_s28 }
  0x79   : > { %2531 = dma.done.wait (%p3284_p3), %s599_s18, 128  }
  0x7a   : > { %2533 = vsyncadd (%p3284_p3), %s599_s18, 4294967168  ;;  %s2064_s29 = sshll.u32 %s2867_s4, 5  ;;  %s615_s25 = sand.u32 1, %s2540_s21  }
  0x7b   : > { %s2065_s10 = sshll.u32 %s615_s25, 5  ;;  %s2879_s9 = scalar_lea.vmem [#allocation9], %s2064_s29 }
  0x7c   : > { %s2881_s27 = scalar_lea.vmem [#allocation10], %s2065_s10  ;;  %s2883_s12 = scalar_lea.vmem [#allocation11], %s2065_s10 }
  0x7d   : > { %s2885_s19 = scalar_lea.vmem [#allocation12], %s2063_s28  ;;  %p2068_p12 = scmp.ne.s32.totalorder %s2560_s26, 0 }
  0x7e   : > { %vm684_vm0 = vcmask (!%p2068_p12), 7168   ;;  %vm693_vm1 = vcmask (!%p2068_p12), 130048   ;;  %v2587_v12 = vmov (!%p2068_p12), -inf   ;;  %v2588_v13 = vmov (!%p2068_p12), 0.0  }
  0x7f   : > { %683 = sbr.rel (%p2068_p12) target bundleno = 134 (0x86), region = 190  ;;  %685 = vst.msk [vmem:[#allocation2] sm:$0xff] (!%p2068_p12), %vm684_vm0, %v2587_v12  ;;  %686 = vst.msk [vmem:[#allocation2 + $0x8] sm:$0xff] (!%p2068_p12), %vm684_vm0, %v2587_v12 }
  0x80   : > { %687 = vst.msk [vmem:[#allocation2 + $0x10] sm:$0xff] (!%p2068_p12), %vm684_vm0, %v2587_v12  ;;  %688 = vst.msk [vmem:[#allocation2 + $0x18] sm:$0xff] (!%p2068_p12), %vm684_vm0, %v2587_v12 }
  0x81   : > { %689 = vst.msk [vmem:[#allocation3] sm:$0xff] (!%p2068_p12), %vm684_vm0, %v2588_v13  ;;  %690 = vst.msk [vmem:[#allocation3 + $0x8] sm:$0xff] (!%p2068_p12), %vm684_vm0, %v2588_v13 }
  0x82   : > { %691 = vst.msk [vmem:[#allocation3 + $0x10] sm:$0xff] (!%p2068_p12), %vm684_vm0, %v2588_v13  ;;  %692 = vst.msk [vmem:[#allocation3 + $0x18] sm:$0xff] (!%p2068_p12), %vm684_vm0, %v2588_v13 }
  0x83   : > { %694 = vst.msk [vmem:[#allocation4] sm:$0xff] (!%p2068_p12), %vm693_vm1, %v2588_v13  ;;  %695 = vst.msk [vmem:[#allocation4 + $0x8] sm:$0xff] (!%p2068_p12), %vm693_vm1, %v2588_v13 }
  0x84   : > { %696 = vst.msk [vmem:[#allocation4 + $0x10] sm:$0xff] (!%p2068_p12), %vm693_vm1, %v2588_v13  ;;  %697 = vst.msk [vmem:[#allocation4 + $0x18] sm:$0xff] (!%p2068_p12), %vm693_vm1, %v2588_v13 }
  0x86 PF: > { %s3285_s21 = sld [smem:[#allocation16_spill]] }
  0x8c   : > { %p2069_p13 = scmp.gt.s32.totalorder %s2560_s26, %s3285_s21 }
  0x8d   : > { %v706_v14 = vld [vmem:[%s2881_s27] sm:$0xff] (!%p2069_p13)  ;;  %vm714_vm2 = vcmask (!%p2069_p13), 130048   ;;  %v707_v15 = vld [vmem:[%s2881_s27 + $0x8] sm:$0xff] (!%p2069_p13)  ;;  %v2589_v16 = vmov (!%p2069_p13), 0.0   ;;  %vm2590_vm3 = vmmov (!%p2069_p13), 0   ;;  %v708_v19 = vld [vmem:[%s2881_s27 + $0x10] sm:$0xff] (!%p2069_p13)  ;;  %v1024_v23 = vlaneseq (!%p2069_p13) }
  0x8e   : > { %701 = sbr.rel (%p2069_p13) target bundleno = 876 (0x36c), region = 194  ;;  %2156 = vmatprep.subr.mxu0 (!%p2069_p13), %v2589_v16  ;;  %2158 = vmatprep.mubr.msk.f32.mxu0 (!%p2069_p13), %vm2590_vm3, %v2589_v16  ;;  %v702_v17 = vld [vmem:[%s2879_s9] sm:$0xff] (!%p2069_p13)  ;;  %v703_v18 = vld [vmem:[%s2879_s9 + $0x8] sm:$0xff] (!%p2069_p13)  ;;  %v709_v20 = vld [vmem:[%s2881_s27 + $0x18] sm:$0xff] (!%p2069_p13)  ;;  %s3286_s15 = sld [smem:[#allocation16_spill]] (!%p2069_p13)  ;;  %vm1044_vm5 = vcmask (!%p2069_p13), 64512  }
  0x8f   : > { %2157 = vmatpush3.xpose.msk.msra.mxu0 (!%p2069_p13), %vm714_vm2, %v706_v14  ;;  %2161 = vmatprep.subr.mxu1 (!%p2069_p13), %v2589_v16  ;;  %v704_v21 = vld [vmem:[%s2879_s9 + $0x10] sm:$0xff] (!%p2069_p13)  ;;  %v705_v22 = vld [vmem:[%s2879_s9 + $0x18] sm:$0xff] (!%p2069_p13)  ;;  %s2079_s5 = sshll.u32 (!%p2069_p13), %s2560_s26, 3  ;;  %v1025_v24 = vshrl.u32 (!%p2069_p13), %v1024_v23, 7  ;;  %v1030_v25 = vand.u32 (!%p2069_p13), 127, %v1024_v23  ;;  %v2591_v50 = vmov (!%p2069_p13), 0  }
  0x90   : > { %2162 = vmatpush3.xpose.msk.msra.mxu1 (!%p2069_p13), %vm714_vm2, %v707_v15  ;;  %2163 = vmatprep.mubr.msk.f32.mxu1 (!%p2069_p13), %vm2590_vm3, %v2589_v16  ;;  %v1031_v27 = vstv (!%p2069_p13), %s2079_s5  ;;  %v1040_v51 = vld [vmem:[#allocation2] sm:$0xff] (!%p2069_p13)  ;;  %vm1129_vm6 = vcmask (!%p2069_p13), 7168   ;;  %v2934_v54 = vld [vmem:[#allocation2 + $0x8] sm:$0xff] (!%p2069_p13)  ;;  %v1042_v55 = vld [vmem:[#allocation2 + $0x10] sm:$0xff] (!%p2069_p13) }
  0x91   : > { %2166 = vmatprep.subr.mxu0 (!%p2069_p13), %v2589_v16  ;;  %2171 = vmatprep.subr.mxu1 (!%p2069_p13), %v2589_v16  ;;  %v1032_v29 = vadd.s32 (!%p2069_p13), %v1031_v27, %v1030_v25  ;;  %v2938_v62 = vld [vmem:[#allocation2 + $0x18] sm:$0xff] (!%p2069_p13)  ;;  %v711_v6 = vld [vmem:[%s2883_s12 + $0x8] sm:$0xff] (!%p2069_p13)  ;;  %v713_v23 = vld [vmem:[%s2883_s12 + $0x18] sm:$0xff] (!%p2069_p13) }
  0x92   : > { %2159 = vmatmul.mubr.msk.f32.vlgmr.msra.gmra.mrb[0].mxu0 (!%p2069_p13), %vm714_vm2, %v702_v17  ;;  %2392 = vset.pattern.permute.xlu0 (!%p2069_p13), %v2591_v50  ;;  %v710_v4 = vld [vmem:[%s2883_s12] sm:$0xff] (!%p2069_p13) }
  0x93   : > { %2164 = vmatmul.mubr.msk.f32.vlgmr.msra.gmra.mrb[0].mxu1 (!%p2069_p13), %vm714_vm2, %v703_v18  ;;  %2167 = vmatpush3.xpose.msk.msra.mxu0 (!%p2069_p13), %vm714_vm2, %v708_v19  ;;  %v712_v19 = vld [vmem:[%s2883_s12 + $0x10] sm:$0xff] (!%p2069_p13) }
  0x94   : > { %2168 = vmatprep.mubr.msk.f32.mxu0 (!%p2069_p13), %vm2590_vm3, %v2589_v16  ;;  %2172 = vmatpush3.xpose.msk.msra.mxu1 (!%p2069_p13), %vm714_vm2, %v709_v20  ;;  %s2078_s20 = sshll.u32 (!%p2069_p13), %s3286_s15, 3 }
  0x95   : > { %2173 = vmatprep.mubr.msk.f32.mxu1 %vm2590_vm3, %v2589_v16  ;;  %2176 = vmatprep.subr.mxu0 %v2589_v16  ;;  %v1026_v26 = vstv %s2078_s20 }
  0x96   : > { %2169 = vmatmul.mubr.msk.f32.vlgmr.msra.gmra.mrb[2].mxu0 %vm714_vm2, %v704_v21  ;;  %2181 = vmatprep.subr.mxu1 %v2589_v16  ;;  %v1027_v28 = vadd.s32 %v1026_v26, %v1025_v24 }
  0x97   : > { %2174 = vmatmul.mubr.msk.f32.vlgmr.msra.gmra.mrb[2].mxu1 %vm714_vm2, %v705_v22  ;;  %2178 = vmatprep.mubr.msk.f32.mxu0 %vm2590_vm3, %v2589_v16 }
  0x98   : > { %2183 = vmatprep.mubr.msk.f32.mxu1 %vm2590_vm3, %v2589_v16  ;;  %vm1033_vm4 = vcmp.le.s32.totalorder %v1032_v29, %v1027_v28  ;;  %2393 = vset.pattern.permute.xlu1 %v2591_v50 }
  0x99   : > { %2177 = vmatpush3.msra.mxu0 %v710_v4  ;;  %2182 = vmatpush3.msra.mxu1 %v711_v6 }
  0x9a   : > { %2186 = vmatprep.subr.mxu0 %v2589_v16  ;;  %2191 = vmatprep.subr.mxu1 %v2589_v16 }
 0x165   : > { %v787_v30 = vpop.f32.mrb[0].mxu0 }
 0x166   : > { %v1019_v31 = vmul.f32 0.25, %v787_v30  ;;  %v2160_v32 = vpop.f32.mrb[1].mxu0  ;;  %v863_v33 = vpop.f32.mrb[0].mxu1 }
 0x167   : > { %v1020_v34 = vmul.f32 0.25, %v863_v33  ;;  %v2165_v35 = vpop.f32.mrb[1].mxu1 }
 0x168   : > { %v1036_v36 = vsel %vm1033_vm4, %v1019_v31, -inf }
 0x169   : > { %v1045_v37 = vsel %vm1044_vm5, %v1036_v36, -inf  ;;  %v939_v38 = vpop.f32.mrb[2].mxu0  ;;  %v1037_v39 = vsel %vm1033_vm4, %v1020_v34, -inf }
 0x16a   : > { %1046 = vmax.xlane.f32.xlu0 %v1045_v37  ;;  %v1021_v40 = vmul.f32 0.25, %v939_v38  ;;  %v2170_v41 = vpop.f32.mrb[3].mxu0  ;;  %v1015_v42 = vpop.f32.mrb[2].mxu1  ;;  %v1048_v43 = vsel %vm1044_vm5, %v1037_v39, -inf }
 0x16b   : > { %v1022_v44 = vmul.f32 0.25, %v1015_v42  ;;  %v2175_v45 = vpop.f32.mrb[3].mxu1 }
 0x16c   : > { %v1038_v46 = vsel %vm1033_vm4, %v1021_v40, -inf  ;;  %v1107_v45 = vld [vmem:[#allocation3 + $0x10] sm:$0xff] }
 0x16d   : > { %v1051_v47 = vsel %vm1044_vm5, %v1038_v46, -inf  ;;  %v1039_v48 = vsel %vm1033_vm4, %v1022_v44, -inf }
 0x16e   : > { %1049 = vmax.xlane.f32.xlu0 %v1048_v43  ;;  %1052 = vmax.xlane.f32.xlu1 %v1051_v47  ;;  %v1054_v49 = vsel %vm1044_vm5, %v1039_v48, -inf }
 0x172   : > { %1055 = vmax.xlane.f32.xlu1 %v1054_v49 }
 0x1f7   : > { %v1047_v52 = vpop.xlane.xlu0 %1046 }
 0x1f8   : > { %v1057_v53 = vmax.f32 %v1040_v51, %v1047_v52 }
 0x1fa   : > { %v1061_v56 = vsub.f32 %v1040_v51, %v1057_v53  ;;  %1462 = vst.msk [vmem:[#allocation2] sm:$0xff] %vm1129_vm6, %v1057_v53  ;;  %1075 = vperm.xlu0 %2392, %v1057_v53   ;;  %v1134_v53 = vld [vmem:[#allocation4] sm:$0xff] }
 0x1fb   : > { %v1050_v57 = vpop.xlane.xlu0 %1049  ;;  %v1053_v58 = vpop.xlane.xlu1 %1052 }
 0x1fc   : > { %v1065_v59 = vmul.f32 1.442695, %v1061_v56  ;;  %v1058_v60 = vmax.f32 %v2934_v54, %v1050_v57  ;;  %v1059_v61 = vmax.f32 %v1042_v55, %v1053_v58 }
 0x1fe   : > { %2394 = vpow2.f32 %v1065_v59  ;;  %v1062_v63 = vsub.f32 %v2934_v54, %v1058_v60  ;;  %1463 = vst.msk [vmem:[#allocation2 + $0x8] sm:$0xff] %vm1129_vm6, %v1058_v60  ;;  %1080 = vperm.xlu1 %2393, %v1058_v60   ;;  %v1063_v0 = vsub.f32 %v1042_v55, %v1059_v61  ;;  %1464 = vst.msk [vmem:[#allocation2 + $0x10] sm:$0xff] %vm1129_vm6, %v1059_v61  ;;  %v1135_v55 = vld [vmem:[#allocation4 + $0x8] sm:$0xff] }
 0x1ff   : > { %v1056_v1 = vpop.xlane.xlu1 %1055 }
 0x200   : > { %v1060_v2 = vmax.f32 %v2938_v62, %v1056_v1  ;;  %v1069_v25 = vmul.f32 1.442695, %v1063_v0  ;;  %v1067_v29 = vmul.f32 1.442695, %v1062_v63 }
 0x202   : > { %1085 = vperm.xlu1 %2393, %v1059_v61   ;;  %v1064_v3 = vsub.f32 %v2938_v62, %v1060_v2  ;;  %1465 = vst.msk [vmem:[#allocation2 + $0x18] sm:$0xff] %vm1129_vm6, %v1060_v2  ;;  %v1136_v61 = vld [vmem:[#allocation4 + $0x10] sm:$0xff] }
 0x206   : > { %1090 = vperm.xlu1 %2393, %v1060_v2   ;;  %v1137_v2 = vld [vmem:[#allocation4 + $0x18] sm:$0xff] }
 0x208   : > { %v2395_v5 = vpop.eup %2394 }
 0x20a   : > { %1140 = vperm.xlu1 %2393, %v2395_v5  }
 0x279   : > { %v1076_v7 = vpop.permute.xlu0 %1075 }
 0x27a   : > { %v1093_v8 = vsub.f32 %v1036_v36, %v1076_v7  ;;  %v1105_v36 = vld [vmem:[#allocation3] sm:$0xff] }
 0x27b   : > { %v1109_v37 = vmul.f32 %v2395_v5, %v1105_v36 }
 0x27c   : > { %v1097_v9 = vmul.f32 1.442695, %v1093_v8 }
 0x27d   : > { %v1081_v10 = vpop.permute.xlu1 %1080 }
 0x27e   : > { %2396 = vpow2.f32 %v1097_v9  ;;  %v1094_v11 = vsub.f32 %v1037_v39, %v1081_v10  ;;  %v1106_v39 = vld [vmem:[#allocation3 + $0x8] sm:$0xff] }
 0x280   : > { %v1099_v12 = vmul.f32 1.442695, %v1094_v11 }
 0x281   : > { %v1086_v13 = vpop.permute.xlu1 %1085 }
 0x282   : > { %2398 = vpow2.f32 %v1099_v12  ;;  %v1095_v14 = vsub.f32 %v1038_v46, %v1086_v13 }
 0x284   : > { %v1101_v15 = vmul.f32 1.442695, %v1095_v14 }
 0x285   : > { %v1091_v17 = vpop.permute.xlu1 %1090 }
 0x286   : > { %2400 = vpow2.f32 %v1101_v15  ;;  %v1096_v18 = vsub.f32 %v1039_v48, %v1091_v17  ;;  %v1108_v48 = vld [vmem:[#allocation3 + $0x18] sm:$0xff] }
 0x288   : > { %v2397_v20 = vpop.eup %2396  ;;  %v1103_v21 = vmul.f32 1.442695, %v1096_v18 }
 0x289   : > { %2179 = vmatmul.mubr.msk.f32.vlgmr.msra.gmra.mrb[4].mxu0 %vm1044_vm5, %v2397_v20  ;;  %v1113_v22 = vsel %vm1044_vm5, %v2397_v20, 0.0  ;;  %v1141_v35 = vpop.permute.xlu1 %1140 }
 0x28a   : > { %2402 = vpow2.f32 %v1103_v21  ;;  %1114 = vadd.xlane.f32.xlu1 %v1113_v22  ;;  %2187 = vmatpush3.msra.mxu0 %v712_v19  ;;  %v1158_v54 = vmul.f32 %v1141_v35, %v1134_v53 }
 0x28b   : > { %2188 = vmatprep.mubr.msk.f32.mxu0 %vm2590_vm3, %v2589_v16  ;;  %2404 = vpow2.f32 %v1069_v25 }
 0x28c   : > { %v2399_v24 = vpop.eup %2398  ;;  %2406 = vpow2.f32 %v1067_v29 }
 0x28d   : > { %2184 = vmatmul.mubr.msk.f32.vlgmr.msra.gmra.mrb[4].mxu1 %vm1044_vm5, %v2399_v24  ;;  %v1116_v26 = vsel %vm1044_vm5, %v2399_v24, 0.0 }
 0x28e   : > { %1117 = vadd.xlane.f32.xlu0 %v1116_v26  ;;  %2192 = vmatpush3.msra.mxu1 %v713_v23 }
 0x28f   : > { %2193 = vmatprep.mubr.msk.f32.mxu1 %vm2590_vm3, %v2589_v16  ;;  %v1071_v16 = vmul.f32 1.442695, %v1064_v3 }
 0x290   : > { %v2401_v27 = vpop.eup %2400 }
 0x291   : > { %2189 = vmatmul.mubr.msk.f32.vlgmr.msra.gmra.mrb[6].mxu0 %vm1044_vm5, %v2401_v27  ;;  %v1119_v32 = vsel %vm1044_vm5, %v2401_v27, 0.0  ;;  %2408 = vpow2.f32 %v1071_v16 }
 0x294   : > { %v2403_v28 = vpop.eup %2402 }
 0x295   : > { %2194 = vmatmul.mubr.msk.f32.vlgmr.msra.gmra.mrb[6].mxu1 %vm1044_vm5, %v2403_v28  ;;  %v2405_v30 = vpop.eup %2404  ;;  %v1122_v33 = vsel %vm1044_vm5, %v2403_v28, 0.0 }
 0x296   : > { %v2407_v31 = vpop.eup %2406  ;;  %v1111_v46 = vmul.f32 %v2405_v30, %v1107_v45 }
 0x297   : > { %v1110_v41 = vmul.f32 %v2407_v31, %v1106_v39 }
 0x29b   : > { %1150 = vperm.xlu1 %2393, %v2405_v30   ;;  %v2409_v34 = vpop.eup %2408 }
 0x29c   : > { %v1112_v50 = vmul.f32 %v2409_v34, %v1108_v48 }
 0x2a4   : > { %1145 = vperm.xlu0 %2392, %v2407_v31  }
 0x2bf   : > { %1120 = vadd.xlane.f32.xlu1 %v1119_v32 }
 0x2c3   : > { %1123 = vadd.xlane.f32.xlu1 %v1122_v33 }
 0x2d4   : > { %1155 = vperm.xlu1 %2393, %v2409_v34  }
 0x317   : > { %v1115_v38 = vpop.xlane.xlu1 %1114 }
 0x318   : > { %v1125_v40 = vadd.f32 %v1115_v38, %v1109_v37 }
 0x31a   : > { %1130 = vst.msk [vmem:[#allocation3] sm:$0xff] %vm1129_vm6, %v1125_v40 }
 0x31b   : > { %v1118_v42 = vpop.xlane.xlu0 %1117  ;;  %v1151_v44 = vpop.permute.xlu1 %1150 }
 0x31c   : > { %v1126_v43 = vadd.f32 %v1118_v42, %v1110_v41  ;;  %v1160_v1 = vmul.f32 %v1151_v44, %v1136_v61 }
 0x31e   : > { %1131 = vst.msk [vmem:[#allocation3 + $0x8] sm:$0xff] %vm1129_vm6, %v1126_v43 }
 0x323   : > { %v1146_v56 = vpop.permute.xlu0 %1145 }
 0x324   : > { %v1159_v60 = vmul.f32 %v1146_v56, %v1135_v55 }
 0x34c   : > { %v1121_v47 = vpop.xlane.xlu1 %1120 }
 0x34d   : > { %v1127_v49 = vadd.f32 %v1121_v47, %v1111_v46 }
 0x34f   : > { %1132 = vst.msk [vmem:[#allocation3 + $0x10] sm:$0xff] %vm1129_vm6, %v1127_v49 }
 0x350   : > { %v1124_v51 = vpop.xlane.xlu1 %1123 }
 0x351   : > { %v1128_v52 = vadd.f32 %v1124_v51, %v1112_v50 }
 0x353   : > { %1133 = vst.msk [vmem:[#allocation3 + $0x18] sm:$0xff] %vm1129_vm6, %v1128_v52 }
 0x354   : > { %v1156_v3 = vpop.permute.xlu1 %1155 }
 0x355   : > { %v1161_v7 = vmul.f32 %v1156_v3, %v1137_v2 }
 0x35c   : > { %v1231_v57 = vpop.f32.mrb[4].mxu0 }
 0x35d   : > { %v1454_v58 = vadd.f32 %v1231_v57, %v1158_v54  ;;  %v2180_v59 = vpop.f32.mrb[5].mxu0 }
 0x35f   : > { %1458 = vst.msk [vmem:[#allocation4] sm:$0xff] %vm714_vm2, %v1454_v58 }
 0x360   : > { %v1304_v62 = vpop.f32.mrb[4].mxu1 }
 0x361   : > { %v1455_v63 = vadd.f32 %v1304_v62, %v1159_v60  ;;  %v2185_v0 = vpop.f32.mrb[5].mxu1 }
 0x363   : > { %1459 = vst.msk [vmem:[#allocation4 + $0x8] sm:$0xff] %vm714_vm2, %v1455_v63 }
 0x364   : > { %v1377_v4 = vpop.f32.mrb[6].mxu0 }
 0x365   : > { %v1456_v5 = vadd.f32 %v1377_v4, %v1160_v1  ;;  %v2190_v6 = vpop.f32.mrb[7].mxu0 }
 0x367   : > { %1460 = vst.msk [vmem:[#allocation4 + $0x10] sm:$0xff] %vm714_vm2, %v1456_v5 }
 0x368   : > { %v1450_v8 = vpop.f32.mrb[6].mxu1 }
 0x369   : > { %v1457_v9 = vadd.f32 %v1450_v8, %v1161_v7  ;;  %v2195_v10 = vpop.f32.mrb[7].mxu1 }
 0x36b   : > { %1461 = vst.msk [vmem:[#allocation4 + $0x18] sm:$0xff] %vm714_vm2, %v1457_v9 }
 0x36c PF: > { %p2084_p4 = scmp.ne.s32.totalorder %s2560_s26, 3 }
 0x36d   : > { %v1471_v11 = vld [vmem:[#allocation3 + $0x8] sm:$0xff] (!%p2084_p4)  ;;  %v1473_v12 = vld [vmem:[#allocation3 + $0x18] sm:$0xff] (!%p2084_p4)  ;;  %v1472_v13 = vld [vmem:[#allocation3 + $0x10] sm:$0xff] (!%p2084_p4)  ;;  %v2592_v14 = vmov (!%p2084_p4), 0   ;;  %s3287_s17 = sld [smem:[#allocation24_spill]] (!%p2084_p4)  ;;  %v2593_v23 = vmov (!%p2084_p4), 0.0|0.0  }
 0x36e   : > { %1469 = sbr.rel (%p2084_p4) target bundleno = 2137 (0x859), region = 198  ;;  %2410 = vset.pattern.permute.xlu0 (!%p2084_p4), %v2592_v14  ;;  %2411 = vset.pattern.permute.xlu1 (!%p2084_p4), %v2592_v14  ;;  %2412 = vrcp.f32 (!%p2084_p4), %v1471_v11  ;;  %v1470_v15 = vld [vmem:[#allocation3] sm:$0xff] (!%p2084_p4)  ;;  %vm2594_vm7 = vmmov (!%p2084_p4), 0   ;;  %v2595_v16 = vmov (!%p2084_p4), 0.0   ;;  %v1479_v34 = vld [vmem:[#allocation4 + $0x8] sm:$0xff] (!%p2084_p4)  ;;  %v1480_v39 = vld [vmem:[#allocation4 + $0x10] sm:$0xff] (!%p2084_p4) }
 0x36f   : > { %2414 = vrcp.f32 (!%p2084_p4), %v1473_v12  ;;  %2215 = vmatprep.subr.bf16.mxu1 (!%p2084_p4), %v2593_v23  ;;  %2212 = vmatprep.mubr.msk.f32.mxu1 (!%p2084_p4), %vm2594_vm7, %v2595_v16  ;;  %s2596_s16 = smov (!%p2084_p4), 16   ;;  %v1478_v41 = vld [vmem:[#allocation4] sm:$0xff] (!%p2084_p4)  ;;  %vm1506_vm8 = vcmask (!%p2084_p4), 130048   ;;  %s2597_s7 = smov (!%p2084_p4), 32   ;;  %vm1512_vm9 = vcmask (!%p2084_p4), 261248   ;;  %vm1518_vm10 = vcmask (!%p2084_p4), 392448  }
 0x370   : > { %2416 = vrcp.f32 (!%p2084_p4), %v1472_v13  ;;  %s2598_s28 = smov (!%p2084_p4), 48   ;;  %vm1524_vm11 = vcmask (!%p2084_p4), 523648   ;;  %vm1542_vm12 = vcmask (!%p2084_p4), 523264   ;;  %s3288_s25 = sld [smem:[#allocation25_spill]] (!%p2084_p4)  ;;  %v1616_v52 = vld [vmem:[%s2871_s8] sm:$0xff] (!%p2084_p4) }
 0x371   : > { %2418 = vrcp.f32 (!%p2084_p4), %v1470_v15  ;;  %s3289_s27 = sld [smem:[#allocation28_spill]] (!%p2084_p4)  ;;  %s3291_s8 = sld [smem:[#allocation30_spill]] (!%p2084_p4) }
 0x372   : > { %v1481_v36 = vld [vmem:[#allocation4 + $0x18] sm:$0xff] (!%p2084_p4)  ;;  %s3294_s20 = sld [smem:[#allocation29_spill]] (!%p2084_p4) }
 0x373   : > { %v1526_v21 = vld [vmem:[%s3287_s17] sm:$0xff] (!%p2084_p4)  ;;  %v1527_v22 = vld [vmem:[%s3287_s17 + $0x8] sm:$0xff] (!%p2084_p4)  ;;  %v1528_v25 = vld [vmem:[%s3287_s17 + $0x10] sm:$0xff] (!%p2084_p4) }
 0x374   : > { %v2216_v24 = vpack.c.bf16 (!%p2084_p4), %v1527_v22, %v1526_v21  ;;  %v1529_v26 = vld [vmem:[%s3287_s17 + $0x18] sm:$0xff] (!%p2084_p4)  ;;  %v1530_v28 = vld [vmem:[%s3287_s17 + $0x20] sm:$0xff] (!%p2084_p4)  ;;  %v1531_v29 = vld [vmem:[%s3287_s17 + $0x28] sm:$0xff] (!%p2084_p4) }
 0x375   : > { %v2219_v27 = vpack.c.bf16 %v1529_v26, %v1528_v25  ;;  %v2222_v30 = vpack.c.bf16 %v1531_v29, %v1530_v28  ;;  %v1532_v31 = vld [vmem:[%s3287_s17 + $0x30] sm:$0xff]  ;;  %v1533_v32 = vld [vmem:[%s3287_s17 + $0x38] sm:$0xff] }
 0x376   : > { %2217 = vmatpush3.bf16.msra.mxu1 %v2216_v24  ;;  %v2225_v33 = vpack.c.bf16 %v1533_v32, %v1532_v31  ;;  %v2085_v50 = vld [vmem:[%s3288_s25] ss:$0 sm:$0xff]  ;;  %s3292_s25 = sld [smem:[#allocation26_spill]] }
 0x377   : > { %2218 = vmatprep.subr.bf16.mxu1 %v2593_v23  ;;  %s3290_s12 = smov %s3289_s27  ;;  %v1649_v62 = vld [vmem:[%s3289_s27 + $0x8] sm:$0xff]  ;;  %v1768_v25 = vld [vmem:[%s3291_s8] sm:$0xff]  ;;  %s3293_s27 = sld [smem:[#allocation27_spill]] }
 0x378   : > { %v2413_v17 = vpop.eup %2412  ;;  %v1651_v63 = vld [vmem:[%s3290_s12 + $0x18] sm:$0xff]  ;;  %v1648_v1 = vld [vmem:[%s3290_s12] sm:$0xff]  ;;  %v1650_v2 = vld [vmem:[%s3290_s12 + $0x10] sm:$0xff] }
 0x379   : > { %v2415_v18 = vpop.eup %2414  ;;  %1489 = vperm.xlu0 %2410, %v2413_v17   ;;  %v2227_v0 = vpack.c.bf16 %v1651_v63, %v1649_v62  ;;  %v2229_v3 = vpack.c.bf16 %v1650_v2, %v1648_v1  ;;  %v1653_v4 = vld [vmem:[%s3290_s12 + $0x28] sm:$0xff]  ;;  %v1655_v5 = vld [vmem:[%s3290_s12 + $0x38] sm:$0xff]  ;;  %v1652_v7 = vld [vmem:[%s3290_s12 + $0x20] sm:$0xff] }
 0x37a   : > { %v2417_v19 = vpop.eup %2416  ;;  %1499 = vperm.xlu1 %2411, %v2415_v18   ;;  %2220 = vmatpush3.bf16.msra.mxu1 %v2219_v27  ;;  %v2231_v6 = vpack.c.bf16 %v1655_v5, %v1653_v4  ;;  %v1654_v8 = vld [vmem:[%s3290_s12 + $0x30] sm:$0xff]  ;;  %v1657_v10 = vld [vmem:[%s3290_s12 + $0x48] sm:$0xff]  ;;  %v1659_v11 = vld [vmem:[%s3290_s12 + $0x58] sm:$0xff] }
 0x37b   : > { %v2419_v20 = vpop.eup %2418  ;;  %2221 = vmatprep.subr.bf16.mxu1 %v2593_v23  ;;  %v2233_v9 = vpack.c.bf16 %v1654_v8, %v1652_v7  ;;  %v2235_v12 = vpack.c.bf16 %v1659_v11, %v1657_v10  ;;  %v1656_v13 = vld [vmem:[%s3290_s12 + $0x40] sm:$0xff]  ;;  %v1658_v14 = vld [vmem:[%s3290_s12 + $0x50] sm:$0xff]  ;;  %v1661_v17 = vld [vmem:[%s3290_s12 + $0x68] sm:$0xff] }
 0x37c   : > { %v2237_v15 = vpack.c.bf16 %v1658_v14, %v1656_v13  ;;  %v1663_v18 = vld [vmem:[%s3290_s12 + $0x78] sm:$0xff]  ;;  %v1662_v21 = vld [vmem:[%s3290_s12 + $0x70] sm:$0xff]  ;;  %v1785_v24 = vld [vmem:[%s3291_s8 + $0x88] sm:$0xff] }
 0x37d   : > { %1494 = vperm.xlu0 %2410, %v2417_v19   ;;  %v2239_v19 = vpack.c.bf16 %v1663_v18, %v1661_v17  ;;  %v1769_v27 = vld [vmem:[%s3291_s8 + $0x8] sm:$0xff]  ;;  %v1779_v1 = vld [vmem:[%s3291_s8 + $0x58] sm:$0xff]  ;;  %v1796_v2 = vld [vmem:[%s3291_s8 + $0xe0] sm:$0xff] }
 0x37e   : > { %1484 = vperm.xlu1 %2411, %v2419_v20   ;;  %2223 = vmatpush3.bf16.msra.mxu1 %v2222_v30  ;;  %v1660_v20 = vld [vmem:[%s3290_s12 + $0x60] sm:$0xff]  ;;  %v2245_v28 = vpack.c.bf16 %v1769_v27, %v1768_v25  ;;  %v1781_v7 = vld [vmem:[%s3291_s8 + $0x68] sm:$0xff]  ;;  %v1798_v8 = vld [vmem:[%s3291_s8 + $0xf0] sm:$0xff] }
 0x37f   : > { %2224 = vmatprep.subr.bf16.mxu1 %v2593_v23  ;;  %v2241_v22 = vpack.c.bf16 %v1662_v21, %v1660_v20  ;;  %v1784_v23 = vld [vmem:[%s3291_s8 + $0x80] sm:$0xff]  ;;  %v1783_v13 = vld [vmem:[%s3291_s8 + $0x78] sm:$0xff] }
 0x380   : > { %v2243_v26 = vpack.c.bf16 %v1785_v24, %v1784_v23 }
 0x382   : > { %2226 = vmatpush3.bf16.msra.mxu1 %v2225_v33  ;;  %2244 = vmatprep.subr.bf16.mxu0 %v2243_v26  ;;  %v2087_v33 = vld [vmem:[%s3292_s25] ss:$0 sm:$0xff] }
 0x383   : > { %2228 = vmatprep.subr.bf16.mxu1 %v2227_v0  ;;  %2246 = vmatpush3.bf16.msra.mxu0 %v2245_v28  ;;  %v1778_v0 = vld [vmem:[%s3291_s8 + $0x50] sm:$0xff] }
 0x384   : > { %v2265_v4 = vpack.c.bf16 %v1779_v1, %v1778_v0 }
 0x3f8   : > { %v1490_v35 = vpop.permute.xlu0 %1489 }
 0x3f9   : > { %v1503_v37 = vmul.f32 %v1490_v35, %v1479_v34  ;;  %v1500_v38 = vpop.permute.xlu1 %1499  ;;  %v2088_v34 = vld [vmem:[%s3293_s27] ss:$0 sm:$0xff] }
 0x3fa   : > { %v1505_v40 = vmul.f32 %v1500_v38, %v1481_v36  ;;  %v1787_v38 = vld [vmem:[%s3291_s8 + $0x98] sm:$0xff] }
 0x3fb   : > { %1509 = vrot.lane.b32.xlu0 %v1503_v37, %s2596_s16  ;;  %v1786_v37 = vld [vmem:[%s3291_s8 + $0x90] sm:$0xff]  ;;  %s3295_s16 = sld [smem:[#allocation31_spill]] }
 0x3fc   : > { %v1495_v42 = vpop.permute.xlu0 %1494 }
 0x3fd   : > { %v1504_v43 = vmul.f32 %v1495_v42, %v1480_v39  ;;  %v1485_v44 = vpop.permute.xlu1 %1484  ;;  %v2247_v39 = vpack.c.bf16 %v1787_v38, %v1786_v37 }
 0x3fe   : > { %v1502_v45 = vmul.f32 %v1485_v44, %v1478_v41  ;;  %v1771_v41 = vld [vmem:[%s3291_s8 + $0x18] sm:$0xff]  ;;  %v1789_v44 = vld [vmem:[%s3291_s8 + $0xa8] sm:$0xff] }
 0x3ff   : > { %1515 = vrot.lane.b32.xlu1 %v1504_v43, %s2597_s7  ;;  %1521 = vrot.lane.b32.xlu0 %v1505_v40, %s2598_s28  ;;  %v1770_v40 = vld [vmem:[%s3291_s8 + $0x10] sm:$0xff]  ;;  %v1788_v43 = vld [vmem:[%s3291_s8 + $0xa0] sm:$0xff] }
 0x400   : > { %1507 = vst.msk [vmem:[#allocation5] sm:$0xff] %vm1506_vm8, %v1502_v45  ;;  %v2249_v42 = vpack.c.bf16 %v1771_v41, %v1770_v40  ;;  %2248 = vmatprep.subr.bf16.mxu0 %v2247_v39  ;;  %v2251_v45 = vpack.c.bf16 %v1789_v44, %v1788_v43 }
 0x402   : > { %2250 = vmatpush3.bf16.msra.mxu0 %v2249_v42 }
 0x403   : > { %2252 = vmatprep.subr.bf16.mxu0 %v2251_v45 }
 0x46d   : > { %v1510_v46 = vpop.permute.xlu0 %1509 }
 0x46e   : > { %1513 = vst.msk [vmem:[#allocation5] sm:$0xff] %vm1512_vm9, %v1510_v46  ;;  %v1772_v46 = vld [vmem:[%s3291_s8 + $0x20] sm:$0xff] }
 0x471   : > { %v1516_v47 = vpop.permute.xlu1 %1515  ;;  %v1522_v48 = vpop.permute.xlu0 %1521 }
 0x472   : > { %1519 = vst.msk [vmem:[#allocation5] sm:$0xff] %vm1518_vm10, %v1516_v47  ;;  %v1773_v47 = vld [vmem:[%s3291_s8 + $0x28] sm:$0xff] }
 0x473   : > { %1525 = vst.msk [vmem:[#allocation5] sm:$0xff] %vm1524_vm11, %v1522_v48  ;;  %v2253_v48 = vpack.c.bf16 %v1773_v47, %v1772_v46  ;;  %v2090_v46 = vld [vmem:[%s3295_s16] ss:$0 sm:$0xff] }
 0x475   : > { %2254 = vmatpush3.bf16.msra.mxu0 %v2253_v48 }
 0x47a   : > { %v1534_v49 = vld [vmem:[#allocation5] sm:$0xff] }
 0x47b   : > { %2213 = vmatmul.mubr.msk.f32.vlgmr.msra.gmra.mrb[0].mxu1 %vm1542_vm12, %v1534_v49  ;;  %v1790_v49 = vld [vmem:[%s3291_s8 + $0xb0] sm:$0xff] }
 0x47c   : > { %1743 = vmatprep.mubr.f32.mxu1 %v2595_v16  ;;  %2230 = vmatpush1.bf16.msra.mxu1 %v2229_v3  ;;  %v1797_v3 = vld [vmem:[%s3291_s8 + $0xe8] sm:$0xff] }
 0x47d   : > { %2232 = vmatprep.subr.bf16.mxu1 %v2231_v6  ;;  %v2267_v5 = vpack.c.bf16 %v1797_v3, %v1796_v2  ;;  %v1780_v6 = vld [vmem:[%s3291_s8 + $0x60] sm:$0xff] }
 0x47e   : > { %v2269_v10 = vpack.c.bf16 %v1781_v7, %v1780_v6 }
 0x480   : > { %2234 = vmatpush1.bf16.msra.mxu1 %v2233_v9  ;;  %v1799_v9 = vld [vmem:[%s3291_s8 + $0xf8] sm:$0xff] }
 0x481   : > { %2236 = vmatprep.subr.bf16.mxu1 %v2235_v12  ;;  %v2271_v11 = vpack.c.bf16 %v1799_v9, %v1798_v8  ;;  %v1782_v12 = vld [vmem:[%s3291_s8 + $0x70] sm:$0xff] }
 0x482   : > { %v2273_v14 = vpack.c.bf16 %v1783_v13, %v1782_v12 }
 0x484   : > { %2238 = vmatpush1.bf16.msra.mxu1 %v2237_v15  ;;  %v1666_v15 = vlaneseq }
 0x485   : > { %2240 = vmatprep.subr.bf16.mxu1 %v2239_v19  ;;  %v1664_v19 = vld [vmem:[%s3294_s20] sm:$0x3] }
 0x486   : > { %v1667_v17 = vshrl.u32 %v1666_v15, 7 }
 0x488   : > { %2242 = vmatpush1.bf16.msra.mxu1 %v2241_v22  ;;  %v1668_v18 = vsub.s32 0, %v1667_v17  ;;  %v1672_v20 = vsub.s32 1, %v1667_v17 }
 0x48a   : > { %v1669_v21 = vrot.slane %v1664_v19, %v1668_v18  ;;  %v1673_v22 = vrot.slane %v1664_v19, %v1672_v20 }
 0x54e   : > { %v1612_v51 = vpop.f32.mrb[0].mxu1 }
 0x54f   : > { %v1613_v53 = vadd.f32 %v2085_v50, %v1612_v51  ;;  %v2214_v54 = vpop.f32.mrb[1].mxu1  ;;  %v1791_v50 = vld [vmem:[%s3291_s8 + $0xb8] sm:$0xff]  ;;  %v1774_v51 = vld [vmem:[%s3291_s8 + $0x30] sm:$0xff] }
 0x550   : > { %v1792_v54 = vld [vmem:[%s3291_s8 + $0xc0] sm:$0xff] }
 0x551   : > { %v1617_v55 = vadd.f32 %v1616_v52, %v1613_v53  ;;  %v2255_v52 = vpack.c.bf16 %v1791_v50, %v1790_v49  ;;  %v1775_v53 = vld [vmem:[%s3291_s8 + $0x38] sm:$0xff] }
 0x553   : > { %v1620_v56 = vsel %vm1542_vm12, %v1617_v55, 0.0  ;;  %2256 = vmatprep.subr.bf16.mxu0 %v2255_v52 }
 0x554   : > { %1621 = vadd.xlane.f32.xlu1 %v1620_v56  ;;  %v2257_v56 = vpack.c.bf16 %v1775_v53, %v1774_v51 }
 0x556   : > { %2258 = vmatpush3.bf16.msra.mxu0 %v2257_v56 }
 0x5e1   : > { %v1622_v57 = vpop.xlane.xlu1 %1621 }
 0x5e2   : > { %v1624_v58 = vmul.f32 0.015625, %v1622_v57 }
 0x5e4   : > { %v1625_v59 = vsub.f32 %v1617_v55, %v1624_v58  ;;  %v1793_v55 = vld [vmem:[%s3291_s8 + $0xc8] sm:$0xff]  ;;  %v1776_v58 = vld [vmem:[%s3291_s8 + $0x40] sm:$0xff] }
 0x5e5   : > { %v2259_v57 = vpack.c.bf16 %v1793_v55, %v1792_v54 }
 0x5e6   : > { %v1626_v60 = vmul.f32 %v1625_v59, %v1625_v59 }
 0x5e7   : > { %2260 = vmatprep.subr.bf16.mxu0 %v2259_v57 }
 0x5e8   : > { %v1627_v61 = vsel %vm1542_vm12, %v1626_v60, 0.0  ;;  %v1794_v60 = vld [vmem:[%s3291_s8 + $0xd0] sm:$0xff] }
 0x5e9   : > { %1628 = vadd.xlane.f32.xlu0 %v1627_v61  ;;  %v1795_v61 = vld [vmem:[%s3291_s8 + $0xd8] sm:$0xff] }
 0x5ea   : > { %v2263_v63 = vpack.c.bf16 %v1795_v61, %v1794_v60 }
 0x676   : > { %v1629_v29 = vpop.xlane.xlu0 %1628 }
 0x677   : > { %v1630_v30 = vmul.f32 0.015625, %v1629_v29 }
 0x679   : > { %v1631_v31 = vadd.f32 1e-05, %v1630_v30 }
 0x67b   : > { %2420 = vrsqrt.f32 %v1631_v31 }
 0x685   : > { %v2421_v32 = vpop.eup %2420 }
 0x686   : > { %v1633_v16 = vmul.f32 %v2421_v32, %v1625_v59  ;;  %v1777_v59 = vld [vmem:[%s3291_s8 + $0x48] sm:$0xff] }
 0x687   : > { %v2261_v62 = vpack.c.bf16 %v1777_v59, %v1776_v58 }
 0x688   : > { %v1640_v35 = vmul.f32 %v2087_v33, %v1633_v16 }
 0x689   : > { %2262 = vmatpush3.bf16.msra.mxu0 %v2261_v62 }
 0x68a   : > { %v3070_v36 = vadd.f32 %v2088_v34, %v1640_v35  ;;  %2264 = vmatprep.subr.bf16.mxu0 %v2263_v63 }
 0x68c   : > { %2089 = vmatmul.mubr.msk.f32.vlgmr.msra.gmra.mrb[2].mxu1 %vm1542_vm12, %v3070_v36 }
 0x68d   : > { %2266 = vmatpush3.bf16.msra.mxu0 %v2265_v4 }
 0x68e   : > { %2268 = vmatprep.subr.bf16.mxu0 %v2267_v5 }
 0x691   : > { %2270 = vmatpush3.bf16.msra.mxu0 %v2269_v10 }
 0x692   : > { %2272 = vmatprep.subr.bf16.mxu0 %v2271_v11 }
 0x695   : > { %2274 = vmatpush3.bf16.msra.mxu0 %v2273_v14 }
 0x75f   : > { %v1745_v23 = vpop.f32.mrb[2].mxu1 }
 0x760   : > { %v1746_v24 = vadd.f32 %v1745_v23, %v1669_v21  ;;  %v1747_v25 = vpop.f32.mrb[3].mxu1 }
 0x761   : > { %v1748_v26 = vadd.f32 %v1747_v25, %v1673_v22 }
 0x762   : > { %v1752_v27 = vmul.f32 0.044715, %v1746_v24  ;;  %v1750_v42 = vmul.f32 0.5, %v1746_v24 }
 0x763   : > { %v1753_v28 = vmul.f32 0.044715, %v1748_v26  ;;  %v1751_v40 = vmul.f32 0.5, %v1748_v26 }
 0x764   : > { %v1754_v29 = vmul.f32 %v1752_v27, %v1746_v24 }
 0x765   : > { %v1755_v30 = vmul.f32 %v1753_v28, %v1748_v26 }
 0x766   : > { %v1756_v31 = vmul.f32 %v1754_v29, %v1746_v24 }
 0x767   : > { %v1757_v32 = vmul.f32 %v1755_v30, %v1748_v26 }
 0x768   : > { %v1758_v33 = vadd.f32 %v1756_v31, %v1746_v24 }
 0x769   : > { %v1759_v16 = vadd.f32 %v1757_v32, %v1748_v26 }
 0x76a   : > { %v1760_v34 = vmul.f32 0.7978846, %v1758_v33 }
 0x76b   : > { %v1761_v35 = vmul.f32 0.7978846, %v1759_v16 }
 0x76c   : > { %2422 = vtanh.f32 %v1760_v34 }
 0x76d   : > { %2424 = vtanh.f32 %v1761_v35 }
 0x776   : > { %v2423_v37 = vpop.eup %2422 }
 0x777   : > { %v2425_v38 = vpop.eup %2424  ;;  %v1764_v39 = vadd.f32 1.0, %v2423_v37 }
 0x778   : > { %v1765_v41 = vadd.f32 1.0, %v2425_v38 }
 0x779   : > { %v1766_v44 = vmul.f32 %v1764_v39, %v1750_v42 }
 0x77a   : > { %v1767_v43 = vmul.f32 %v1765_v41, %v1751_v40 }
 0x77c   : > { %1871 = vmatprep.mubr.f32.mxu0 %v1767_v43 }
 0x77d   : > { %1872 = vmatmul.mubr.f32.vlgmr.msra.gmra.mrb[0].mxu0 %v1766_v44 }
 0x850   : > { %v2153_v45 = vpop.f32.mrb[0].mxu0 }
 0x851   : > { %v2154_v47 = vpop.f32.mrb[1].mxu0 }
 0x852   : > { %v2155_v48 = vadd.f32 %v2154_v47, %v2153_v45 }
 0x854   : > { %v1874_v49 = vadd.f32 %v2155_v48, %v2090_v46 }
 0x856   : > { %v1877_v50 = vadd.f32 %v1874_v49, %v3070_v36 }
 0x858   : > { %1878 = vst.msk [vmem:[%s2885_s19] sm:$0xff] %vm1542_vm12, %v1877_v50 }
 0x859 PF: > { %s3296_s7 = sld [smem:[#allocation17_spill]]  ;;  %s3297_s28 = sld [smem:[#allocation16_spill]] }
 0x85a   : > { %s1895_s25 = sshll.u32 %s2885_s19, 4  ;;  %s3298_s21 = sld [smem:[#allocation32_spill]]  ;;  %s3170_s25 = int_to_ptr.vmem [resolvable:$true] %s1895_s25 }
 0x85b   : > { %s1880_s5 = scalar_lea.sflag [#allocation8], %s2867_s4  ;;  %s2454_s26 = scalar_lea.vmem %s3170_s25, 128 }
 0x85c   : > { %p2455_p5 = scmp.ne.s32.totalorder %s3170_s25, %s2454_s26  ;;  %p3300_p10 = scmp.ne.s32.totalorder %s3280_s11, 0 }
 0x85d   : > { %s2599_s16 = smov [#allocation12]  }
 0x85e   : > { %p2456_p1 = pnand %p2455_p5, %p3300_p10 }
 0x85f   : > { %s2092_s18 = sshll.u32 %s3296_s7, 2  ;;  %s2458_s7 = sshll.u32 %s2599_s16, 4  ;;  %s2459_s7 = int_to_ptr.vmem [resolvable:$false] %s2458_s7 }
 0x860   : > { %s1891_s29 = sadd.s32 %s3297_s28, %s2092_s18  ;;  %s3299_s15 = smov %s3298_s21 }
 0x861   : > { %s2093_s10 = sshll.u32 %s1891_s29, 7  ;;  %p2457_p2 = pneg %p2456_p1 }
 0x862   : > { %s1893_s20 = scalar_lea.hbm %s3298_s21, %s2093_s10  ;;  %s2460_s19 = scalar_lea.vmem %s2459_s7, 256 }
 0x863   : > { %p2461_p11 = scmp.lt.s32.totalorder %s3170_s25, %s2459_s7  ;;  %p2462_p6 = scmp.lt.s32.totalorder %s2460_s19, %s2454_s26 }
 0x865   : > { %p2463_p8 = por %p2462_p6, %p2461_p11 }
 0x867   : > { %p2464_p0 = pnand %p2463_p8, %p2457_p2 }
 0x869   : > { %2467 = shalt.err (!%p2464_p0)
}
 0x86a   : > { %s2468_s28 = scalar_lea.hbm %s1893_s20, 128  ;;  %s2472_s29 = scalar_lea.hbm %s3299_s15, 1024 }
 0x86b   : > { %p2469_p7 = scmp.ne.s32.totalorder %s1893_s20, %s2468_s28  ;;  %p2473_p12 = scmp.lt.u32.totalorder %s1893_s20, %s3299_s15 }
 0x86c   : > { %p2474_p13 = scmp.lt.u32.totalorder %s2472_s29, %s2468_s28  ;;  %p2476_p5 = scmp.lt.u32.totalorder %s2468_s28, %s1893_s20 }
 0x86d   : > { %p2470_p9 = pnand %p2469_p7, %p3300_p10 }
 0x86e   : > { %p2475_p4 = por %p2474_p13, %p2473_p12 }
 0x86f   : > { %p2471_p3 = pneg %p2470_p9 }
 0x870   : > { %p2477_p1 = por %p2476_p5, %p2475_p4 }
 0x872   : > { %p2478_p2 = pnand %p2477_p1, %p2471_p3 }
 0x874   : > { %2481 = shalt.err (!%p2478_p2)
}
 0x875   : > { %2277 = dma.vmem_to_hbm [thread:$0]  (%p3300_p10), %s3170_s25, 128, %s1893_s20, %s1880_s5  }
 0x876 PF: > { %p2283_p11 = scmp.ge.s32.totalorder %s2584_s14, 2  ;;  %s1907_s27 = sand.u32 1, %s2548_s23  }
 0x877   : > { %p3301_p6 = scmp.ne.s32.totalorder %s3281_s6, 0  ;;  %s1908_s21 = scalar_lea.sflag [#allocation8], %s1907_s27 }
 0x879   : > { %p2280_p8 = pnand %p2283_p11, %p3301_p6 }
 0x87b   : > { %2535 = dma.done.wait (!%p2280_p8), %s1908_s21, 128  }
 0x87c   : > { %2537 = vsyncadd (!%p2280_p8), %s1908_s21, 4294967168  ;;  %s28_s14 = sadd.s32 1, %s2584_s14   ;;  %s3302_s26 = sld [smem:[#allocation23_spill]] }
 0x87d   : > { %p25_p0 = scmp.ge.s32.totalorder %s28_s14, 34   ;;  %s3303_s11 = sld [smem:[#allocation15_spill]] }
 0x87e   : > { %s3304_s25 = sld [smem:[#allocation22_spill]]  ;;  %s3305_s20 = sld [smem:[#allocation18_spill]] }
 0x87f   : > { %s3306_s29 = sld [smem:[#allocation19_spill]]  ;;  %s3307_s5 = sld [smem:[#allocation20_spill]] }
 0x880   : > { %s3308_s16 = sld [smem:[#allocation21_spill]]  ;;  %s3309_s21 = smov %s2544_s22 }
 0x881   : > { %s3311_s23 = smov %s2552_s24  ;;  %s3314_s27 = smov %s2576_s30 }
 0x882   : > { %s3310_s22 = smov %s3302_s26  ;;  %s3315_s28 = smov %s2580_s13 }
 0x883   : > { %s3312_s24 = smov %s3303_s11  ;;  %27 = sbr.rel (!%p25_p0) target bundleno = 19 (0x13), region = 263 }
 0x884   : > { %s3313_s26 = smov %s3305_s20 }
 0x885   : > { %s3316_s30 = smov %s3307_s5 }
 0x886   : > { %s3317_s13 = smov %s3308_s16 }
 0x88a   :  { %1913 = vsyncpa [#allocation7], 1 }
 0x88b   :  { %1915 = vsyncpa [#allocation7 + $0x1], 1 }
 0x88c   :  { %1916 = vsyncpa [#allocation8], 1 }
 0x88d   :  { %1918 = vsyncpa [#allocation8 + $0x1], 1 }

</bundles_post_ra>
